<compile_context>
chip_gen: v7x
topology: tpu7x:2x2x1
jax: 0.10.0
libtpu: 0.0.40
codegen_flags: <defaults>
</compile_context>

<pallas_src>
import numpy as np

import jax
import jax.numpy as jnp
from jax.experimental import pallas as pl
from jax.experimental.pallas import tpu as pltpu

_EPS = 1e-5  # nn.BatchNorm2d default


# ---------------------------------------------------------------------------
# The single fused Pallas kernel
# ---------------------------------------------------------------------------
def _basic_cnn_kernel(
    x1_ref, x2_ref,                    # input, split + laid out in glue
    w0_ref, b0_ref,                    # layer0 (1x1 conv, block-diagonal)
    sel1_ref, band1_ref, b1_ref,       # layer1 (conv3x3 pad=3 + BN + ReLU + pool)
    sel2_ref, band2_ref, b2_ref,       # layer2 (conv3x3 pad=1 + BN + ReLU + pool)
    sel3_ref, band3_ref, b3_ref,       # layer3 (conv3x3 pad=1 + BN + ReLU + pool)
    wf1_ref, bf1_ref, wf2_ref, bf2_ref,  # fc head
    o_ref,
):
    f32, bf16 = jnp.float32, jnp.bfloat16

    def conv_bn_relu_pool(act, sel_ref, band_ref, bias_ref):
        # act: (B*Hin, Win*Cin) bf16, rows (b,h), lanes (w,c).
        # Sel_s (s = ki+dh) selects input rows h = 2*hp + s - pad (zero rows
        # realise the H zero-padding); Band[2*ki+dw] applies the three kj taps,
        # the W zero-padding and the W-pool parity dw.  2x2 maxpool == max over
        # the four (dh,dw) quadrants; folded BN bias + ReLU commute with it.
        v = [jnp.dot(sel_ref[s], act, preferred_element_type=f32).astype(bf16)
             for s in range(4)]
        quad = None
        for dh in (0, 1):
            for dw in (0, 1):
                q = None
                for ki in (0, 1, 2):
                    t = jnp.dot(v[ki + dh], band_ref[2 * ki + dw],
                                preferred_element_type=f32)
                    q = t if q is None else q + t
                quad = q if quad is None else jnp.maximum(quad, q)
        return jnp.maximum(quad + bias_ref[...], 0.0).astype(bf16)

    # --- layer0: 1x1 conv (block-diag weights) + folded BN + ReLU, written into
    #     lanes c>=4 next to the raw x1 passthrough lanes (== torch.cat). -------
    y0 = jnp.dot(x2_ref[...], w0_ref[...], preferred_element_type=f32)
    y0 = jnp.maximum(y0 + b0_ref[...], 0.0)                 # 0 on the x1 lanes
    act = (y0 + x1_ref[...].astype(f32)).astype(bf16)       # (B*12, 12*12)

    # --- layer1/2/3: conv3x3 + BN + ReLU + 2x2 maxpool, all as 2-D matmuls -----
    act = conv_bn_relu_pool(act, sel1_ref, band1_ref, b1_ref)   # (B*8, 8*16)
    act = conv_bn_relu_pool(act, sel2_ref, band2_ref, b2_ref)   # (B*4, 4*32)
    act = conv_bn_relu_pool(act, sel3_ref, band3_ref, b3_ref)   # (2*B, 2*64), rows (hp,b)

    # --- head: NCHW flatten folded into row-permuted fc1 weights ---------------
    bsz = o_ref.shape[0]
    h1 = (jnp.dot(act[0:bsz, :], wf1_ref[0], preferred_element_type=f32)      # hp = 0 rows
          + jnp.dot(act[bsz:2 * bsz, :], wf1_ref[1], preferred_element_type=f32)  # hp = 1 rows
          + bf1_ref[...])
    h1 = jnp.maximum(h1, 0.0)                                                 # (B, 8) f32
    logit = jnp.sum(h1 * wf2_ref[...], axis=1, keepdims=True) + bf2_ref[...]  # (B, 1)
    o_ref[...] = 0.5 * (jnp.tanh(0.5 * logit) + 1.0)          # sigmoid on the EUP


def basic_cnn_fused(x1m, x2m, kp, batch):
    args = (x1m, x2m,
            kp["w0"], kp["b0"],
            kp["sel1"], kp["band1"], kp["b1"],
            kp["sel2"], kp["band2"], kp["b2"],
            kp["sel3"], kp["band3"], kp["b3"],
            kp["wf1"], kp["bf1"], kp["wf2"], kp["bf2"])
    vmem_spec = lambda: pl.BlockSpec(memory_space=pltpu.MemorySpace.VMEM)
    return pl.pallas_call(
        _basic_cnn_kernel,
        out_shape=jax.ShapeDtypeStruct((batch, 1), jnp.float32),
        in_specs=[vmem_spec() for _ in args],     # whole-array VMEM residency
        out_specs=vmem_spec(),
        compiler_params=pltpu.CompilerParams(),
    )(*args)


def basic_cnn_forward(x, kparams):
    # x: (B, 44, L, L) NCHW (PyTorch layout), L = 12.
    b, c, h, w = x.shape
    x_nhwc = jnp.transpose(x, (0, 2, 3, 1)).astype(jnp.float32)
    # 1x1-conv branch input: rows (b,h), lanes (w, cin) for channels 4:44.
    x2m = x_nhwc[..., 4:].reshape(b * h, w * (c - 4)).astype(jnp.bfloat16)
    # Passthrough branch embedded at lanes (w, 0:4) of the 12-channel layout.
    x1m = jnp.pad(x_nhwc[..., :4], ((0, 0), (0, 0), (0, 0), (0, 8)))
    x1m = x1m.reshape(b * h, w * 12).astype(jnp.bfloat16)
    return basic_cnn_fused(x1m, x2m, kparams, b)


# ---------------------------------------------------------------------------
# Parameter preparation: fold BN, build banded / selection / permuted matrices
# (runs once at init time, outside the jitted forward)
# ---------------------------------------------------------------------------
def _fold_bn(w, b, gamma, beta, mean, var):
    # PyTorch conv weight (O,I,kh,kw) + eval-mode BN -> w_eff[kh,kw,cin,cout], bias_eff[cout]
    s = gamma / jnp.sqrt(var + _EPS)
    w_eff = jnp.transpose(w, (2, 3, 1, 0)) * s
    bias_eff = (b - mean) * s + beta
    return np.asarray(w_eff, np.float32), np.asarray(bias_eff, np.float32)


def _build_bands(w_eff, w_in, pad):
    # (3,3,cin,cout) -> (6, w_in*cin, wp*cout); flat index = 2*ki + dw.
    kh, kw, cin, cout = w_eff.shape
    w_out = w_in + 2 * pad - 2
    assert w_out % 2 == 0, "maxpool(2) needs an even conv output width"
    wp = w_out // 2
    bands = np.zeros((kh, 2, w_in * cin, wp * cout), np.float32)
    for ki in range(kh):
        for dw in range(2):
            for wph in range(wp):
                wo = 2 * wph + dw
                for kj in range(kw):
                    wi = wo + kj - pad
                    if 0 <= wi < w_in:
                        bands[ki, dw,
                              wi * cin:(wi + 1) * cin,
                              wph * cout:(wph + 1) * cout] = w_eff[ki, kj]
    return jnp.asarray(bands.reshape(kh * 2, w_in * cin, wp * cout), jnp.bfloat16)


def _build_sels(h_in, pad, batch, batch_major_out=True):
    # (4, batch*hp, batch*h_in); Sel_s picks input row h = 2*hp + s - pad
    # (missing rows == H zero-padding).  batch_major_out=False -> rows (hp, b).
    h_out = h_in + 2 * pad - 2
    assert h_out % 2 == 0
    hp = h_out // 2
    sels = np.zeros((4, batch * hp, batch * h_in), np.float32)
    for s in range(4):
        for b in range(batch):
            for hpp in range(hp):
                hi = 2 * hpp + s - pad
                if 0 <= hi < h_in:
                    r = b * hp + hpp if batch_major_out else hpp * batch + b
                    sels[s, r, b * h_in + hi] = 1.0
    return jnp.asarray(sels, jnp.bfloat16)


def _bias_tile(bias_eff, wp):
    # per-channel folded BN bias tiled over the pooled w positions: lanes (wp, cout)
    return jnp.asarray(np.tile(bias_eff, wp)[None, :], jnp.float32)


def _build_layer0(w_eff_1x1, bias_eff, w_in, c_pass):
    # 1x1 conv as a block-diagonal matmul over lanes (w, cin); output lands in
    # lanes (w, c_pass:c_pass+cout) so torch.cat([x1, y0], 1) is just an add.
    cin, cout = w_eff_1x1.shape
    ctot = c_pass + cout
    w0 = np.zeros((w_in * cin, w_in * ctot), np.float32)
    b0 = np.zeros((1, w_in * ctot), np.float32)
    for w in range(w_in):
        w0[w * cin:(w + 1) * cin, w * ctot + c_pass:(w + 1) * ctot] = w_eff_1x1
        b0[0, w * ctot + c_pass:(w + 1) * ctot] = bias_eff
    return jnp.asarray(w0, jnp.bfloat16), jnp.asarray(b0, jnp.float32)


def _build_fc_head(w1, b1, w2, b2):
    # fc1 weight (8, 256); PyTorch flatten orders features as (c, hp, wp).
    # Re-row it to the kernel layout (hp-selected rows, lanes = wp*64 + c).
    w1 = np.asarray(w1, np.float32)
    wf1 = np.zeros((2, 128, 8), np.float32)
    for hp in range(2):
        for wp in range(2):
            for cc in range(64):
                wf1[hp, wp * 64 + cc, :] = w1[:, cc * 4 + hp * 2 + wp]
    return (jnp.asarray(wf1, jnp.bfloat16),
            jnp.asarray(np.asarray(b1, np.float32)[None, :], jnp.float32),   # (1, 8)
            jnp.asarray(np.asarray(w2, np.float32), jnp.float32),            # (1, 8)
            jnp.asarray(np.asarray(b2, np.float32)[None, :], jnp.float32))   # (1, 1)


def prepare_kernel_params(raw, batch, length=12):
    assert length == 12, "fc1 in-features 2*2*64 implies a 12x12 spatial input"
    w0e, b0e = _fold_bn(*raw["layer0"])
    w1e, b1e = _fold_bn(*raw["layer1"])
    w2e, b2e = _fold_bn(*raw["layer2"])
    w3e, b3e = _fold_bn(*raw["layer3"])
    w0b, b0t = _build_layer0(w0e[0, 0], b0e, length, 4)
    kp = {
        "w0": w0b, "b0": b0t,
        "sel1": _build_sels(length, 3, batch),                      # 12 -> conv 16 -> pool 8
        "band1": _build_bands(w1e, length, 3), "b1": _bias_tile(b1e, 8),
        "sel2": _build_sels(8, 1, batch),                           # 8 -> 8 -> 4
        "band2": _build_bands(w2e, 8, 1), "b2": _bias_tile(b2e, 4),
        "sel3": _build_sels(4, 1, batch, batch_major_out=False),    # 4 -> 4 -> 2, rows (hp,b)
        "band3": _build_bands(w3e, 4, 1), "b3": _bias_tile(b3e, 2),
    }
    wf1, bf1, wf2, bf2 = _build_fc_head(raw["fc1"][0], raw["fc1"][1],
                                        raw["fc2"][0], raw["fc2"][1])
    kp.update({"wf1": wf1, "bf1": bf1, "wf2": wf2, "bf2": bf2})
    return kp


# ---------------------------------------------------------------------------
# Random PyTorch-layout parameters + pure-JAX reference of the module
# ---------------------------------------------------------------------------
def _init_conv_bn(key, cin, cout, ksize):
    kw, kb, kg, kbe, km, kv = jax.random.split(key, 6)
    fan_in = cin * ksize * ksize
    w = jax.random.normal(kw, (cout, cin, ksize, ksize), jnp.float32) / np.sqrt(fan_in)
    b = 0.05 * jax.random.normal(kb, (cout,), jnp.float32)
    gamma = 1.0 + 0.1 * jax.random.normal(kg, (cout,), jnp.float32)
    beta = 0.1 * jax.random.normal(kbe, (cout,), jnp.float32)
    mean = 0.1 * jax.random.normal(km, (cout,), jnp.float32)
    var = 1.0 + 0.1 * jnp.abs(jax.random.normal(kv, (cout,), jnp.float32))
    return (w, b, gamma, beta, mean, var)


def init_raw_params(key):
    k0, k1, k2, k3, kf1, kf2 = jax.random.split(key, 6)
    kw1, kb1 = jax.random.split(kf1)
    kw2, kb2 = jax.random.split(kf2)
    return {
        "layer0": _init_conv_bn(k0, 40, 8, 1),
        "layer1": _init_conv_bn(k1, 12, 16, 3),
        "layer2": _init_conv_bn(k2, 16, 32, 3),
        "layer3": _init_conv_bn(k3, 32, 64, 3),
        "fc1": (jax.random.normal(kw1, (8, 256), jnp.float32) / 16.0,
                0.05 * jax.random.normal(kb1, (8,), jnp.float32)),
        "fc2": (jax.random.normal(kw2, (1, 8), jnp.float32) / np.sqrt(8.0),
                0.05 * jax.random.normal(kb2, (1,), jnp.float32)),
    }


def reference_forward(x, raw):
    # Pure-JAX/XLA transcription of basicCnn.forward (eval-mode BN), f32.
    def conv_bn_relu(h, p, pad):
        w, b, gamma, beta, mean, var = p
        y = jax.lax.conv_general_dilated(
            h, w, window_strides=(1, 1), padding=[(pad, pad), (pad, pad)],
            dimension_numbers=("NCHW", "OIHW", "NCHW"))
        y = y + b[None, :, None, None]
        y = ((y - mean[None, :, None, None])
             * (gamma[None, :, None, None] / jnp.sqrt(var[None, :, None, None] + _EPS))
             + beta[None, :, None, None])
        return jnp.maximum(y, 0.0)

    def maxpool2(h):
        return jax.lax.reduce_window(h, -jnp.inf, jax.lax.max,
                                     (1, 1, 2, 2), (1, 1, 2, 2), "VALID")

    x1, x2 = x[:, :4], x[:, 4:]
    h = jnp.concatenate([x1, conv_bn_relu(x2, raw["layer0"], 0)], axis=1)
    h = maxpool2(conv_bn_relu(h, raw["layer1"], 3))
    h = maxpool2(conv_bn_relu(h, raw["layer2"], 1))
    h = maxpool2(conv_bn_relu(h, raw["layer3"], 1))
    h = h.reshape(h.shape[0], -1)
    w1, b1 = raw["fc1"]
    w2, b2 = raw["fc2"]
    h = jnp.maximum(h @ w1.T + b1, 0.0)
    return jax.nn.sigmoid(h @ w2.T + b2)


if __name__ == "__main__":
    key = jax.random.PRNGKey(0)
    kx, kparam = jax.random.split(key)

    # Input implied by the module: 4 + 40 channels; spatial 12 so that
    # layer1(pad=3) -> 16 -> pool 8 -> 4 -> 2, matching fc1 in-features 2*2*64.
    batch, length = 2, 12
    x = jax.random.normal(kx, (batch, 44, length, length), jnp.float32)  # NCHW

    raw = init_raw_params(kparam)
    kparams = prepare_kernel_params(raw, batch, length)

    fwd = jax.jit(basic_cnn_forward)
    out = jax.block_until_ready(fwd(x, kparams))

    assert out.shape == (batch, 1)
    assert bool(jnp.all(jnp.isfinite(out)))
    assert bool(jnp.all((out >= 0.0) & (out <= 1.0)))

    # Cross-check against the pure-JAX reference (bf16 matmul operands in the
    # kernel, f32 accumulation -> small tolerance on the sigmoid output).
    ref = jax.block_until_ready(reference_forward(x, raw))
    max_err = float(jnp.max(jnp.abs(out - ref)))
    assert max_err < 5e-2, f"kernel deviates from reference: max abs err {max_err}"

    print("KERNEL_OK")
</pallas_src>

<mosaic_0001>
module attributes {stable_mosaic.version = 11 : i64} {
  func.func @_basic_cnn_kernel(%arg0: memref<24x144xbf16, #tpu.memory_space<vmem>>, %arg1: memref<24x480xbf16, #tpu.memory_space<vmem>>, %arg2: memref<480x144xbf16, #tpu.memory_space<vmem>>, %arg3: memref<1x144xf32, #tpu.memory_space<vmem>>, %arg4: memref<4x16x24xbf16, #tpu.memory_space<vmem>>, %arg5: memref<6x144x128xbf16, #tpu.memory_space<vmem>>, %arg6: memref<1x128xf32, #tpu.memory_space<vmem>>, %arg7: memref<4x8x16xbf16, #tpu.memory_space<vmem>>, %arg8: memref<6x128x128xbf16, #tpu.memory_space<vmem>>, %arg9: memref<1x128xf32, #tpu.memory_space<vmem>>, %arg10: memref<4x4x8xbf16, #tpu.memory_space<vmem>>, %arg11: memref<6x128x128xbf16, #tpu.memory_space<vmem>>, %arg12: memref<1x128xf32, #tpu.memory_space<vmem>>, %arg13: memref<2x128x8xbf16, #tpu.memory_space<vmem>>, %arg14: memref<1x8xf32, #tpu.memory_space<vmem>>, %arg15: memref<1x8xf32, #tpu.memory_space<vmem>>, %arg16: memref<1x1xf32, #tpu.memory_space<vmem>>, %arg17: memref<2x1xf32, #tpu.memory_space<vmem>>) attributes {dimension_semantics = [], scalar_prefetch = 0 : i64, scratch_operands = 0 : i64, tpu.core_type = #tpu.core_type<tc>} {
    %c0 = arith.constant 0 : index
    %c0_0 = arith.constant 0 : index
    %0 = vector.load %arg1[%c0, %c0_0] : memref<24x480xbf16, #tpu.memory_space<vmem>>, vector<24x480xbf16>
    %c0_1 = arith.constant 0 : index
    %c0_2 = arith.constant 0 : index
    %1 = vector.load %arg2[%c0_1, %c0_2] : memref<480x144xbf16, #tpu.memory_space<vmem>>, vector<480x144xbf16>
    %cst = arith.constant dense<0.000000e+00> : vector<24x144xf32>
    %2 = tpu.matmul %0, %1, %cst {dimension_numbers = #tpu.dot_dimension_numbers<[1], [0], [0], [1], [0, 0, 1, 1], [], []>} : vector<24x480xbf16>, vector<480x144xbf16>, vector<24x144xf32> -> vector<24x144xf32>
    %c0_3 = arith.constant 0 : index
    %c0_4 = arith.constant 0 : index
    %3 = vector.load %arg3[%c0_3, %c0_4] : memref<1x144xf32, #tpu.memory_space<vmem>>, vector<1x144xf32>
    %4 = vector.broadcast %3 : vector<1x144xf32> to vector<24x144xf32>
    %5 = arith.addf %2, %4 : vector<24x144xf32>
    %cst_5 = arith.constant 0.000000e+00 : f32
    %6 = vector.broadcast %cst_5 : f32 to vector<24x144xf32>
    %7 = arith.maximumf %5, %6 : vector<24x144xf32>
    %c0_6 = arith.constant 0 : index
    %c0_7 = arith.constant 0 : index
    %8 = vector.load %arg0[%c0_6, %c0_7] : memref<24x144xbf16, #tpu.memory_space<vmem>>, vector<24x144xbf16>
    %9 = arith.extf %8 : vector<24x144xbf16> to vector<24x144xf32>
    %10 = arith.addf %7, %9 : vector<24x144xf32>
    %11 = arith.truncf %10 : vector<24x144xf32> to vector<24x144xbf16>
    %c0_8 = arith.constant 0 : index
    %c0_9 = arith.constant 0 : index
    %c0_10 = arith.constant 0 : index
    %12 = vector.load %arg4[%c0_8, %c0_9, %c0_10] : memref<4x16x24xbf16, #tpu.memory_space<vmem>>, vector<1x16x24xbf16>
    %13 = vector.shape_cast %12 : vector<1x16x24xbf16> to vector<16x24xbf16>
    %cst_11 = arith.constant dense<0.000000e+00> : vector<16x144xf32>
    %14 = tpu.matmul %13, %11, %cst_11 {dimension_numbers = #tpu.dot_dimension_numbers<[1], [0], [0], [1], [0, 0, 1, 1], [], []>} : vector<16x24xbf16>, vector<24x144xbf16>, vector<16x144xf32> -> vector<16x144xf32>
    %15 = arith.truncf %14 : vector<16x144xf32> to vector<16x144xbf16>
    %c1 = arith.constant 1 : index
    %c0_12 = arith.constant 0 : index
    %c0_13 = arith.constant 0 : index
    %16 = vector.load %arg4[%c1, %c0_12, %c0_13] : memref<4x16x24xbf16, #tpu.memory_space<vmem>>, vector<1x16x24xbf16>
    %17 = vector.shape_cast %16 : vector<1x16x24xbf16> to vector<16x24xbf16>
    %cst_14 = arith.constant dense<0.000000e+00> : vector<16x144xf32>
    %18 = tpu.matmul %17, %11, %cst_14 {dimension_numbers = #tpu.dot_dimension_numbers<[1], [0], [0], [1], [0, 0, 1, 1], [], []>} : vector<16x24xbf16>, vector<24x144xbf16>, vector<16x144xf32> -> vector<16x144xf32>
    %19 = arith.truncf %18 : vector<16x144xf32> to vector<16x144xbf16>
    %c2 = arith.constant 2 : index
    %c0_15 = arith.constant 0 : index
    %c0_16 = arith.constant 0 : index
    %20 = vector.load %arg4[%c2, %c0_15, %c0_16] : memref<4x16x24xbf16, #tpu.memory_space<vmem>>, vector<1x16x24xbf16>
    %21 = vector.shape_cast %20 : vector<1x16x24xbf16> to vector<16x24xbf16>
    %cst_17 = arith.constant dense<0.000000e+00> : vector<16x144xf32>
    %22 = tpu.matmul %21, %11, %cst_17 {dimension_numbers = #tpu.dot_dimension_numbers<[1], [0], [0], [1], [0, 0, 1, 1], [], []>} : vector<16x24xbf16>, vector<24x144xbf16>, vector<16x144xf32> -> vector<16x144xf32>
    %23 = arith.truncf %22 : vector<16x144xf32> to vector<16x144xbf16>
    %c3 = arith.constant 3 : index
    %c0_18 = arith.constant 0 : index
    %c0_19 = arith.constant 0 : index
    %24 = vector.load %arg4[%c3, %c0_18, %c0_19] : memref<4x16x24xbf16, #tpu.memory_space<vmem>>, vector<1x16x24xbf16>
    %25 = vector.shape_cast %24 : vector<1x16x24xbf16> to vector<16x24xbf16>
    %cst_20 = arith.constant dense<0.000000e+00> : vector<16x144xf32>
    %26 = tpu.matmul %25, %11, %cst_20 {dimension_numbers = #tpu.dot_dimension_numbers<[1], [0], [0], [1], [0, 0, 1, 1], [], []>} : vector<16x24xbf16>, vector<24x144xbf16>, vector<16x144xf32> -> vector<16x144xf32>
    %27 = arith.truncf %26 : vector<16x144xf32> to vector<16x144xbf16>
    %c0_21 = arith.constant 0 : index
    %c0_22 = arith.constant 0 : index
    %c0_23 = arith.constant 0 : index
    %28 = vector.load %arg5[%c0_21, %c0_22, %c0_23] : memref<6x144x128xbf16, #tpu.memory_space<vmem>>, vector<1x144x128xbf16>
    %29 = vector.shape_cast %28 : vector<1x144x128xbf16> to vector<144x128xbf16>
    %cst_24 = arith.constant dense<0.000000e+00> : vector<16x128xf32>
    %30 = tpu.matmul %15, %29, %cst_24 {dimension_numbers = #tpu.dot_dimension_numbers<[1], [0], [0], [1], [0, 0, 1, 1], [], []>} : vector<16x144xbf16>, vector<144x128xbf16>, vector<16x128xf32> -> vector<16x128xf32>
    %c2_25 = arith.constant 2 : index
    %c0_26 = arith.constant 0 : index
    %c0_27 = arith.constant 0 : index
    %31 = vector.load %arg5[%c2_25, %c0_26, %c0_27] : memref<6x144x128xbf16, #tpu.memory_space<vmem>>, vector<1x144x128xbf16>
    %32 = vector.shape_cast %31 : vector<1x144x128xbf16> to vector<144x128xbf16>
    %cst_28 = arith.constant dense<0.000000e+00> : vector<16x128xf32>
    %33 = tpu.matmul %19, %32, %cst_28 {dimension_numbers = #tpu.dot_dimension_numbers<[1], [0], [0], [1], [0, 0, 1, 1], [], []>} : vector<16x144xbf16>, vector<144x128xbf16>, vector<16x128xf32> -> vector<16x128xf32>
    %34 = arith.addf %30, %33 : vector<16x128xf32>
    %c4 = arith.constant 4 : index
    %c0_29 = arith.constant 0 : index
    %c0_30 = arith.constant 0 : index
    %35 = vector.load %arg5[%c4, %c0_29, %c0_30] : memref<6x144x128xbf16, #tpu.memory_space<vmem>>, vector<1x144x128xbf16>
    %36 = vector.shape_cast %35 : vector<1x144x128xbf16> to vector<144x128xbf16>
    %cst_31 = arith.constant dense<0.000000e+00> : vector<16x128xf32>
    %37 = tpu.matmul %23, %36, %cst_31 {dimension_numbers = #tpu.dot_dimension_numbers<[1], [0], [0], [1], [0, 0, 1, 1], [], []>} : vector<16x144xbf16>, vector<144x128xbf16>, vector<16x128xf32> -> vector<16x128xf32>
    %38 = arith.addf %34, %37 : vector<16x128xf32>
    %c1_32 = arith.constant 1 : index
    %c0_33 = arith.constant 0 : index
    %c0_34 = arith.constant 0 : index
    %39 = vector.load %arg5[%c1_32, %c0_33, %c0_34] : memref<6x144x128xbf16, #tpu.memory_space<vmem>>, vector<1x144x128xbf16>
    %40 = vector.shape_cast %39 : vector<1x144x128xbf16> to vector<144x128xbf16>
    %cst_35 = arith.constant dense<0.000000e+00> : vector<16x128xf32>
    %41 = tpu.matmul %15, %40, %cst_35 {dimension_numbers = #tpu.dot_dimension_numbers<[1], [0], [0], [1], [0, 0, 1, 1], [], []>} : vector<16x144xbf16>, vector<144x128xbf16>, vector<16x128xf32> -> vector<16x128xf32>
    %c3_36 = arith.constant 3 : index
    %c0_37 = arith.constant 0 : index
    %c0_38 = arith.constant 0 : index
    %42 = vector.load %arg5[%c3_36, %c0_37, %c0_38] : memref<6x144x128xbf16, #tpu.memory_space<vmem>>, vector<1x144x128xbf16>
    %43 = vector.shape_cast %42 : vector<1x144x128xbf16> to vector<144x128xbf16>
    %cst_39 = arith.constant dense<0.000000e+00> : vector<16x128xf32>
    %44 = tpu.matmul %19, %43, %cst_39 {dimension_numbers = #tpu.dot_dimension_numbers<[1], [0], [0], [1], [0, 0, 1, 1], [], []>} : vector<16x144xbf16>, vector<144x128xbf16>, vector<16x128xf32> -> vector<16x128xf32>
    %45 = arith.addf %41, %44 : vector<16x128xf32>
    %c5 = arith.constant 5 : index
    %c0_40 = arith.constant 0 : index
    %c0_41 = arith.constant 0 : index
    %46 = vector.load %arg5[%c5, %c0_40, %c0_41] : memref<6x144x128xbf16, #tpu.memory_space<vmem>>, vector<1x144x128xbf16>
    %47 = vector.shape_cast %46 : vector<1x144x128xbf16> to vector<144x128xbf16>
    %cst_42 = arith.constant dense<0.000000e+00> : vector<16x128xf32>
    %48 = tpu.matmul %23, %47, %cst_42 {dimension_numbers = #tpu.dot_dimension_numbers<[1], [0], [0], [1], [0, 0, 1, 1], [], []>} : vector<16x144xbf16>, vector<144x128xbf16>, vector<16x128xf32> -> vector<16x128xf32>
    %49 = arith.addf %45, %48 : vector<16x128xf32>
    %50 = arith.maximumf %38, %49 : vector<16x128xf32>
    %c0_43 = arith.constant 0 : index
    %c0_44 = arith.constant 0 : index
    %c0_45 = arith.constant 0 : index
    %51 = vector.load %arg5[%c0_43, %c0_44, %c0_45] : memref<6x144x128xbf16, #tpu.memory_space<vmem>>, vector<1x144x128xbf16>
    %52 = vector.shape_cast %51 : vector<1x144x128xbf16> to vector<144x128xbf16>
    %cst_46 = arith.constant dense<0.000000e+00> : vector<16x128xf32>
    %53 = tpu.matmul %19, %52, %cst_46 {dimension_numbers = #tpu.dot_dimension_numbers<[1], [0], [0], [1], [0, 0, 1, 1], [], []>} : vector<16x144xbf16>, vector<144x128xbf16>, vector<16x128xf32> -> vector<16x128xf32>
    %c2_47 = arith.constant 2 : index
    %c0_48 = arith.constant 0 : index
    %c0_49 = arith.constant 0 : index
    %54 = vector.load %arg5[%c2_47, %c0_48, %c0_49] : memref<6x144x128xbf16, #tpu.memory_space<vmem>>, vector<1x144x128xbf16>
    %55 = vector.shape_cast %54 : vector<1x144x128xbf16> to vector<144x128xbf16>
    %cst_50 = arith.constant dense<0.000000e+00> : vector<16x128xf32>
    %56 = tpu.matmul %23, %55, %cst_50 {dimension_numbers = #tpu.dot_dimension_numbers<[1], [0], [0], [1], [0, 0, 1, 1], [], []>} : vector<16x144xbf16>, vector<144x128xbf16>, vector<16x128xf32> -> vector<16x128xf32>
    %57 = arith.addf %53, %56 : vector<16x128xf32>
    %c4_51 = arith.constant 4 : index
    %c0_52 = arith.constant 0 : index
    %c0_53 = arith.constant 0 : index
    %58 = vector.load %arg5[%c4_51, %c0_52, %c0_53] : memref<6x144x128xbf16, #tpu.memory_space<vmem>>, vector<1x144x128xbf16>
    %59 = vector.shape_cast %58 : vector<1x144x128xbf16> to vector<144x128xbf16>
    %cst_54 = arith.constant dense<0.000000e+00> : vector<16x128xf32>
    %60 = tpu.matmul %27, %59, %cst_54 {dimension_numbers = #tpu.dot_dimension_numbers<[1], [0], [0], [1], [0, 0, 1, 1], [], []>} : vector<16x144xbf16>, vector<144x128xbf16>, vector<16x128xf32> -> vector<16x128xf32>
    %61 = arith.addf %57, %60 : vector<16x128xf32>
    %62 = arith.maximumf %50, %61 : vector<16x128xf32>
    %c1_55 = arith.constant 1 : index
    %c0_56 = arith.constant 0 : index
    %c0_57 = arith.constant 0 : index
    %63 = vector.load %arg5[%c1_55, %c0_56, %c0_57] : memref<6x144x128xbf16, #tpu.memory_space<vmem>>, vector<1x144x128xbf16>
    %64 = vector.shape_cast %63 : vector<1x144x128xbf16> to vector<144x128xbf16>
    %cst_58 = arith.constant dense<0.000000e+00> : vector<16x128xf32>
    %65 = tpu.matmul %19, %64, %cst_58 {dimension_numbers = #tpu.dot_dimension_numbers<[1], [0], [0], [1], [0, 0, 1, 1], [], []>} : vector<16x144xbf16>, vector<144x128xbf16>, vector<16x128xf32> -> vector<16x128xf32>
    %c3_59 = arith.constant 3 : index
    %c0_60 = arith.constant 0 : index
    %c0_61 = arith.constant 0 : index
    %66 = vector.load %arg5[%c3_59, %c0_60, %c0_61] : memref<6x144x128xbf16, #tpu.memory_space<vmem>>, vector<1x144x128xbf16>
    %67 = vector.shape_cast %66 : vector<1x144x128xbf16> to vector<144x128xbf16>
    %cst_62 = arith.constant dense<0.000000e+00> : vector<16x128xf32>
    %68 = tpu.matmul %23, %67, %cst_62 {dimension_numbers = #tpu.dot_dimension_numbers<[1], [0], [0], [1], [0, 0, 1, 1], [], []>} : vector<16x144xbf16>, vector<144x128xbf16>, vector<16x128xf32> -> vector<16x128xf32>
    %69 = arith.addf %65, %68 : vector<16x128xf32>
    %c5_63 = arith.constant 5 : index
    %c0_64 = arith.constant 0 : index
    %c0_65 = arith.constant 0 : index
    %70 = vector.load %arg5[%c5_63, %c0_64, %c0_65] : memref<6x144x128xbf16, #tpu.memory_space<vmem>>, vector<1x144x128xbf16>
    %71 = vector.shape_cast %70 : vector<1x144x128xbf16> to vector<144x128xbf16>
    %cst_66 = arith.constant dense<0.000000e+00> : vector<16x128xf32>
    %72 = tpu.matmul %27, %71, %cst_66 {dimension_numbers = #tpu.dot_dimension_numbers<[1], [0], [0], [1], [0, 0, 1, 1], [], []>} : vector<16x144xbf16>, vector<144x128xbf16>, vector<16x128xf32> -> vector<16x128xf32>
    %73 = arith.addf %69, %72 : vector<16x128xf32>
    %74 = arith.maximumf %62, %73 : vector<16x128xf32>
    %c0_67 = arith.constant 0 : index
    %c0_68 = arith.constant 0 : index
    %75 = vector.load %arg6[%c0_67, %c0_68] : memref<1x128xf32, #tpu.memory_space<vmem>>, vector<1x128xf32>
    %76 = vector.broadcast %75 : vector<1x128xf32> to vector<16x128xf32>
    %77 = arith.addf %74, %76 : vector<16x128xf32>
    %cst_69 = arith.constant 0.000000e+00 : f32
    %78 = vector.broadcast %cst_69 : f32 to vector<16x128xf32>
    %79 = arith.maximumf %77, %78 : vector<16x128xf32>
    %80 = arith.truncf %79 : vector<16x128xf32> to vector<16x128xbf16>
    %c0_70 = arith.constant 0 : index
    %c0_71 = arith.constant 0 : index
    %c0_72 = arith.constant 0 : index
    %81 = vector.load %arg7[%c0_70, %c0_71, %c0_72] : memref<4x8x16xbf16, #tpu.memory_space<vmem>>, vector<1x8x16xbf16>
    %82 = vector.shape_cast %81 : vector<1x8x16xbf16> to vector<8x16xbf16>
    %cst_73 = arith.constant dense<0.000000e+00> : vector<8x128xf32>
    %83 = tpu.matmul %82, %80, %cst_73 {dimension_numbers = #tpu.dot_dimension_numbers<[1], [0], [0], [1], [0, 0, 1, 1], [], []>} : vector<8x16xbf16>, vector<16x128xbf16>, vector<8x128xf32> -> vector<8x128xf32>
    %84 = arith.truncf %83 : vector<8x128xf32> to vector<8x128xbf16>
    %c1_74 = arith.constant 1 : index
    %c0_75 = arith.constant 0 : index
    %c0_76 = arith.constant 0 : index
    %85 = vector.load %arg7[%c1_74, %c0_75, %c0_76] : memref<4x8x16xbf16, #tpu.memory_space<vmem>>, vector<1x8x16xbf16>
    %86 = vector.shape_cast %85 : vector<1x8x16xbf16> to vector<8x16xbf16>
    %cst_77 = arith.constant dense<0.000000e+00> : vector<8x128xf32>
    %87 = tpu.matmul %86, %80, %cst_77 {dimension_numbers = #tpu.dot_dimension_numbers<[1], [0], [0], [1], [0, 0, 1, 1], [], []>} : vector<8x16xbf16>, vector<16x128xbf16>, vector<8x128xf32> -> vector<8x128xf32>
    %88 = arith.truncf %87 : vector<8x128xf32> to vector<8x128xbf16>
    %c2_78 = arith.constant 2 : index
    %c0_79 = arith.constant 0 : index
    %c0_80 = arith.constant 0 : index
    %89 = vector.load %arg7[%c2_78, %c0_79, %c0_80] : memref<4x8x16xbf16, #tpu.memory_space<vmem>>, vector<1x8x16xbf16>
    %90 = vector.shape_cast %89 : vector<1x8x16xbf16> to vector<8x16xbf16>
    %cst_81 = arith.constant dense<0.000000e+00> : vector<8x128xf32>
    %91 = tpu.matmul %90, %80, %cst_81 {dimension_numbers = #tpu.dot_dimension_numbers<[1], [0], [0], [1], [0, 0, 1, 1], [], []>} : vector<8x16xbf16>, vector<16x128xbf16>, vector<8x128xf32> -> vector<8x128xf32>
    %92 = arith.truncf %91 : vector<8x128xf32> to vector<8x128xbf16>
    %c3_82 = arith.constant 3 : index
    %c0_83 = arith.constant 0 : index
    %c0_84 = arith.constant 0 : index
    %93 = vector.load %arg7[%c3_82, %c0_83, %c0_84] : memref<4x8x16xbf16, #tpu.memory_space<vmem>>, vector<1x8x16xbf16>
    %94 = vector.shape_cast %93 : vector<1x8x16xbf16> to vector<8x16xbf16>
    %cst_85 = arith.constant dense<0.000000e+00> : vector<8x128xf32>
    %95 = tpu.matmul %94, %80, %cst_85 {dimension_numbers = #tpu.dot_dimension_numbers<[1], [0], [0], [1], [0, 0, 1, 1], [], []>} : vector<8x16xbf16>, vector<16x128xbf16>, vector<8x128xf32> -> vector<8x128xf32>
    %96 = arith.truncf %95 : vector<8x128xf32> to vector<8x128xbf16>
    %c0_86 = arith.constant 0 : index
    %c0_87 = arith.constant 0 : index
    %c0_88 = arith.constant 0 : index
    %97 = vector.load %arg8[%c0_86, %c0_87, %c0_88] : memref<6x128x128xbf16, #tpu.memory_space<vmem>>, vector<1x128x128xbf16>
    %98 = vector.shape_cast %97 : vector<1x128x128xbf16> to vector<128x128xbf16>
    %cst_89 = arith.constant dense<0.000000e+00> : vector<8x128xf32>
    %99 = tpu.matmul %84, %98, %cst_89 {dimension_numbers = #tpu.dot_dimension_numbers<[1], [0], [0], [1], [0, 0, 1, 1], [], []>} : vector<8x128xbf16>, vector<128x128xbf16>, vector<8x128xf32> -> vector<8x128xf32>
    %c2_90 = arith.constant 2 : index
    %c0_91 = arith.constant 0 : index
    %c0_92 = arith.constant 0 : index
    %100 = vector.load %arg8[%c2_90, %c0_91, %c0_92] : memref<6x128x128xbf16, #tpu.memory_space<vmem>>, vector<1x128x128xbf16>
    %101 = vector.shape_cast %100 : vector<1x128x128xbf16> to vector<128x128xbf16>
    %cst_93 = arith.constant dense<0.000000e+00> : vector<8x128xf32>
    %102 = tpu.matmul %88, %101, %cst_93 {dimension_numbers = #tpu.dot_dimension_numbers<[1], [0], [0], [1], [0, 0, 1, 1], [], []>} : vector<8x128xbf16>, vector<128x128xbf16>, vector<8x128xf32> -> vector<8x128xf32>
    %103 = arith.addf %99, %102 : vector<8x128xf32>
    %c4_94 = arith.constant 4 : index
    %c0_95 = arith.constant 0 : index
    %c0_96 = arith.constant 0 : index
    %104 = vector.load %arg8[%c4_94, %c0_95, %c0_96] : memref<6x128x128xbf16, #tpu.memory_space<vmem>>, vector<1x128x128xbf16>
    %105 = vector.shape_cast %104 : vector<1x128x128xbf16> to vector<128x128xbf16>
    %cst_97 = arith.constant dense<0.000000e+00> : vector<8x128xf32>
    %106 = tpu.matmul %92, %105, %cst_97 {dimension_numbers = #tpu.dot_dimension_numbers<[1], [0], [0], [1], [0, 0, 1, 1], [], []>} : vector<8x128xbf16>, vector<128x128xbf16>, vector<8x128xf32> -> vector<8x128xf32>
    %107 = arith.addf %103, %106 : vector<8x128xf32>
    %c1_98 = arith.constant 1 : index
    %c0_99 = arith.constant 0 : index
    %c0_100 = arith.constant 0 : index
    %108 = vector.load %arg8[%c1_98, %c0_99, %c0_100] : memref<6x128x128xbf16, #tpu.memory_space<vmem>>, vector<1x128x128xbf16>
    %109 = vector.shape_cast %108 : vector<1x128x128xbf16> to vector<128x128xbf16>
    %cst_101 = arith.constant dense<0.000000e+00> : vector<8x128xf32>
    %110 = tpu.matmul %84, %109, %cst_101 {dimension_numbers = #tpu.dot_dimension_numbers<[1], [0], [0], [1], [0, 0, 1, 1], [], []>} : vector<8x128xbf16>, vector<128x128xbf16>, vector<8x128xf32> -> vector<8x128xf32>
    %c3_102 = arith.constant 3 : index
    %c0_103 = arith.constant 0 : index
    %c0_104 = arith.constant 0 : index
    %111 = vector.load %arg8[%c3_102, %c0_103, %c0_104] : memref<6x128x128xbf16, #tpu.memory_space<vmem>>, vector<1x128x128xbf16>
    %112 = vector.shape_cast %111 : vector<1x128x128xbf16> to vector<128x128xbf16>
    %cst_105 = arith.constant dense<0.000000e+00> : vector<8x128xf32>
    %113 = tpu.matmul %88, %112, %cst_105 {dimension_numbers = #tpu.dot_dimension_numbers<[1], [0], [0], [1], [0, 0, 1, 1], [], []>} : vector<8x128xbf16>, vector<128x128xbf16>, vector<8x128xf32> -> vector<8x128xf32>
    %114 = arith.addf %110, %113 : vector<8x128xf32>
    %c5_106 = arith.constant 5 : index
    %c0_107 = arith.constant 0 : index
    %c0_108 = arith.constant 0 : index
    %115 = vector.load %arg8[%c5_106, %c0_107, %c0_108] : memref<6x128x128xbf16, #tpu.memory_space<vmem>>, vector<1x128x128xbf16>
    %116 = vector.shape_cast %115 : vector<1x128x128xbf16> to vector<128x128xbf16>
    %cst_109 = arith.constant dense<0.000000e+00> : vector<8x128xf32>
    %117 = tpu.matmul %92, %116, %cst_109 {dimension_numbers = #tpu.dot_dimension_numbers<[1], [0], [0], [1], [0, 0, 1, 1], [], []>} : vector<8x128xbf16>, vector<128x128xbf16>, vector<8x128xf32> -> vector<8x128xf32>
    %118 = arith.addf %114, %117 : vector<8x128xf32>
    %119 = arith.maximumf %107, %118 : vector<8x128xf32>
    %c0_110 = arith.constant 0 : index
    %c0_111 = arith.constant 0 : index
    %c0_112 = arith.constant 0 : index
    %120 = vector.load %arg8[%c0_110, %c0_111, %c0_112] : memref<6x128x128xbf16, #tpu.memory_space<vmem>>, vector<1x128x128xbf16>
    %121 = vector.shape_cast %120 : vector<1x128x128xbf16> to vector<128x128xbf16>
    %cst_113 = arith.constant dense<0.000000e+00> : vector<8x128xf32>
    %122 = tpu.matmul %88, %121, %cst_113 {dimension_numbers = #tpu.dot_dimension_numbers<[1], [0], [0], [1], [0, 0, 1, 1], [], []>} : vector<8x128xbf16>, vector<128x128xbf16>, vector<8x128xf32> -> vector<8x128xf32>
    %c2_114 = arith.constant 2 : index
    %c0_115 = arith.constant 0 : index
    %c0_116 = arith.constant 0 : index
    %123 = vector.load %arg8[%c2_114, %c0_115, %c0_116] : memref<6x128x128xbf16, #tpu.memory_space<vmem>>, vector<1x128x128xbf16>
    %124 = vector.shape_cast %123 : vector<1x128x128xbf16> to vector<128x128xbf16>
    %cst_117 = arith.constant dense<0.000000e+00> : vector<8x128xf32>
    %125 = tpu.matmul %92, %124, %cst_117 {dimension_numbers = #tpu.dot_dimension_numbers<[1], [0], [0], [1], [0, 0, 1, 1], [], []>} : vector<8x128xbf16>, vector<128x128xbf16>, vector<8x128xf32> -> vector<8x128xf32>
    %126 = arith.addf %122, %125 : vector<8x128xf32>
    %c4_118 = arith.constant 4 : index
    %c0_119 = arith.constant 0 : index
    %c0_120 = arith.constant 0 : index
    %127 = vector.load %arg8[%c4_118, %c0_119, %c0_120] : memref<6x128x128xbf16, #tpu.memory_space<vmem>>, vector<1x128x128xbf16>
    %128 = vector.shape_cast %127 : vector<1x128x128xbf16> to vector<128x128xbf16>
    %cst_121 = arith.constant dense<0.000000e+00> : vector<8x128xf32>
    %129 = tpu.matmul %96, %128, %cst_121 {dimension_numbers = #tpu.dot_dimension_numbers<[1], [0], [0], [1], [0, 0, 1, 1], [], []>} : vector<8x128xbf16>, vector<128x128xbf16>, vector<8x128xf32> -> vector<8x128xf32>
    %130 = arith.addf %126, %129 : vector<8x128xf32>
    %131 = arith.maximumf %119, %130 : vector<8x128xf32>
    %c1_122 = arith.constant 1 : index
    %c0_123 = arith.constant 0 : index
    %c0_124 = arith.constant 0 : index
    %132 = vector.load %arg8[%c1_122, %c0_123, %c0_124] : memref<6x128x128xbf16, #tpu.memory_space<vmem>>, vector<1x128x128xbf16>
    %133 = vector.shape_cast %132 : vector<1x128x128xbf16> to vector<128x128xbf16>
    %cst_125 = arith.constant dense<0.000000e+00> : vector<8x128xf32>
    %134 = tpu.matmul %88, %133, %cst_125 {dimension_numbers = #tpu.dot_dimension_numbers<[1], [0], [0], [1], [0, 0, 1, 1], [], []>} : vector<8x128xbf16>, vector<128x128xbf16>, vector<8x128xf32> -> vector<8x128xf32>
    %c3_126 = arith.constant 3 : index
    %c0_127 = arith.constant 0 : index
    %c0_128 = arith.constant 0 : index
    %135 = vector.load %arg8[%c3_126, %c0_127, %c0_128] : memref<6x128x128xbf16, #tpu.memory_space<vmem>>, vector<1x128x128xbf16>
    %136 = vector.shape_cast %135 : vector<1x128x128xbf16> to vector<128x128xbf16>
    %cst_129 = arith.constant dense<0.000000e+00> : vector<8x128xf32>
    %137 = tpu.matmul %92, %136, %cst_129 {dimension_numbers = #tpu.dot_dimension_numbers<[1], [0], [0], [1], [0, 0, 1, 1], [], []>} : vector<8x128xbf16>, vector<128x128xbf16>, vector<8x128xf32> -> vector<8x128xf32>
    %138 = arith.addf %134, %137 : vector<8x128xf32>
    %c5_130 = arith.constant 5 : index
    %c0_131 = arith.constant 0 : index
    %c0_132 = arith.constant 0 : index
    %139 = vector.load %arg8[%c5_130, %c0_131, %c0_132] : memref<6x128x128xbf16, #tpu.memory_space<vmem>>, vector<1x128x128xbf16>
    %140 = vector.shape_cast %139 : vector<1x128x128xbf16> to vector<128x128xbf16>
    %cst_133 = arith.constant dense<0.000000e+00> : vector<8x128xf32>
    %141 = tpu.matmul %96, %140, %cst_133 {dimension_numbers = #tpu.dot_dimension_numbers<[1], [0], [0], [1], [0, 0, 1, 1], [], []>} : vector<8x128xbf16>, vector<128x128xbf16>, vector<8x128xf32> -> vector<8x128xf32>
    %142 = arith.addf %138, %141 : vector<8x128xf32>
    %143 = arith.maximumf %131, %142 : vector<8x128xf32>
    %c0_134 = arith.constant 0 : index
    %c0_135 = arith.constant 0 : index
    %144 = vector.load %arg9[%c0_134, %c0_135] : memref<1x128xf32, #tpu.memory_space<vmem>>, vector<1x128xf32>
    %145 = vector.broadcast %144 : vector<1x128xf32> to vector<8x128xf32>
    %146 = arith.addf %143, %145 : vector<8x128xf32>
    %cst_136 = arith.constant 0.000000e+00 : f32
    %147 = vector.broadcast %cst_136 : f32 to vector<8x128xf32>
    %148 = arith.maximumf %146, %147 : vector<8x128xf32>
    %149 = arith.truncf %148 : vector<8x128xf32> to vector<8x128xbf16>
    %c0_137 = arith.constant 0 : index
    %c0_138 = arith.constant 0 : index
    %c0_139 = arith.constant 0 : index
    %150 = vector.load %arg10[%c0_137, %c0_138, %c0_139] : memref<4x4x8xbf16, #tpu.memory_space<vmem>>, vector<1x4x8xbf16>
    %151 = vector.shape_cast %150 : vector<1x4x8xbf16> to vector<4x8xbf16>
    %cst_140 = arith.constant dense<0.000000e+00> : vector<4x128xf32>
    %152 = tpu.matmul %151, %149, %cst_140 {dimension_numbers = #tpu.dot_dimension_numbers<[1], [0], [0], [1], [0, 0, 1, 1], [], []>} : vector<4x8xbf16>, vector<8x128xbf16>, vector<4x128xf32> -> vector<4x128xf32>
    %153 = arith.truncf %152 : vector<4x128xf32> to vector<4x128xbf16>
    %c1_141 = arith.constant 1 : index
    %c0_142 = arith.constant 0 : index
    %c0_143 = arith.constant 0 : index
    %154 = vector.load %arg10[%c1_141, %c0_142, %c0_143] : memref<4x4x8xbf16, #tpu.memory_space<vmem>>, vector<1x4x8xbf16>
    %155 = vector.shape_cast %154 : vector<1x4x8xbf16> to vector<4x8xbf16>
    %cst_144 = arith.constant dense<0.000000e+00> : vector<4x128xf32>
    %156 = tpu.matmul %155, %149, %cst_144 {dimension_numbers = #tpu.dot_dimension_numbers<[1], [0], [0], [1], [0, 0, 1, 1], [], []>} : vector<4x8xbf16>, vector<8x128xbf16>, vector<4x128xf32> -> vector<4x128xf32>
    %157 = arith.truncf %156 : vector<4x128xf32> to vector<4x128xbf16>
    %c2_145 = arith.constant 2 : index
    %c0_146 = arith.constant 0 : index
    %c0_147 = arith.constant 0 : index
    %158 = vector.load %arg10[%c2_145, %c0_146, %c0_147] : memref<4x4x8xbf16, #tpu.memory_space<vmem>>, vector<1x4x8xbf16>
    %159 = vector.shape_cast %158 : vector<1x4x8xbf16> to vector<4x8xbf16>
    %cst_148 = arith.constant dense<0.000000e+00> : vector<4x128xf32>
    %160 = tpu.matmul %159, %149, %cst_148 {dimension_numbers = #tpu.dot_dimension_numbers<[1], [0], [0], [1], [0, 0, 1, 1], [], []>} : vector<4x8xbf16>, vector<8x128xbf16>, vector<4x128xf32> -> vector<4x128xf32>
    %161 = arith.truncf %160 : vector<4x128xf32> to vector<4x128xbf16>
    %c3_149 = arith.constant 3 : index
    %c0_150 = arith.constant 0 : index
    %c0_151 = arith.constant 0 : index
    %162 = vector.load %arg10[%c3_149, %c0_150, %c0_151] : memref<4x4x8xbf16, #tpu.memory_space<vmem>>, vector<1x4x8xbf16>
    %163 = vector.shape_cast %162 : vector<1x4x8xbf16> to vector<4x8xbf16>
    %cst_152 = arith.constant dense<0.000000e+00> : vector<4x128xf32>
    %164 = tpu.matmul %163, %149, %cst_152 {dimension_numbers = #tpu.dot_dimension_numbers<[1], [0], [0], [1], [0, 0, 1, 1], [], []>} : vector<4x8xbf16>, vector<8x128xbf16>, vector<4x128xf32> -> vector<4x128xf32>
    %165 = arith.truncf %164 : vector<4x128xf32> to vector<4x128xbf16>
    %c0_153 = arith.constant 0 : index
    %c0_154 = arith.constant 0 : index
    %c0_155 = arith.constant 0 : index
    %166 = vector.load %arg11[%c0_153, %c0_154, %c0_155] : memref<6x128x128xbf16, #tpu.memory_space<vmem>>, vector<1x128x128xbf16>
    %167 = vector.shape_cast %166 : vector<1x128x128xbf16> to vector<128x128xbf16>
    %cst_156 = arith.constant dense<0.000000e+00> : vector<4x128xf32>
    %168 = tpu.matmul %153, %167, %cst_156 {dimension_numbers = #tpu.dot_dimension_numbers<[1], [0], [0], [1], [0, 0, 1, 1], [], []>} : vector<4x128xbf16>, vector<128x128xbf16>, vector<4x128xf32> -> vector<4x128xf32>
    %c2_157 = arith.constant 2 : index
    %c0_158 = arith.constant 0 : index
    %c0_159 = arith.constant 0 : index
    %169 = vector.load %arg11[%c2_157, %c0_158, %c0_159] : memref<6x128x128xbf16, #tpu.memory_space<vmem>>, vector<1x128x128xbf16>
    %170 = vector.shape_cast %169 : vector<1x128x128xbf16> to vector<128x128xbf16>
    %cst_160 = arith.constant dense<0.000000e+00> : vector<4x128xf32>
    %171 = tpu.matmul %157, %170, %cst_160 {dimension_numbers = #tpu.dot_dimension_numbers<[1], [0], [0], [1], [0, 0, 1, 1], [], []>} : vector<4x128xbf16>, vector<128x128xbf16>, vector<4x128xf32> -> vector<4x128xf32>
    %172 = arith.addf %168, %171 : vector<4x128xf32>
    %c4_161 = arith.constant 4 : index
    %c0_162 = arith.constant 0 : index
    %c0_163 = arith.constant 0 : index
    %173 = vector.load %arg11[%c4_161, %c0_162, %c0_163] : memref<6x128x128xbf16, #tpu.memory_space<vmem>>, vector<1x128x128xbf16>
    %174 = vector.shape_cast %173 : vector<1x128x128xbf16> to vector<128x128xbf16>
    %cst_164 = arith.constant dense<0.000000e+00> : vector<4x128xf32>
    %175 = tpu.matmul %161, %174, %cst_164 {dimension_numbers = #tpu.dot_dimension_numbers<[1], [0], [0], [1], [0, 0, 1, 1], [], []>} : vector<4x128xbf16>, vector<128x128xbf16>, vector<4x128xf32> -> vector<4x128xf32>
    %176 = arith.addf %172, %175 : vector<4x128xf32>
    %c1_165 = arith.constant 1 : index
    %c0_166 = arith.constant 0 : index
    %c0_167 = arith.constant 0 : index
    %177 = vector.load %arg11[%c1_165, %c0_166, %c0_167] : memref<6x128x128xbf16, #tpu.memory_space<vmem>>, vector<1x128x128xbf16>
    %178 = vector.shape_cast %177 : vector<1x128x128xbf16> to vector<128x128xbf16>
    %cst_168 = arith.constant dense<0.000000e+00> : vector<4x128xf32>
    %179 = tpu.matmul %153, %178, %cst_168 {dimension_numbers = #tpu.dot_dimension_numbers<[1], [0], [0], [1], [0, 0, 1, 1], [], []>} : vector<4x128xbf16>, vector<128x128xbf16>, vector<4x128xf32> -> vector<4x128xf32>
    %c3_169 = arith.constant 3 : index
    %c0_170 = arith.constant 0 : index
    %c0_171 = arith.constant 0 : index
    %180 = vector.load %arg11[%c3_169, %c0_170, %c0_171] : memref<6x128x128xbf16, #tpu.memory_space<vmem>>, vector<1x128x128xbf16>
    %181 = vector.shape_cast %180 : vector<1x128x128xbf16> to vector<128x128xbf16>
    %cst_172 = arith.constant dense<0.000000e+00> : vector<4x128xf32>
    %182 = tpu.matmul %157, %181, %cst_172 {dimension_numbers = #tpu.dot_dimension_numbers<[1], [0], [0], [1], [0, 0, 1, 1], [], []>} : vector<4x128xbf16>, vector<128x128xbf16>, vector<4x128xf32> -> vector<4x128xf32>
    %183 = arith.addf %179, %182 : vector<4x128xf32>
    %c5_173 = arith.constant 5 : index
    %c0_174 = arith.constant 0 : index
    %c0_175 = arith.constant 0 : index
    %184 = vector.load %arg11[%c5_173, %c0_174, %c0_175] : memref<6x128x128xbf16, #tpu.memory_space<vmem>>, vector<1x128x128xbf16>
    %185 = vector.shape_cast %184 : vector<1x128x128xbf16> to vector<128x128xbf16>
    %cst_176 = arith.constant dense<0.000000e+00> : vector<4x128xf32>
    %186 = tpu.matmul %161, %185, %cst_176 {dimension_numbers = #tpu.dot_dimension_numbers<[1], [0], [0], [1], [0, 0, 1, 1], [], []>} : vector<4x128xbf16>, vector<128x128xbf16>, vector<4x128xf32> -> vector<4x128xf32>
    %187 = arith.addf %183, %186 : vector<4x128xf32>
    %188 = arith.maximumf %176, %187 : vector<4x128xf32>
    %c0_177 = arith.constant 0 : index
    %c0_178 = arith.constant 0 : index
    %c0_179 = arith.constant 0 : index
    %189 = vector.load %arg11[%c0_177, %c0_178, %c0_179] : memref<6x128x128xbf16, #tpu.memory_space<vmem>>, vector<1x128x128xbf16>
    %190 = vector.shape_cast %189 : vector<1x128x128xbf16> to vector<128x128xbf16>
    %cst_180 = arith.constant dense<0.000000e+00> : vector<4x128xf32>
    %191 = tpu.matmul %157, %190, %cst_180 {dimension_numbers = #tpu.dot_dimension_numbers<[1], [0], [0], [1], [0, 0, 1, 1], [], []>} : vector<4x128xbf16>, vector<128x128xbf16>, vector<4x128xf32> -> vector<4x128xf32>
    %c2_181 = arith.constant 2 : index
    %c0_182 = arith.constant 0 : index
    %c0_183 = arith.constant 0 : index
    %192 = vector.load %arg11[%c2_181, %c0_182, %c0_183] : memref<6x128x128xbf16, #tpu.memory_space<vmem>>, vector<1x128x128xbf16>
    %193 = vector.shape_cast %192 : vector<1x128x128xbf16> to vector<128x128xbf16>
    %cst_184 = arith.constant dense<0.000000e+00> : vector<4x128xf32>
    %194 = tpu.matmul %161, %193, %cst_184 {dimension_numbers = #tpu.dot_dimension_numbers<[1], [0], [0], [1], [0, 0, 1, 1], [], []>} : vector<4x128xbf16>, vector<128x128xbf16>, vector<4x128xf32> -> vector<4x128xf32>
    %195 = arith.addf %191, %194 : vector<4x128xf32>
    %c4_185 = arith.constant 4 : index
    %c0_186 = arith.constant 0 : index
    %c0_187 = arith.constant 0 : index
    %196 = vector.load %arg11[%c4_185, %c0_186, %c0_187] : memref<6x128x128xbf16, #tpu.memory_space<vmem>>, vector<1x128x128xbf16>
    %197 = vector.shape_cast %196 : vector<1x128x128xbf16> to vector<128x128xbf16>
    %cst_188 = arith.constant dense<0.000000e+00> : vector<4x128xf32>
    %198 = tpu.matmul %165, %197, %cst_188 {dimension_numbers = #tpu.dot_dimension_numbers<[1], [0], [0], [1], [0, 0, 1, 1], [], []>} : vector<4x128xbf16>, vector<128x128xbf16>, vector<4x128xf32> -> vector<4x128xf32>
    %199 = arith.addf %195, %198 : vector<4x128xf32>
    %200 = arith.maximumf %188, %199 : vector<4x128xf32>
    %c1_189 = arith.constant 1 : index
    %c0_190 = arith.constant 0 : index
    %c0_191 = arith.constant 0 : index
    %201 = vector.load %arg11[%c1_189, %c0_190, %c0_191] : memref<6x128x128xbf16, #tpu.memory_space<vmem>>, vector<1x128x128xbf16>
    %202 = vector.shape_cast %201 : vector<1x128x128xbf16> to vector<128x128xbf16>
    %cst_192 = arith.constant dense<0.000000e+00> : vector<4x128xf32>
    %203 = tpu.matmul %157, %202, %cst_192 {dimension_numbers = #tpu.dot_dimension_numbers<[1], [0], [0], [1], [0, 0, 1, 1], [], []>} : vector<4x128xbf16>, vector<128x128xbf16>, vector<4x128xf32> -> vector<4x128xf32>
    %c3_193 = arith.constant 3 : index
    %c0_194 = arith.constant 0 : index
    %c0_195 = arith.constant 0 : index
    %204 = vector.load %arg11[%c3_193, %c0_194, %c0_195] : memref<6x128x128xbf16, #tpu.memory_space<vmem>>, vector<1x128x128xbf16>
    %205 = vector.shape_cast %204 : vector<1x128x128xbf16> to vector<128x128xbf16>
    %cst_196 = arith.constant dense<0.000000e+00> : vector<4x128xf32>
    %206 = tpu.matmul %161, %205, %cst_196 {dimension_numbers = #tpu.dot_dimension_numbers<[1], [0], [0], [1], [0, 0, 1, 1], [], []>} : vector<4x128xbf16>, vector<128x128xbf16>, vector<4x128xf32> -> vector<4x128xf32>
    %207 = arith.addf %203, %206 : vector<4x128xf32>
    %c5_197 = arith.constant 5 : index
    %c0_198 = arith.constant 0 : index
    %c0_199 = arith.constant 0 : index
    %208 = vector.load %arg11[%c5_197, %c0_198, %c0_199] : memref<6x128x128xbf16, #tpu.memory_space<vmem>>, vector<1x128x128xbf16>
    %209 = vector.shape_cast %208 : vector<1x128x128xbf16> to vector<128x128xbf16>
    %cst_200 = arith.constant dense<0.000000e+00> : vector<4x128xf32>
    %210 = tpu.matmul %165, %209, %cst_200 {dimension_numbers = #tpu.dot_dimension_numbers<[1], [0], [0], [1], [0, 0, 1, 1], [], []>} : vector<4x128xbf16>, vector<128x128xbf16>, vector<4x128xf32> -> vector<4x128xf32>
    %211 = arith.addf %207, %210 : vector<4x128xf32>
    %212 = arith.maximumf %200, %211 : vector<4x128xf32>
    %c0_201 = arith.constant 0 : index
    %c0_202 = arith.constant 0 : index
    %213 = vector.load %arg12[%c0_201, %c0_202] : memref<1x128xf32, #tpu.memory_space<vmem>>, vector<1x128xf32>
    %214 = vector.broadcast %213 : vector<1x128xf32> to vector<4x128xf32>
    %215 = arith.addf %212, %214 : vector<4x128xf32>
    %cst_203 = arith.constant 0.000000e+00 : f32
    %216 = vector.broadcast %cst_203 : f32 to vector<4x128xf32>
    %217 = arith.maximumf %215, %216 : vector<4x128xf32>
    %218 = arith.truncf %217 : vector<4x128xf32> to vector<4x128xbf16>
    %219 = vector.extract_strided_slice %218 {offsets = [0, 0], sizes = [2, 128], strides = [1, 1]} : vector<4x128xbf16> to vector<2x128xbf16>
    %c0_204 = arith.constant 0 : index
    %c0_205 = arith.constant 0 : index
    %c0_206 = arith.constant 0 : index
    %220 = vector.load %arg13[%c0_204, %c0_205, %c0_206] : memref<2x128x8xbf16, #tpu.memory_space<vmem>>, vector<1x128x8xbf16>
    %221 = vector.shape_cast %220 : vector<1x128x8xbf16> to vector<128x8xbf16>
    %cst_207 = arith.constant dense<0.000000e+00> : vector<2x8xf32>
    %222 = tpu.matmul %219, %221, %cst_207 {dimension_numbers = #tpu.dot_dimension_numbers<[1], [0], [0], [1], [0, 0, 1, 1], [], []>} : vector<2x128xbf16>, vector<128x8xbf16>, vector<2x8xf32> -> vector<2x8xf32>
    %223 = vector.extract_strided_slice %218 {offsets = [2, 0], sizes = [2, 128], strides = [1, 1]} : vector<4x128xbf16> to vector<2x128xbf16>
    %c1_208 = arith.constant 1 : index
    %c0_209 = arith.constant 0 : index
    %c0_210 = arith.constant 0 : index
    %224 = vector.load %arg13[%c1_208, %c0_209, %c0_210] : memref<2x128x8xbf16, #tpu.memory_space<vmem>>, vector<1x128x8xbf16>
    %225 = vector.shape_cast %224 : vector<1x128x8xbf16> to vector<128x8xbf16>
    %cst_211 = arith.constant dense<0.000000e+00> : vector<2x8xf32>
    %226 = tpu.matmul %223, %225, %cst_211 {dimension_numbers = #tpu.dot_dimension_numbers<[1], [0], [0], [1], [0, 0, 1, 1], [], []>} : vector<2x128xbf16>, vector<128x8xbf16>, vector<2x8xf32> -> vector<2x8xf32>
    %227 = arith.addf %222, %226 : vector<2x8xf32>
    %c0_212 = arith.constant 0 : index
    %c0_213 = arith.constant 0 : index
    %228 = vector.load %arg14[%c0_212, %c0_213] : memref<1x8xf32, #tpu.memory_space<vmem>>, vector<1x8xf32>
    %229 = vector.broadcast %228 : vector<1x8xf32> to vector<2x8xf32>
    %230 = arith.addf %227, %229 : vector<2x8xf32>
    %cst_214 = arith.constant 0.000000e+00 : f32
    %231 = vector.broadcast %cst_214 : f32 to vector<2x8xf32>
    %232 = arith.maximumf %230, %231 : vector<2x8xf32>
    %c0_215 = arith.constant 0 : index
    %c0_216 = arith.constant 0 : index
    %233 = vector.load %arg15[%c0_215, %c0_216] : memref<1x8xf32, #tpu.memory_space<vmem>>, vector<1x8xf32>
    %234 = vector.broadcast %233 : vector<1x8xf32> to vector<2x8xf32>
    %235 = arith.mulf %232, %234 : vector<2x8xf32>
    %cst_217 = arith.constant dense<0.000000e+00> : vector<2xf32>
    %236 = vector.multi_reduction <add>, %235, %cst_217 [1] : vector<2x8xf32> to vector<2xf32>
    %237 = vector.shape_cast %236 : vector<2xf32> to vector<2x1xf32>
    %c0_218 = arith.constant 0 : index
    %c0_219 = arith.constant 0 : index
    %238 = vector.load %arg16[%c0_218, %c0_219] : memref<1x1xf32, #tpu.memory_space<vmem>>, vector<1x1xf32>
    %239 = vector.broadcast %238 : vector<1x1xf32> to vector<2x1xf32>
    %240 = arith.addf %237, %239 : vector<2x1xf32>
    %cst_220 = arith.constant 5.000000e-01 : f32
    %241 = vector.broadcast %cst_220 : f32 to vector<2x1xf32>
    %242 = arith.mulf %241, %240 : vector<2x1xf32>
    %243 = math.tanh %242 : vector<2x1xf32>
    %cst_221 = arith.constant 1.000000e+00 : f32
    %244 = vector.broadcast %cst_221 : f32 to vector<2x1xf32>
    %245 = arith.addf %243, %244 : vector<2x1xf32>
    %cst_222 = arith.constant 5.000000e-01 : f32
    %246 = vector.broadcast %cst_222 : f32 to vector<2x1xf32>
    %247 = arith.mulf %246, %245 : vector<2x1xf32>
    %c0_223 = arith.constant 0 : index
    %c0_224 = arith.constant 0 : index
    %248 = vector.load %arg17[%c0_223, %c0_224] : memref<2x1xf32, #tpu.memory_space<vmem>>, vector<2x1xf32>
    tpu.vector_store %arg17[%c0_223, %c0_224], %247 {strides = array<i32>} : memref<2x1xf32, #tpu.memory_space<vmem>>, vector<2x1xf32>,
    return
  }
}

</mosaic_0001>

<bundles_post_ra>
// kernel: basic_cnn_forward.1
= control target key start
LH: loop header
LB: loop body
LE: loop exit
PB: predicated region body
PF: predicated region fallthrough
CT: control target
= control target key end

     0   :  { %vm469_vm0 = vcmask 785408   ;;  %vm614_vm1 = vcmask 1043456   ;;  %vm610_vm2 = vcmask 195584   ;;  %vm925_vm3 = vcmask 130048   ;;  %s7908_s2 = inlined_call_operand.vmem [shape: bf16[480,144], index: 2, kind: input, shape index: {}]   ;;  %s7909_s1 = inlined_call_operand.vmem [shape: bf16[24,480], index: 1, kind: input, shape index: {}]   ;;  %s7910_s4 = inlined_call_operand.vmem [shape: bf16[4,16,24], index: 4, kind: input, shape index: {}]   ;;  %s7911_s5 = inlined_call_operand.vmem [shape: bf16[6,144,128], index: 5, kind: input, shape index: {}]   ;;  %s7912_s3 = inlined_call_operand.vmem [shape: f32[1,144], index: 3, kind: input, shape index: {}]   ;;  %s7913_s0 = inlined_call_operand.vmem [shape: bf16[24,144], index: 0, kind: input, shape index: {}]   ;;  %s7914_s8 = inlined_call_operand.vmem [shape: bf16[6,128,128], index: 8, kind: input, shape index: {}]   ;;  %s7915_s6 = inlined_call_operand.vmem [shape: f32[1,128], index: 6, kind: input, shape index: {}]   ;;  %s7916_s7 = inlined_call_operand.vmem [shape: bf16[4,8,16], index: 7, kind: input, shape index: {}]   ;;  %s7917_s11 = inlined_call_operand.vmem [shape: bf16[6,128,128], index: 11, kind: input, shape index: {}]   ;;  %s7918_s9 = inlined_call_operand.vmem [shape: f32[1,128], index: 9, kind: input, shape index: {}]   ;;  %s7919_s10 = inlined_call_operand.vmem [shape: bf16[4,4,8], index: 10, kind: input, shape index: {}]   ;;  %s7920_s13 = inlined_call_operand.vmem [shape: bf16[2,128,8], index: 13, kind: input, shape index: {}]   ;;  %s7921_s12 = inlined_call_operand.vmem [shape: f32[1,128], index: 12, kind: input, shape index: {}]   ;;  %s7922_s16 = inlined_call_operand.<no memory space> [shape: f32[1,1], index: 16, kind: input, shape index: {}]   ;;  %s7923_s14 = inlined_call_operand.vmem [shape: f32[1,8], index: 14, kind: input, shape index: {}]   ;;  %s7924_s15 = inlined_call_operand.vmem [shape: f32[1,8], index: 15, kind: input, shape index: {}]   ;;  %s7925_s17 = inlined_call_operand.vmem [shape: f32[2,1], index: 17, kind: output, shape index: {}]  }
   0x1   :  { %7928 = sst [smem:[#allocation3_spill]] %s7908_s2  ;;  %vm5952_vm4 = vmmov 0   ;;  %vm2872_vm5 = vcmask 64512   ;;  %vm4173_vm6 = vcmask 58368   ;;  %vm4189_vm7 = vcmask 1024  }
   0x2   :  { %7929 = sst [smem:[#allocation4_spill]] %s7909_s1  ;;  %s7930_s26 = sld [smem:[#allocation3_spill]] }
   0x3   :  { %s7931_s24 = sld [smem:[#allocation4_spill]] }
   0x8   :  { %v5678_v0 = vld [vmem:[%s7930_s26 + $0x4] ss:$8 sps:$4 sm:$0xff]   ;;  %v5680_v1 = vld [vmem:[%s7930_s26] ss:$8 sps:$4 sm:$0xff]   ;;  %v5681_v2 = vld [vmem:[%s7930_s26 + $0x14] ss:$8 sps:$4 sm:$0xff]  }
   0x9   :  { %476 = vmatprep.subr.bf16.mxu0 %v5678_v0  ;;  %v5683_v3 = vld [vmem:[%s7930_s26 + $0x10] ss:$8 sps:$4 sm:$0xff]   ;;  %v5684_v4 = vld [vmem:[%s7930_s26 + $0x24] ss:$8 sps:$4 sm:$0xff]   ;;  %v5686_v5 = vld [vmem:[%s7930_s26 + $0x20] ss:$8 sps:$4 sm:$0xff]  }
   0xa   :  { %477 = vmatpush1.bf16.msra.mxu0 %v5680_v1  ;;  %v5687_v6 = vld [vmem:[%s7930_s26 + $0x34] ss:$8 sps:$4 sm:$0xff]   ;;  %v5689_v7 = vld [vmem:[%s7930_s26 + $0x30] ss:$8 sps:$4 sm:$0xff]   ;;  %v5690_v8 = vld [vmem:[%s7930_s26 + $0x44] ss:$8 sps:$4 sm:$0xff]  }
   0xb   :  { %478 = vmatprep.subr.bf16.mxu0 %v5681_v2  ;;  %v5692_v9 = vld [vmem:[%s7930_s26 + $0x40] ss:$8 sps:$4 sm:$0xff]   ;;  %v5693_v10 = vld [vmem:[%s7930_s26 + $0x54] ss:$8 sps:$4 sm:$0xff]   ;;  %v5695_v11 = vld [vmem:[%s7930_s26 + $0x50] ss:$8 sps:$4 sm:$0xff]  }
   0xc   :  { %v5696_v12 = vld [vmem:[%s7930_s26 + $0x64] ss:$8 sps:$4 sm:$0xff]   ;;  %v5698_v14 = vld [vmem:[%s7930_s26 + $0x60] ss:$8 sps:$4 sm:$0xff]   ;;  %v5699_v15 = vld [vmem:[%s7930_s26 + $0x74] ss:$8 sps:$4 sm:$0xff]  }
   0xd   :  { %v5728_v13 = vld [vmem:[%s7931_s24 + $0x4] ss:$16 sps:$4 sm:$0xff]   ;;  %v5701_v16 = vld [vmem:[%s7930_s26 + $0x70] ss:$8 sps:$4 sm:$0xff]   ;;  %v5704_v18 = vld [vmem:[%s7930_s26 + $0x80] ss:$8 sps:$4 sm:$0xff]  }
   0xe   :  { %479 = vmatpush1.bf16.msra.mxu0 %v5683_v3  ;;  %508 = vmatprep.mubr.bf16.mxu0 %v5728_v13  ;;  %v5702_v17 = vld [vmem:[%s7930_s26 + $0x84] ss:$8 sps:$4 sm:$0xff]   ;;  %v5705_v19 = vld [vmem:[%s7930_s26 + $0x94] ss:$8 sps:$4 sm:$0xff]   ;;  %v5707_v20 = vld [vmem:[%s7930_s26 + $0x90] ss:$8 sps:$4 sm:$0xff]   ;;  %v127_v13 = vlaneseq }
   0xf   :  { %480 = vmatprep.subr.bf16.mxu0 %v5684_v4  ;;  %v5708_v21 = vld [vmem:[%s7930_s26 + $0xa4] ss:$8 sps:$4 sm:$0xff]   ;;  %v5710_v22 = vld [vmem:[%s7930_s26 + $0xa0] ss:$8 sps:$4 sm:$0xff]   ;;  %v5711_v23 = vld [vmem:[%s7930_s26 + $0xb4] ss:$8 sps:$4 sm:$0xff]  }
  0x10   :  { %v5713_v24 = vld [vmem:[%s7930_s26 + $0xb0] ss:$8 sps:$4 sm:$0xff]   ;;  %v5714_v25 = vld [vmem:[%s7930_s26 + $0xc4] ss:$8 sps:$4 sm:$0xff]   ;;  %v5716_v26 = vld [vmem:[%s7930_s26 + $0xc0] ss:$8 sps:$4 sm:$0xff]  }
  0x11   :  { %v5717_v27 = vld [vmem:[%s7930_s26 + $0xd4] ss:$8 sps:$4 sm:$0xff]   ;;  %v5719_v28 = vld [vmem:[%s7930_s26 + $0xd0] ss:$8 sps:$4 sm:$0xff]   ;;  %v5720_v29 = vld [vmem:[%s7930_s26 + $0xe4] ss:$8 sps:$4 sm:$0xff]  }
  0x12   :  { %481 = vmatpush1.bf16.msra.mxu0 %v5686_v5  ;;  %v5722_v30 = vld [vmem:[%s7930_s26 + $0xe0] ss:$8 sps:$4 sm:$0xff]   ;;  %v5723_v31 = vld [vmem:[%s7930_s26 + $0xf4] ss:$8 sps:$4 sm:$0xff]   ;;  %v5725_v32 = vld [vmem:[%s7930_s26 + $0xf0] ss:$8 sps:$4 sm:$0xff]  }
  0x13   :  { %482 = vmatprep.subr.bf16.mxu0 %v5687_v6  ;;  %v5731_v33 = vld [vmem:[%s7930_s26 + $0x104] ss:$8 sps:$4 sm:$0xff]   ;;  %v5726_v35 = vld [vmem:[%s7931_s24] ss:$16 sps:$4 sm:$0xff]   ;;  %v5734_v38 = vld [vmem:[%s7930_s26 + $0x114] ss:$8 sps:$4 sm:$0xff]  }
  0x14   :  { %v63_v34 = vld [vmem:[%s7931_s24 + $0x20] sm:$0xff]  ;;  %v5732_v39 = vld [vmem:[%s7930_s26 + $0x110] ss:$8 sps:$4 sm:$0xff]   ;;  %v5775_v43 = vld [vmem:[%s7931_s24 + $0xc] ss:$16 sps:$4 sm:$0xff]   ;;  %v5950_v6 = vmov 0  }
  0x15   :  { %v5729_v36 = vld [vmem:[%s7930_s26 + $0x100] ss:$8 sps:$4 sm:$0xff]   ;;  %v4200_v37 = vcombine.high %v63_v34, %v63_v34  ;;  %v5737_v40 = vld [vmem:[%s7930_s26 + $0x124] ss:$8 sps:$4 sm:$0xff]   ;;  %v4199_v41 = vcombine.low %v63_v34, %v63_v34  ;;  %v5740_v44 = vld [vmem:[%s7930_s26 + $0x134] ss:$8 sps:$4 sm:$0xff]   ;;  %653 = vmatprep.mubr.bf16.mxu1 %v5950_v6 }
  0x16   :  { %483 = vmatpush1.bf16.msra.mxu0 %v5689_v7  ;;  %v5735_v42 = vld [vmem:[%s7930_s26 + $0x120] ss:$8 sps:$4 sm:$0xff]   ;;  %v5738_v45 = vld [vmem:[%s7930_s26 + $0x130] ss:$8 sps:$4 sm:$0xff]   ;;  %v5743_v46 = vld [vmem:[%s7930_s26 + $0x144] ss:$8 sps:$4 sm:$0xff]  }
  0x17   :  { %484 = vmatprep.subr.bf16.mxu0 %v5690_v8  ;;  %v5741_v47 = vld [vmem:[%s7930_s26 + $0x140] ss:$8 sps:$4 sm:$0xff]   ;;  %v5746_v48 = vld [vmem:[%s7930_s26 + $0x154] ss:$8 sps:$4 sm:$0xff]   ;;  %v5744_v49 = vld [vmem:[%s7930_s26 + $0x150] ss:$8 sps:$4 sm:$0xff]  }
  0x18   :  { %v5749_v50 = vld [vmem:[%s7930_s26 + $0x164] ss:$8 sps:$4 sm:$0xff]   ;;  %v5747_v51 = vld [vmem:[%s7930_s26 + $0x160] ss:$8 sps:$4 sm:$0xff]   ;;  %v5752_v52 = vld [vmem:[%s7930_s26 + $0x174] ss:$8 sps:$4 sm:$0xff]  }
  0x19   :  { %v5750_v53 = vld [vmem:[%s7930_s26 + $0x170] ss:$8 sps:$4 sm:$0xff]   ;;  %v5755_v54 = vld [vmem:[%s7930_s26 + $0x184] ss:$8 sps:$4 sm:$0xff]   ;;  %v5753_v55 = vld [vmem:[%s7930_s26 + $0x180] ss:$8 sps:$4 sm:$0xff]  }
  0x1a   :  { %485 = vmatpush1.bf16.msra.mxu0 %v5692_v9  ;;  %v5758_v56 = vld [vmem:[%s7930_s26 + $0x194] ss:$8 sps:$4 sm:$0xff]   ;;  %v5756_v57 = vld [vmem:[%s7930_s26 + $0x190] ss:$8 sps:$4 sm:$0xff]   ;;  %v5761_v58 = vld [vmem:[%s7930_s26 + $0x1a4] ss:$8 sps:$4 sm:$0xff]  }
  0x1b   :  { %486 = vmatprep.subr.bf16.mxu0 %v5693_v10  ;;  %v5759_v59 = vld [vmem:[%s7930_s26 + $0x1a0] ss:$8 sps:$4 sm:$0xff]   ;;  %v5764_v60 = vld [vmem:[%s7930_s26 + $0x1b4] ss:$8 sps:$4 sm:$0xff]   ;;  %v5762_v61 = vld [vmem:[%s7930_s26 + $0x1b0] ss:$8 sps:$4 sm:$0xff]  }
  0x1c   :  { %v5769_v62 = vld [vmem:[%s7930_s26 + $0x1c4] ss:$8 sps:$4 sm:$0xff]   ;;  %v5767_v63 = vld [vmem:[%s7930_s26 + $0x1c0] ss:$8 sps:$4 sm:$0xff]   ;;  %v5772_v0 = vld [vmem:[%s7930_s26 + $0x1d4] ss:$8 sps:$4 sm:$0xff]  }
  0x1d   :  { %v5770_v1 = vld [vmem:[%s7930_s26 + $0x1d0] ss:$8 sps:$4 sm:$0xff]   ;;  %v64_v2 = vld [vmem:[%s7931_s24 + $0x28] sm:$0xff]  ;;  %v6255_v8 = vld [vmem:[%s7911_s5 + $0xe0] sm:$0xff]  }
  0x1e   :  { %487 = vmatpush1.bf16.msra.mxu0 %v5695_v11  ;;  %v5773_v3 = vld [vmem:[%s7931_s24 + $0x8] ss:$16 sps:$4 sm:$0xff]   ;;  %v4202_v4 = vcombine.high %v64_v2, %v64_v2  ;;  %v4201_v5 = vcombine.low %v64_v2, %v64_v2  ;;  %v6269_v10 = vld [vmem:[%s7911_s5 + $0xf0] sm:$0xff]   ;;  %v6340_v2 = vld [vmem:[%s7911_s5 + $0xa0] sm:$0xff]  }
  0x1f   :  { %488 = vmatprep.subr.bf16.mxu0 %v5696_v12  ;;  %v6248_v7 = vld [vmem:[%s7911_s5 + $0xd8] sm:$0xff]   ;;  %v6262_v9 = vld [vmem:[%s7911_s5 + $0xe8] sm:$0xff]   ;;  %v6283_v12 = vld [vmem:[%s7911_s5 + $0x100] sm:$0xff]  }
  0x20   :  { %v6276_v11 = vld [vmem:[%s7911_s5 + $0xf8] sm:$0xff]  }
  0x22   :  { %489 = vmatpush1.bf16.msra.mxu0 %v5698_v14  ;;  %v128_v14 = vshrl.u32 %v127_v13, 7  ;;  %v6369_v13 = vld [vmem:[%s7911_s5 + $0xc0] sm:$0xff]  }
  0x23   :  { %490 = vmatprep.subr.bf16.mxu0 %v5699_v15 }
  0x24   :  { %v129_v15 = vsub.s32 0, %v128_v14 }
  0x26   :  { %491 = vmatpush1.bf16.msra.mxu0 %v5701_v16  ;;  %v125_v16 = vld [vmem:[%s7912_s3] sm:$0x3] }
  0x27   :  { %492 = vmatprep.subr.bf16.mxu0 %v5702_v17  ;;  %v133_v17 = vsub.s32 1, %v128_v14  ;;  %v6374_v14 = vld [vmem:[%s7911_s5 + $0x108] sm:$0xff]  }
  0x2a   :  { %493 = vmatpush1.bf16.msra.mxu0 %v5704_v18  ;;  %v130_v18 = vrot.slane %v125_v16, %v129_v15  ;;  %v6383_v15 = vld [vmem:[%s7911_s5 + $0xc8] sm:$0xff]  }
  0x2b   :  { %494 = vmatprep.subr.bf16.mxu0 %v5705_v19  ;;  %v134_v19 = vrot.slane %v125_v16, %v133_v17  ;;  %v6388_v16 = vld [vmem:[%s7911_s5 + $0x110] sm:$0xff]  }
  0x2c   :  { %v6397_v17 = vld [vmem:[%s7911_s5 + $0xd0] sm:$0xff]  }
  0x2e   :  { %495 = vmatpush1.bf16.msra.mxu0 %v5707_v20 }
  0x2f   :  { %496 = vmatprep.subr.bf16.mxu0 %v5708_v21  ;;  %v584_v21 = vld [vmem:[%s7913_s0] sm:$0xff] }
  0x32   :  { %497 = vmatpush1.bf16.msra.mxu0 %v5710_v22  ;;  %v585_v22 = vld [vmem:[%s7913_s0 + $0x8] sm:$0xff] }
  0x33   :  { %498 = vmatprep.subr.bf16.mxu0 %v5711_v23 }
  0x36   :  { %499 = vmatpush1.bf16.msra.mxu0 %v5713_v24 }
  0x37   :  { %500 = vmatprep.subr.bf16.mxu0 %v5714_v25 }
  0x3a   :  { %501 = vmatpush1.bf16.msra.mxu0 %v5716_v26 }
  0x3b   :  { %502 = vmatprep.subr.bf16.mxu0 %v5717_v27 }
  0x3e   :  { %503 = vmatpush1.bf16.msra.mxu0 %v5719_v28  ;;  %v587_v28 = vunpack.c.l.bf16 %v584_v21 }
  0x3f   :  { %504 = vmatprep.subr.bf16.mxu0 %v5720_v29 }
  0x42   :  { %505 = vmatpush1.bf16.msra.mxu0 %v5722_v30  ;;  %v589_v30 = vunpack.c.l.bf16 %v585_v22 }
  0x43   :  { %506 = vmatprep.subr.bf16.mxu0 %v5723_v31 }
  0x46   :  { %507 = vmatpush1.bf16.msra.mxu0 %v5725_v32 }
  0x47   :  { %527 = vmatprep.subr.bf16.mxu0 %v5731_v33  ;;  %v588_v33 = vunpack.c.h.bf16 %v584_v21 }
  0x49   :  { %509 = vmatmul.mubr.bf16.vlgmr.msra.gmra.mrb[0].mxu0 %v5726_v35  ;;  %v590_v35 = vunpack.c.h.bf16 %v585_v22 }
  0x4a   :  { %528 = vmatpush1.bf16.msra.mxu0 %v5729_v36  ;;  %518 = vmatprep.mubr.bf16.mxu0 %v4200_v37 }
  0x4b   :  { %529 = vmatprep.subr.bf16.mxu0 %v5734_v38  ;;  %v586_v38 = vld [vmem:[%s7913_s0 + $0x10] sm:$0xff] }
  0x4e   :  { %530 = vmatpush1.bf16.msra.mxu0 %v5732_v39 }
  0x4f   :  { %531 = vmatprep.subr.bf16.mxu0 %v5737_v40 }
  0x51   :  { %519 = vmatmul.mubr.bf16.gmra.mrb[4].mxu0 %v4199_v41 }
  0x52   :  { %532 = vmatpush1.bf16.msra.mxu0 %v5735_v42  ;;  %4263 = vmatprep.mubr.msk.bf16.mxu0 %vm469_vm0, %v5775_v43 }
  0x53   :  { %533 = vmatprep.subr.bf16.mxu0 %v5740_v44 }
  0x56   :  { %534 = vmatpush1.bf16.msra.mxu0 %v5738_v45 }
  0x57   :  { %535 = vmatprep.subr.bf16.mxu0 %v5743_v46  ;;  %v591_v46 = vunpack.c.l.bf16 %v586_v38 }
  0x5a   :  { %536 = vmatpush1.bf16.msra.mxu0 %v5741_v47 }
  0x5b   :  { %537 = vmatprep.subr.bf16.mxu0 %v5746_v48 }
  0x5e   :  { %538 = vmatpush1.bf16.msra.mxu0 %v5744_v49 }
  0x5f   :  { %539 = vmatprep.subr.bf16.mxu0 %v5749_v50  ;;  %v592_v50 = vunpack.c.h.bf16 %v586_v38 }
  0x62   :  { %540 = vmatpush1.bf16.msra.mxu0 %v5747_v51 }
  0x63   :  { %541 = vmatprep.subr.bf16.mxu0 %v5752_v52 }
  0x66   :  { %542 = vmatpush1.bf16.msra.mxu0 %v5750_v53 }
  0x67   :  { %543 = vmatprep.subr.bf16.mxu0 %v5755_v54 }
  0x6a   :  { %544 = vmatpush1.bf16.msra.mxu0 %v5753_v55 }
  0x6b   :  { %545 = vmatprep.subr.bf16.mxu0 %v5758_v56 }
  0x6e   :  { %546 = vmatpush1.bf16.msra.mxu0 %v5756_v57 }
  0x6f   :  { %547 = vmatprep.subr.bf16.mxu0 %v5761_v58 }
  0x72   :  { %548 = vmatpush1.bf16.msra.mxu0 %v5759_v59 }
  0x73   :  { %549 = vmatprep.subr.bf16.mxu0 %v5764_v60  ;;  %v5778_v60 = vld [vmem:[%s7910_s4] sm:$0xff]  }
  0x76   :  { %550 = vmatpush1.bf16.msra.mxu0 %v5762_v61  ;;  %v5779_v61 = vld [vmem:[%s7910_s4 + $0x8] sm:$0xff]  }
  0x77   :  { %551 = vmatprep.subr.bf16.mxu0 %v5769_v62  ;;  %v5780_v62 = vld [vmem:[%s7910_s4 + $0x10] sm:$0xff]  }
  0x7a   :  { %552 = vmatpush1.bf16.msra.mxu0 %v5767_v63  ;;  %v5781_v63 = vld [vmem:[%s7910_s4 + $0x18] sm:$0xff]  }
  0x7b   :  { %553 = vmatprep.subr.bf16.mxu0 %v5772_v0  ;;  %v6325_v0 = vld [vmem:[%s7911_s5 + $0x90] sm:$0xff]  }
  0x7e   :  { %554 = vmatpush1.bf16.msra.mxu0 %v5770_v1  ;;  %v6333_v1 = vld [vmem:[%s7911_s5 + $0x98] sm:$0xff]  }
  0x7f   :  { %1279 = vmatprep.subr.bf16.mxu0 %v5950_v6 }
  0x81   :  { %560 = vmatmul.mubr.bf16.vlgmr.msra.gmra.mrb[0].mxu0 %v5773_v3  ;;  %v6347_v3 = vld [vmem:[%s7911_s5 + $0xa8] sm:$0xff]  }
  0x82   :  { %4264 = vmatprep.mubr.msk.bf16.mxu0 %vm469_vm0, %v4202_v4  ;;  %1280 = vmatpush1.bf16.msra.mxu0 %v6248_v7  ;;  %v6354_v4 = vld [vmem:[%s7911_s5 + $0xb0] sm:$0xff]  }
  0x83   :  { %1281 = vmatprep.subr.bf16.mxu0 %v5950_v6 }
  0x86   :  { %1282 = vmatpush1.bf16.msra.mxu0 %v6255_v8 }
  0x87   :  { %1283 = vmatprep.subr.bf16.mxu0 %v5950_v6 }
  0x89   :  { %570 = vmatmul.mubr.bf16.gmra.mrb[4].mxu0 %v4201_v5  ;;  %v6361_v5 = vld [vmem:[%s7911_s5 + $0xb8] sm:$0xff]  }
  0x8a   :  { %1284 = vmatpush1.bf16.msra.mxu0 %v6262_v9 }
  0x8b   :  { %1285 = vmatprep.subr.bf16.mxu0 %v5950_v6 }
  0x8e   :  { %1286 = vmatpush1.bf16.msra.mxu0 %v6269_v10 }
  0x8f   :  { %1287 = vmatprep.subr.bf16.mxu0 %v5950_v6 }
  0x92   :  { %1288 = vmatpush1.bf16.msra.mxu0 %v6276_v11 }
  0x93   :  { %1289 = vmatprep.subr.bf16.mxu0 %v5950_v6 }
  0x96   :  { %1290 = vmatpush1.bf16.msra.mxu0 %v6283_v12 }
  0x97   :  { %1291 = vmatprep.subr.bf16.mxu0 %v5950_v6 }
  0x9a   :  { %1292 = vmatpush1.bf16.msra.mxu0 %v6374_v14 }
  0x9b   :  { %1293 = vmatprep.subr.bf16.mxu0 %v5950_v6 }
  0x9e   :  { %1294 = vmatpush1.bf16.msra.mxu0 %v6388_v16 }
  0x9f   :  { %1295 = vmatprep.subr.bf16.mxu0 %v5950_v6 }
 0x154   :  { %v561_v20 = vpop.f32.mrb[0].mxu0 }
 0x155   :  { %v5565_v23 = vadd.f32 %v561_v20, %v130_v18  ;;  %v563_v24 = vpop.f32.mrb[1].mxu0 }
 0x156   :  { %v5566_v25 = vadd.f32 %v563_v24, %v134_v19  ;;  %v565_v26 = vpop.f32.mrb[2].mxu0 }
 0x157   :  { %v578_v27 = vmax.f32 %v5565_v23, 0.0  ;;  %v5567_v29 = vadd.f32 %v565_v26, %v130_v18  ;;  %v567_v31 = vpop.f32.mrb[3].mxu0 }
 0x158   :  { %v579_v32 = vmax.f32 %v5566_v25, 0.0  ;;  %v5568_v34 = vadd.f32 %v567_v31, %v134_v19  ;;  %v6417_v31 = vld [vmem:[%s7911_s5] sm:$0xff]  }
 0x159   :  { %v580_v36 = vmax.f32 %v5567_v29, 0.0  ;;  %v593_v39 = vadd.f32 %v587_v28, %v578_v27 }
 0x15a   :  { %v581_v37 = vmax.f32 %v5568_v34, 0.0  ;;  %v594_v41 = vadd.f32 %v588_v33, %v579_v32  ;;  %v6422_v32 = vld [vmem:[%s7911_s5 + $0x48] sm:$0xff]   ;;  %v6440_v34 = vld [vmem:[%s7911_s5 + $0x50] sm:$0xff]  }
 0x15b   :  { %v595_v40 = vadd.f32 %v589_v30, %v580_v36  ;;  %v6435_v33 = vld [vmem:[%s7911_s5 + $0x8] sm:$0xff]  }
 0x15c   :  { %v596_v42 = vadd.f32 %v590_v35, %v581_v37  ;;  %v571_v43 = vpop.f32.mrb[4].mxu0 }
 0x15d   :  { %v599_v44 = vpack.c.bf16 %v595_v40, %v593_v39  ;;  %v5569_v45 = vadd.f32 %v571_v43, %v130_v18  ;;  %v573_v47 = vpop.f32.mrb[5].mxu0  ;;  %v6402_v18 = vld [vmem:[%s7911_s5 + $0x118] sm:$0xff]   ;;  %v6453_v40 = vld [vmem:[%s7911_s5 + $0x10] sm:$0xff]  }
 0x15e   :  { %v600_v48 = vpack.c.bf16 %v596_v42, %v594_v41  ;;  %v5570_v49 = vadd.f32 %v573_v47, %v134_v19  ;;  %v575_v51 = vpop.f32.mrb[6].mxu0  ;;  %1296 = vmatpush1.bf16.msra.mxu0 %v6402_v18  ;;  %v6458_v41 = vld [vmem:[%s7911_s5 + $0x58] sm:$0xff]   ;;  %v6497_v47 = vld [vmem:[%s7911_s5 + $0x28] sm:$0xff]  }
 0x15f   :  { %v582_v52 = vmax.f32 %v5569_v45, 0.0  ;;  %v576_v53 = vpop.f32.mrb[7].mxu0  ;;  %1374 = vmatprep.subr.bf16.mxu0 %v5950_v6  ;;  %v6469_v43 = vld [vmem:[%s7911_s5 + $0x18] sm:$0xff]   ;;  %v6483_v45 = vld [vmem:[%s7911_s5 + $0x20] sm:$0xff]  }
 0x160   :  { %v583_v54 = vmax.f32 %v5570_v49, 0.0  ;;  %621 = vmatprep.subr.bf16.mxu1 %v600_v48  ;;  %v6511_v49 = vld [vmem:[%s7911_s5 + $0x30] sm:$0xff]   ;;  %v6525_v51 = vld [vmem:[%s7911_s5 + $0x38] sm:$0xff]   ;;  %v6539_v53 = vld [vmem:[%s7911_s5 + $0x40] sm:$0xff]  }
 0x161   :  { %v597_v55 = vadd.f32 %v591_v46, %v582_v52  ;;  %622 = vmatpush1.bf16.msra.mxu1 %v599_v44  ;;  %v6488_v46 = vld [vmem:[%s7911_s5 + $0x68] sm:$0xff]   ;;  %v6530_v52 = vld [vmem:[%s7911_s5 + $0x80] sm:$0xff]  }
 0x162   :  { %v598_v56 = vadd.f32 %v592_v50, %v583_v54  ;;  %v6516_v50 = vld [vmem:[%s7911_s5 + $0x78] sm:$0xff]   ;;  %v6544_v54 = vld [vmem:[%s7911_s5 + $0x88] sm:$0xff]  }
 0x163   :  { %v601_v57 = vpack.c.bf16 %v597_v55, %v597_v55  ;;  %v6553_v55 = vld [vmem:[%s7911_s5 + $0x120] sm:$0xff]  }
 0x164   :  { %v602_v58 = vpack.c.bf16 %v598_v56, %v598_v56  ;;  %v6558_v56 = vld [vmem:[%s7911_s5 + $0x168] sm:$0xff]  }
 0x165   :  { %v616_v59 = vsel %vm614_vm1, %v601_v57, 0  ;;  %v6569_v57 = vld [vmem:[%s7911_s5 + $0x128] sm:$0xff]  }
 0x166   :  { %4266 = vmatprep.subr.msk.bf16.mxu1 %vm614_vm1, %v602_v58 }
 0x167   :  { %624 = vmatpush1.bf16.msra.mxu1 %v616_v59 }
 0x168   :  { %677 = vmatprep.subr.bf16.mxu1 %v600_v48 }
 0x16a   :  { %4267 = vmatmul.mubr.msk.bf16.vlgmr.msra.gmra.mrb[0].mxu1 %vm610_vm2, %v5778_v60  ;;  %v6592_v60 = vld [vmem:[%s7911_s5 + $0x178] sm:$0xff]  }
 0x16b   :  { %678 = vmatpush1.bf16.msra.mxu1 %v599_v44  ;;  %709 = vmatprep.mubr.bf16.mxu1 %v5950_v6 }
 0x16c   :  { %4271 = vmatprep.subr.msk.bf16.mxu1 %vm614_vm1, %v602_v58 }
 0x16f   :  { %680 = vmatpush1.bf16.msra.mxu1 %v616_v59 }
 0x170   :  { %733 = vmatprep.subr.bf16.mxu1 %v600_v48 }
 0x172   :  { %4272 = vmatmul.mubr.msk.bf16.vlgmr.msra.gmra.mrb[4].mxu1 %vm610_vm2, %v5779_v61 }
 0x173   :  { %734 = vmatpush1.bf16.msra.mxu1 %v599_v44  ;;  %765 = vmatprep.mubr.bf16.mxu1 %v5950_v6 }
 0x174   :  { %4276 = vmatprep.subr.msk.bf16.mxu1 %vm614_vm1, %v602_v58 }
 0x177   :  { %736 = vmatpush1.bf16.msra.mxu1 %v616_v59 }
 0x178   :  { %789 = vmatprep.subr.bf16.mxu1 %v600_v48  ;;  %v6502_v48 = vld [vmem:[%s7911_s5 + $0x70] sm:$0xff]  }
 0x17a   :  { %4277 = vmatmul.mubr.msk.bf16.vlgmr.msra.gmra.mrb[8].mxu1 %vm610_vm2, %v5780_v62 }
 0x17b   :  { %790 = vmatpush1.bf16.msra.mxu1 %v599_v44  ;;  %821 = vmatprep.mubr.bf16.mxu1 %v5950_v6  ;;  %v6474_v44 = vld [vmem:[%s7911_s5 + $0x60] sm:$0xff]  }
 0x17c   :  { %4281 = vmatprep.subr.msk.bf16.mxu1 %vm614_vm1, %v602_v58  ;;  %v6574_v58 = vld [vmem:[%s7911_s5 + $0x170] sm:$0xff]  }
 0x17f   :  { %792 = vmatpush1.bf16.msra.mxu1 %v616_v59  ;;  %v6587_v59 = vld [vmem:[%s7911_s5 + $0x130] sm:$0xff]  }
 0x180   :  { %929 = vmatprep.subr.bf16.mxu1 %v5950_v6 }
 0x182   :  { %4282 = vmatmul.mubr.msk.bf16.vlgmr.msra.gmra.mrb[12].mxu1 %vm610_vm2, %v5781_v63 }
 0x183   :  { %930 = vmatpush1.bf16.msra.mxu1 %v6325_v0 }
 0x184   :  { %931 = vmatprep.subr.bf16.mxu1 %v5950_v6 }
 0x187   :  { %932 = vmatpush1.bf16.msra.mxu1 %v6333_v1 }
 0x188   :  { %933 = vmatprep.subr.bf16.mxu1 %v5950_v6 }
 0x18b   :  { %934 = vmatpush1.bf16.msra.mxu1 %v6340_v2 }
 0x18c   :  { %935 = vmatprep.subr.bf16.mxu1 %v5950_v6 }
 0x18f   :  { %936 = vmatpush1.bf16.msra.mxu1 %v6347_v3 }
 0x190   :  { %937 = vmatprep.subr.bf16.mxu1 %v5950_v6 }
 0x193   :  { %938 = vmatpush1.bf16.msra.mxu1 %v6354_v4 }
 0x194   :  { %939 = vmatprep.subr.bf16.mxu1 %v5950_v6 }
 0x197   :  { %940 = vmatpush1.bf16.msra.mxu1 %v6361_v5 }
 0x198   :  { %941 = vmatprep.subr.bf16.mxu1 %v5950_v6 }
 0x19b   :  { %942 = vmatpush1.bf16.msra.mxu1 %v6369_v13 }
 0x19c   :  { %943 = vmatprep.subr.bf16.mxu1 %v5950_v6 }
 0x19f   :  { %944 = vmatpush1.bf16.msra.mxu1 %v6383_v15 }
 0x1a0   :  { %945 = vmatprep.subr.bf16.mxu1 %v5950_v6 }
 0x1a3   :  { %946 = vmatpush1.bf16.msra.mxu1 %v6397_v17 }
 0x1a4   :  { %1027 = vmatprep.subr.bf16.mxu1 %v5950_v6 }
 0x23d   :  { %v655_v19 = vpop.f32.mrb[0].mxu1 }
 0x23e   :  { %v657_v20 = vpop.f32.mrb[1].mxu1 }
 0x23f   :  { %v659_v21 = vpop.f32.mrb[2].mxu1 }
 0x240   :  { %v6408_v22 = vpack.c.bf16 %v659_v21, %v655_v19  ;;  %v661_v23 = vpop.f32.mrb[3].mxu1  ;;  %v6601_v19 = vld [vmem:[%s7911_s5 + $0x138] sm:$0xff]  }
 0x241   :  { %v665_v24 = vpack.c.bf16 %v661_v23, %v657_v20  ;;  %v6606_v20 = vld [vmem:[%s7911_s5 + $0x180] sm:$0xff]  }
 0x245   :  { %v711_v25 = vpop.f32.mrb[4].mxu1 }
 0x246   :  { %v713_v26 = vpop.f32.mrb[5].mxu1 }
 0x247   :  { %v715_v27 = vpop.f32.mrb[6].mxu1 }
 0x248   :  { %v6410_v28 = vpack.c.bf16 %v715_v27, %v711_v25  ;;  %v717_v29 = vpop.f32.mrb[7].mxu1  ;;  %v6624_v25 = vld [vmem:[%s7911_s5 + $0x188] sm:$0xff]   ;;  %v6638_v27 = vld [vmem:[%s7911_s5 + $0x190] sm:$0xff]  }
 0x249   :  { %v6412_v30 = vpack.c.bf16 %v717_v29, %v713_v26  ;;  %v6633_v26 = vld [vmem:[%s7911_s5 + $0x148] sm:$0xff]   ;;  %v6647_v29 = vld [vmem:[%s7911_s5 + $0x150] sm:$0xff]  }
 0x24b   :  { %4310 = vmatprep.mubr.msk.bf16.mxu1 %vm925_vm3, %v6412_v30  ;;  %4394 = vmatprep.mubr.msk.bf16.mxu0 %vm925_vm3, %v6412_v30 }
 0x24c   :  { %962 = vmatmul.mubr.bf16.vlgmr.msra.gmra.mrb[16].mxu1 %v6410_v28  ;;  %1312 = vmatmul.mubr.bf16.vlgmr.msra.gmra.mrb[8].mxu0 %v6410_v28 }
 0x24d   :  { %1028 = vmatpush1.bf16.msra.mxu1 %v6417_v31  ;;  %1375 = vmatpush1.bf16.msra.mxu0 %v6422_v32  ;;  %v767_v35 = vpop.f32.mrb[8].mxu1 }
 0x24e   :  { %4320 = vmatprep.mubr.msk.bf16.mxu1 %vm925_vm3, %v665_v24  ;;  %4404 = vmatprep.mubr.msk.bf16.mxu0 %vm925_vm3, %v665_v24  ;;  %v769_v36 = vpop.f32.mrb[9].mxu1  ;;  %v6619_v24 = vld [vmem:[%s7911_s5 + $0x140] sm:$0xff]  }
 0x24f   :  { %1029 = vmatprep.subr.bf16.mxu1 %v5950_v6  ;;  %1376 = vmatprep.subr.bf16.mxu0 %v5950_v6  ;;  %v771_v37 = vpop.f32.mrb[10].mxu1 }
 0x250   :  { %v6446_v38 = vpack.c.bf16 %v771_v37, %v767_v35  ;;  %v773_v39 = vpop.f32.mrb[11].mxu1  ;;  %v6652_v35 = vld [vmem:[%s7911_s5 + $0x198] sm:$0xff]   ;;  %v6666_v37 = vld [vmem:[%s7911_s5 + $0x1a0] sm:$0xff]  }
 0x251   :  { %1030 = vmatpush1.bf16.msra.mxu1 %v6435_v33  ;;  %1377 = vmatpush1.bf16.msra.mxu0 %v6440_v34  ;;  %v6460_v42 = vpack.c.bf16 %v773_v39, %v769_v36  ;;  %v6661_v36 = vld [vmem:[%s7911_s5 + $0x158] sm:$0xff]   ;;  %v6675_v39 = vld [vmem:[%s7911_s5 + $0x160] sm:$0xff]  }
 0x252   :  { %1031 = vmatprep.subr.bf16.mxu1 %v5950_v6  ;;  %1378 = vmatprep.subr.bf16.mxu0 %v5950_v6 }
 0x255   :  { %1032 = vmatpush1.bf16.msra.mxu1 %v6453_v40  ;;  %1379 = vmatpush1.bf16.msra.mxu0 %v6458_v41  ;;  %v823_v61 = vpop.f32.mrb[12].mxu1 }
 0x256   :  { %1033 = vmatprep.subr.bf16.mxu1 %v5950_v6  ;;  %1380 = vmatprep.subr.bf16.mxu0 %v5950_v6  ;;  %v825_v62 = vpop.f32.mrb[13].mxu1 }
 0x257   :  { %v827_v63 = vpop.f32.mrb[14].mxu1 }
 0x258   :  { %v6608_v21 = vpack.c.bf16 %v827_v63, %v823_v61  ;;  %v6680_v61 = vld [vmem:[%s7911_s5 + $0x1a8] sm:$0xff]   ;;  %v6955_v63 = vld [vmem:[%s7914_s8 + $0xf8] sm:$0xff]  }
 0x259   :  { %1034 = vmatpush1.bf16.msra.mxu1 %v6469_v43  ;;  %1381 = vmatpush1.bf16.msra.mxu0 %v6474_v44 }
 0x25a   :  { %1035 = vmatprep.subr.bf16.mxu1 %v5950_v6  ;;  %1382 = vmatprep.subr.bf16.mxu0 %v5950_v6 }
 0x25d   :  { %1036 = vmatpush1.bf16.msra.mxu1 %v6483_v45  ;;  %1383 = vmatpush1.bf16.msra.mxu0 %v6488_v46 }
 0x25e   :  { %1037 = vmatprep.subr.bf16.mxu1 %v5950_v6  ;;  %1384 = vmatprep.subr.bf16.mxu0 %v5950_v6 }
 0x261   :  { %1038 = vmatpush1.bf16.msra.mxu1 %v6497_v47  ;;  %1385 = vmatpush1.bf16.msra.mxu0 %v6502_v48 }
 0x262   :  { %1039 = vmatprep.subr.bf16.mxu1 %v5950_v6  ;;  %1386 = vmatprep.subr.bf16.mxu0 %v5950_v6 }
 0x265   :  { %1040 = vmatpush1.bf16.msra.mxu1 %v6511_v49  ;;  %1387 = vmatpush1.bf16.msra.mxu0 %v6516_v50 }
 0x266   :  { %1041 = vmatprep.subr.bf16.mxu1 %v5950_v6  ;;  %1388 = vmatprep.subr.bf16.mxu0 %v5950_v6 }
 0x269   :  { %1042 = vmatpush1.bf16.msra.mxu1 %v6525_v51  ;;  %1389 = vmatpush1.bf16.msra.mxu0 %v6530_v52 }
 0x26a   :  { %1043 = vmatprep.subr.bf16.mxu1 %v5950_v6  ;;  %1390 = vmatprep.subr.bf16.mxu0 %v5950_v6 }
 0x26d   :  { %1044 = vmatpush1.bf16.msra.mxu1 %v6539_v53  ;;  %1391 = vmatpush1.bf16.msra.mxu0 %v6544_v54 }
 0x26e   :  { %1144 = vmatprep.subr.bf16.mxu1 %v5950_v6  ;;  %1488 = vmatprep.subr.bf16.mxu0 %v5950_v6 }
 0x270   :  { %1060 = vmatmul.mubr.bf16.vlgmr.msra.gmra.mrb[16].mxu1 %v6408_v22  ;;  %1407 = vmatmul.mubr.bf16.vlgmr.msra.gmra.mrb[8].mxu0 %v6408_v22  ;;  %v829_v22 = vpop.f32.mrb[15].mxu1 }
 0x271   :  { %1145 = vmatpush1.bf16.msra.mxu1 %v6553_v55  ;;  %1489 = vmatpush1.bf16.msra.mxu0 %v6558_v56  ;;  %v6612_v23 = vpack.c.bf16 %v829_v22, %v825_v62  ;;  %v6950_v62 = vld [vmem:[%s7914_s8 + $0xb8] sm:$0xff]  }
 0x272   :  { %1146 = vmatprep.subr.bf16.mxu1 %v5950_v6  ;;  %1490 = vmatprep.subr.bf16.mxu0 %v5950_v6 }
 0x273   :  { %4348 = vmatprep.mubr.msk.bf16.mxu1 %vm925_vm3, %v6460_v42  ;;  %4432 = vmatprep.mubr.msk.bf16.mxu0 %vm925_vm3, %v6460_v42 }
 0x275   :  { %1147 = vmatpush1.bf16.msra.mxu1 %v6569_v57  ;;  %1491 = vmatpush1.bf16.msra.mxu0 %v6574_v58 }
 0x276   :  { %1148 = vmatprep.subr.bf16.mxu1 %v5950_v6  ;;  %1492 = vmatprep.subr.bf16.mxu0 %v5950_v6 }
 0x279   :  { %1149 = vmatpush1.bf16.msra.mxu1 %v6587_v59  ;;  %1493 = vmatpush1.bf16.msra.mxu0 %v6592_v60 }
 0x27a   :  { %1150 = vmatprep.subr.bf16.mxu1 %v5950_v6  ;;  %1494 = vmatprep.subr.bf16.mxu0 %v5950_v6 }
 0x27d   :  { %1151 = vmatpush1.bf16.msra.mxu1 %v6601_v19  ;;  %1495 = vmatpush1.bf16.msra.mxu0 %v6606_v20 }
 0x27e   :  { %1152 = vmatprep.subr.bf16.mxu1 %v5950_v6  ;;  %1496 = vmatprep.subr.bf16.mxu0 %v5950_v6 }
 0x281   :  { %1153 = vmatpush1.bf16.msra.mxu1 %v6619_v24  ;;  %1497 = vmatpush1.bf16.msra.mxu0 %v6624_v25 }
 0x282   :  { %1154 = vmatprep.subr.bf16.mxu1 %v5950_v6  ;;  %1498 = vmatprep.subr.bf16.mxu0 %v5950_v6 }
 0x285   :  { %1155 = vmatpush1.bf16.msra.mxu1 %v6633_v26  ;;  %1499 = vmatpush1.bf16.msra.mxu0 %v6638_v27 }
 0x286   :  { %1156 = vmatprep.subr.bf16.mxu1 %v5950_v6  ;;  %1500 = vmatprep.subr.bf16.mxu0 %v5950_v6 }
 0x289   :  { %1157 = vmatpush1.bf16.msra.mxu1 %v6647_v29  ;;  %1501 = vmatpush1.bf16.msra.mxu0 %v6652_v35 }
 0x28a   :  { %1158 = vmatprep.subr.bf16.mxu1 %v5950_v6  ;;  %1502 = vmatprep.subr.bf16.mxu0 %v5950_v6 }
 0x28d   :  { %1159 = vmatpush1.bf16.msra.mxu1 %v6661_v36  ;;  %1503 = vmatpush1.bf16.msra.mxu0 %v6666_v37 }
 0x28e   :  { %1160 = vmatprep.subr.bf16.mxu1 %v5950_v6  ;;  %1504 = vmatprep.subr.bf16.mxu0 %v5950_v6 }
 0x291   :  { %1161 = vmatpush1.bf16.msra.mxu1 %v6675_v39  ;;  %1505 = vmatpush1.bf16.msra.mxu0 %v6680_v61 }
 0x292   :  { %1533 = vmatprep.subr.bf16.mxu1 %v5950_v6  ;;  %1663 = vmatprep.subr.bf16.mxu0 %v5950_v6 }
 0x294   :  { %1177 = vmatmul.mubr.bf16.vlgmr.msra.gmra.mrb[16].mxu1 %v6446_v38  ;;  %1521 = vmatmul.mubr.bf16.vlgmr.msra.gmra.mrb[8].mxu0 %v6446_v38 }
 0x295   :  { %1534 = vmatpush1.bf16.msra.mxu1 %v6325_v0  ;;  %4433 = vmatprep.mubr.msk.bf16.mxu1 %vm925_vm3, %v6460_v42 }
 0x296   :  { %1664 = vmatpush1.bf16.msra.mxu0 %v6248_v7  ;;  %4436 = vmatprep.mubr.msk.bf16.mxu0 %vm925_vm3, %v6460_v42  ;;  %v5951_v7 = vmov 0.0  }
 0x297   :  { %1535 = vmatprep.subr.bf16.mxu1 %v5950_v6  ;;  %1665 = vmatprep.subr.bf16.mxu0 %v5950_v6 }
 0x299   :  { %1536 = vmatpush1.bf16.msra.mxu1 %v6333_v1 }
 0x29a   :  { %1666 = vmatpush1.bf16.msra.mxu0 %v6255_v8  ;;  %1537 = vmatprep.subr.bf16.mxu1 %v5950_v6 }
 0x29b   :  { %1667 = vmatprep.subr.bf16.mxu0 %v5950_v6 }
 0x29d   :  { %1538 = vmatpush1.bf16.msra.mxu1 %v6340_v2 }
 0x29e   :  { %1668 = vmatpush1.bf16.msra.mxu0 %v6262_v9  ;;  %1539 = vmatprep.subr.bf16.mxu1 %v5950_v6 }
 0x29f   :  { %1669 = vmatprep.subr.bf16.mxu0 %v5950_v6 }
 0x2a1   :  { %1540 = vmatpush1.bf16.msra.mxu1 %v6347_v3 }
 0x2a2   :  { %1670 = vmatpush1.bf16.msra.mxu0 %v6269_v10  ;;  %1541 = vmatprep.subr.bf16.mxu1 %v5950_v6 }
 0x2a3   :  { %1671 = vmatprep.subr.bf16.mxu0 %v5950_v6 }
 0x2a5   :  { %1542 = vmatpush1.bf16.msra.mxu1 %v6354_v4  ;;  %v6823_v4 = vld [vmem:[%s7914_s8 + $0xc0] sm:$0xff]  }
 0x2a6   :  { %1672 = vmatpush1.bf16.msra.mxu0 %v6276_v11  ;;  %1543 = vmatprep.subr.bf16.mxu1 %v5950_v6 }
 0x2a7   :  { %1673 = vmatprep.subr.bf16.mxu0 %v5950_v6 }
 0x2a9   :  { %1544 = vmatpush1.bf16.msra.mxu1 %v6361_v5  ;;  %v6830_v5 = vld [vmem:[%s7914_s8 + $0xc8] sm:$0xff]  }
 0x2aa   :  { %1674 = vmatpush1.bf16.msra.mxu0 %v6283_v12  ;;  %1545 = vmatprep.subr.bf16.mxu1 %v5950_v6 }
 0x2ab   :  { %1675 = vmatprep.subr.bf16.mxu0 %v5950_v6 }
 0x2ad   :  { %1546 = vmatpush1.bf16.msra.mxu1 %v6369_v13  ;;  %v6837_v13 = vld [vmem:[%s7914_s8 + $0xd0] sm:$0xff]  }
 0x2ae   :  { %1676 = vmatpush1.bf16.msra.mxu0 %v6374_v14  ;;  %1547 = vmatprep.subr.bf16.mxu1 %v5950_v6  ;;  %v6844_v14 = vld [vmem:[%s7914_s8 + $0xd8] sm:$0xff]  }
 0x2af   :  { %1677 = vmatprep.subr.bf16.mxu0 %v5950_v6 }
 0x2b1   :  { %1548 = vmatpush1.bf16.msra.mxu1 %v6383_v15  ;;  %v6851_v15 = vld [vmem:[%s7914_s8 + $0xe0] sm:$0xff]  }
 0x2b2   :  { %1678 = vmatpush1.bf16.msra.mxu0 %v6388_v16  ;;  %1549 = vmatprep.subr.bf16.mxu1 %v5950_v6  ;;  %v6858_v16 = vld [vmem:[%s7914_s8 + $0xe8] sm:$0xff]  }
 0x2b3   :  { %1679 = vmatprep.subr.bf16.mxu0 %v5950_v6 }
 0x2b5   :  { %1550 = vmatpush1.bf16.msra.mxu1 %v6397_v17 }
 0x2b6   :  { %1680 = vmatpush1.bf16.msra.mxu0 %v6402_v18  ;;  %1574 = vmatprep.subr.bf16.mxu1 %v5950_v6 }
 0x2b7   :  { %1704 = vmatprep.subr.bf16.mxu0 %v5950_v6 }
 0x2b8   :  { %1566 = vmatmul.mubr.bf16.vlgmr.msra.gmra.mrb[20].mxu1 %v6446_v38 }
 0x2b9   :  { %1696 = vmatmul.mubr.bf16.vlgmr.msra.gmra.mrb[12].mxu0 %v6446_v38  ;;  %1575 = vmatpush1.bf16.msra.mxu1 %v6417_v31  ;;  %v4439_v31 = vld [vmem:[%s7915_s6] ss:$0 sm:$0xff] }
 0x2ba   :  { %4434 = vmatprep.mubr.msk.bf16.mxu1 %vm925_vm3, %v6412_v30  ;;  %1705 = vmatpush1.bf16.msra.mxu0 %v6422_v32 }
 0x2bb   :  { %4437 = vmatprep.mubr.msk.bf16.mxu0 %vm925_vm3, %v6412_v30  ;;  %1576 = vmatprep.subr.bf16.mxu1 %v5950_v6 }
 0x2bc   :  { %1706 = vmatprep.subr.bf16.mxu0 %v5950_v6 }
 0x2bd   :  { %1577 = vmatpush1.bf16.msra.mxu1 %v6435_v33 }
 0x2be   :  { %1707 = vmatpush1.bf16.msra.mxu0 %v6440_v34  ;;  %1578 = vmatprep.subr.bf16.mxu1 %v5950_v6 }
 0x2bf   :  { %1708 = vmatprep.subr.bf16.mxu0 %v5950_v6 }
 0x2c1   :  { %1579 = vmatpush1.bf16.msra.mxu1 %v6453_v40 }
 0x2c2   :  { %1709 = vmatpush1.bf16.msra.mxu0 %v6458_v41  ;;  %1580 = vmatprep.subr.bf16.mxu1 %v5950_v6 }
 0x2c3   :  { %1710 = vmatprep.subr.bf16.mxu0 %v5950_v6 }
 0x2c5   :  { %1581 = vmatpush1.bf16.msra.mxu1 %v6469_v43 }
 0x2c6   :  { %1711 = vmatpush1.bf16.msra.mxu0 %v6474_v44  ;;  %1582 = vmatprep.subr.bf16.mxu1 %v5950_v6 }
 0x2c7   :  { %1712 = vmatprep.subr.bf16.mxu0 %v5950_v6 }
 0x2c9   :  { %1583 = vmatpush1.bf16.msra.mxu1 %v6483_v45 }
 0x2ca   :  { %1713 = vmatpush1.bf16.msra.mxu0 %v6488_v46  ;;  %1584 = vmatprep.subr.bf16.mxu1 %v5950_v6 }
 0x2cb   :  { %1714 = vmatprep.subr.bf16.mxu0 %v5950_v6 }
 0x2cd   :  { %1585 = vmatpush1.bf16.msra.mxu1 %v6497_v47 }
 0x2ce   :  { %1715 = vmatpush1.bf16.msra.mxu0 %v6502_v48  ;;  %1586 = vmatprep.subr.bf16.mxu1 %v5950_v6 }
 0x2cf   :  { %1716 = vmatprep.subr.bf16.mxu0 %v5950_v6 }
 0x2d1   :  { %1587 = vmatpush1.bf16.msra.mxu1 %v6511_v49  ;;  %v1802_v49 = vld [vmem:[%s7916_s7] sm:$0xf] }
 0x2d2   :  { %1717 = vmatpush1.bf16.msra.mxu0 %v6516_v50  ;;  %1588 = vmatprep.subr.bf16.mxu1 %v5950_v6  ;;  %v4441_v50 = vld [vmem:[%s7916_s7 + $0x4] sm:$0xf] }
 0x2d3   :  { %1718 = vmatprep.subr.bf16.mxu0 %v5950_v6 }
 0x2d5   :  { %1589 = vmatpush1.bf16.msra.mxu1 %v6525_v51  ;;  %v4443_v51 = vld [vmem:[%s7916_s7 + $0x8] sm:$0xf] }
 0x2d6   :  { %1719 = vmatpush1.bf16.msra.mxu0 %v6530_v52  ;;  %1590 = vmatprep.subr.bf16.mxu1 %v5950_v6  ;;  %v4445_v52 = vld [vmem:[%s7916_s7 + $0xc] sm:$0xf] }
 0x2d7   :  { %1720 = vmatprep.subr.bf16.mxu0 %v5950_v6 }
 0x2d9   :  { %1591 = vmatpush1.bf16.msra.mxu1 %v6539_v53  ;;  %v6893_v53 = vld [vmem:[%s7914_s8 + $0x80] sm:$0xff]  }
 0x2da   :  { %1721 = vmatpush1.bf16.msra.mxu0 %v6544_v54  ;;  %1618 = vmatprep.subr.bf16.mxu1 %v5950_v6  ;;  %v6900_v54 = vld [vmem:[%s7914_s8 + $0x88] sm:$0xff]  }
 0x2db   :  { %1745 = vmatprep.subr.bf16.mxu0 %v5950_v6 }
 0x2dc   :  { %1607 = vmatmul.mubr.bf16.vlgmr.msra.gmra.mrb[20].mxu1 %v6410_v28 }
 0x2dd   :  { %1737 = vmatmul.mubr.bf16.vlgmr.msra.gmra.mrb[12].mxu0 %v6410_v28  ;;  %1619 = vmatpush1.bf16.msra.mxu1 %v6553_v55  ;;  %v6909_v55 = vld [vmem:[%s7914_s8 + $0x90] sm:$0xff]  }
 0x2de   :  { %1746 = vmatpush1.bf16.msra.mxu0 %v6558_v56  ;;  %1620 = vmatprep.subr.bf16.mxu1 %v5950_v6  ;;  %v6916_v56 = vld [vmem:[%s7914_s8 + $0x98] sm:$0xff]  }
 0x2df   :  { %1747 = vmatprep.subr.bf16.mxu0 %v5950_v6  ;;  %4435 = vmatprep.mubr.msk.bf16.mxu1 %vm925_vm3, %v6612_v23 }
 0x2e0   :  { %4438 = vmatprep.mubr.msk.bf16.mxu0 %vm925_vm3, %v6612_v23 }
 0x2e1   :  { %1621 = vmatpush1.bf16.msra.mxu1 %v6569_v57  ;;  %v6923_v57 = vld [vmem:[%s7914_s8 + $0xa0] sm:$0xff]  }
 0x2e2   :  { %1748 = vmatpush1.bf16.msra.mxu0 %v6574_v58  ;;  %1622 = vmatprep.subr.bf16.mxu1 %v5950_v6  ;;  %v6930_v58 = vld [vmem:[%s7914_s8 + $0xa8] sm:$0xff]  }
 0x2e3   :  { %1749 = vmatprep.subr.bf16.mxu0 %v5950_v6 }
 0x2e5   :  { %1623 = vmatpush1.bf16.msra.mxu1 %v6587_v59  ;;  %v6938_v59 = vld [vmem:[%s7914_s8 + $0xb0] sm:$0xff]  }
 0x2e6   :  { %1750 = vmatpush1.bf16.msra.mxu0 %v6592_v60  ;;  %1624 = vmatprep.subr.bf16.mxu1 %v5950_v6  ;;  %v6943_v60 = vld [vmem:[%s7914_s8 + $0xf0] sm:$0xff]  }
 0x2e7   :  { %1751 = vmatprep.subr.bf16.mxu0 %v5950_v6 }
 0x2e9   :  { %1625 = vmatpush1.bf16.msra.mxu1 %v6601_v19 }
 0x2ea   :  { %1752 = vmatpush1.bf16.msra.mxu0 %v6606_v20  ;;  %1626 = vmatprep.subr.bf16.mxu1 %v5950_v6 }
 0x2eb   :  { %1753 = vmatprep.subr.bf16.mxu0 %v5950_v6 }
 0x2ed   :  { %1627 = vmatpush1.bf16.msra.mxu1 %v6619_v24  ;;  %v6968_v24 = vld [vmem:[%s7914_s8] sm:$0xff]  }
 0x2ee   :  { %1754 = vmatpush1.bf16.msra.mxu0 %v6624_v25  ;;  %1628 = vmatprep.subr.bf16.mxu1 %v5950_v6  ;;  %v6973_v25 = vld [vmem:[%s7914_s8 + $0x40] sm:$0xff]  }
 0x2ef   :  { %1755 = vmatprep.subr.bf16.mxu0 %v5950_v6 }
 0x2f1   :  { %1629 = vmatpush1.bf16.msra.mxu1 %v6633_v26 }
 0x2f2   :  { %1756 = vmatpush1.bf16.msra.mxu0 %v6638_v27  ;;  %1630 = vmatprep.subr.bf16.mxu1 %v5950_v6 }
 0x2f3   :  { %1757 = vmatprep.subr.bf16.mxu0 %v5950_v6 }
 0x2f5   :  { %1631 = vmatpush1.bf16.msra.mxu1 %v6647_v29 }
 0x2f6   :  { %1758 = vmatpush1.bf16.msra.mxu0 %v6652_v35  ;;  %1632 = vmatprep.subr.bf16.mxu1 %v5950_v6 }
 0x2f7   :  { %1759 = vmatprep.subr.bf16.mxu0 %v5950_v6 }
 0x2f9   :  { %1633 = vmatpush1.bf16.msra.mxu1 %v6661_v36  ;;  %v6984_v36 = vld [vmem:[%s7914_s8 + $0x8] sm:$0xff]  }
 0x2fa   :  { %1760 = vmatpush1.bf16.msra.mxu0 %v6666_v37  ;;  %1634 = vmatprep.subr.bf16.mxu1 %v5950_v6  ;;  %v6989_v37 = vld [vmem:[%s7914_s8 + $0x48] sm:$0xff]  }
 0x2fb   :  { %1761 = vmatprep.subr.bf16.mxu0 %v5950_v6 }
 0x2fd   :  { %1635 = vmatpush1.bf16.msra.mxu1 %v6675_v39  ;;  %v7002_v39 = vld [vmem:[%s7914_s8 + $0x10] sm:$0xff]  }
 0x2fe   :  { %1762 = vmatpush1.bf16.msra.mxu0 %v6680_v61  ;;  %4997 = vmatprep.subr.bf16.mxu1 %v5951_v7  ;;  %v7007_v61 = vld [vmem:[%s7914_s8 + $0x50] sm:$0xff]  }
 0x2ff   :  { %5081 = vmatprep.subr.bf16.mxu0 %v5951_v7 }
 0x300   :  { %1651 = vmatmul.mubr.bf16.vlgmr.msra.gmra.mrb[20].mxu1 %v6608_v21 }
 0x301   :  { %1778 = vmatmul.mubr.bf16.vlgmr.msra.gmra.mrb[12].mxu0 %v6608_v21  ;;  %4999 = vmatprep.mubr.msk.bf16.mxu1 %vm5952_vm4, %v5951_v7 }
 0x302   :  { %5097 = vmatprep.mubr.msk.bf16.mxu0 %vm5952_vm4, %v5951_v7  ;;  %5082 = vmatpush3.bf16.msra.mxu0 %v6823_v4 }
 0x303   :  { %5083 = vmatprep.subr.bf16.mxu0 %v5951_v7 }
 0x306   :  { %5084 = vmatpush3.bf16.msra.mxu0 %v6830_v5 }
 0x307   :  { %5085 = vmatprep.subr.bf16.mxu0 %v5951_v7 }
 0x30a   :  { %5086 = vmatpush3.bf16.msra.mxu0 %v6837_v13 }
 0x30b   :  { %5087 = vmatprep.subr.bf16.mxu0 %v5951_v7 }
 0x30e   :  { %5088 = vmatpush3.bf16.msra.mxu0 %v6844_v14 }
 0x30f   :  { %5089 = vmatprep.subr.bf16.mxu0 %v5951_v7 }
 0x312   :  { %5090 = vmatpush3.bf16.msra.mxu0 %v6851_v15 }
 0x313   :  { %5091 = vmatprep.subr.bf16.mxu0 %v5951_v7 }
 0x316   :  { %5092 = vmatpush3.bf16.msra.mxu0 %v6858_v16 }
 0x317   :  { %5093 = vmatprep.subr.bf16.mxu0 %v5951_v7 }
 0x31a   :  { %5094 = vmatpush3.bf16.msra.mxu0 %v6943_v60 }
 0x31b   :  { %5095 = vmatprep.subr.bf16.mxu0 %v5951_v7 }
 0x31e   :  { %5096 = vmatpush3.bf16.msra.mxu0 %v6955_v63 }
 0x31f   :  { %5101 = vmatprep.subr.bf16.mxu0 %v5951_v7 }
 0x367   :  { %v1178_v6 = vpop.f32.mrb[16].mxu1  ;;  %v1522_v8 = vpop.f32.mrb[8].mxu0 }
 0x368   :  { %v1531_v9 = vmax.f32 %v1178_v6, %v1522_v8  ;;  %v1180_v10 = vpop.f32.mrb[17].mxu1  ;;  %v1524_v11 = vpop.f32.mrb[9].mxu0 }
 0x369   :  { %v1181_v12 = vpop.f32.mrb[18].mxu1  ;;  %v1525_v0 = vpop.f32.mrb[10].mxu0  ;;  %v7018_v11 = vld [vmem:[%s7914_s8 + $0x18] sm:$0xff]  }
 0x36a   :  { %v1532_v1 = vmax.f32 %v1181_v12, %v1525_v0  ;;  %v1183_v2 = vpop.f32.mrb[19].mxu1  ;;  %v1527_v3 = vpop.f32.mrb[11].mxu0  ;;  %v7023_v12 = vld [vmem:[%s7914_s8 + $0x58] sm:$0xff]   ;;  %v7032_v0 = vld [vmem:[%s7914_s8 + $0x20] sm:$0xff]  }
 0x36b   :  { %v7046_v2 = vld [vmem:[%s7914_s8 + $0x28] sm:$0xff]  }
 0x36c   :  { %v7051_v3 = vld [vmem:[%s7914_s8 + $0x68] sm:$0xff]  }
 0x3d3   :  { %v1652_v17 = vpop.f32.mrb[20].mxu1 }
 0x3d4   :  { %v1661_v18 = vmax.f32 %v1531_v9, %v1652_v17  ;;  %v1779_v28 = vpop.f32.mrb[12].mxu0  ;;  %v1654_v30 = vpop.f32.mrb[21].mxu1  ;;  %v7060_v17 = vld [vmem:[%s7914_s8 + $0x30] sm:$0xff]  }
 0x3d5   :  { %v1781_v32 = vpop.f32.mrb[13].mxu0  ;;  %v1655_v33 = vpop.f32.mrb[22].mxu1  ;;  %v7079_v30 = vld [vmem:[%s7914_s8 + $0x78] sm:$0xff]  }
 0x3d6   :  { %v1788_v34 = vmax.f32 %v1661_v18, %v1779_v28  ;;  %v1662_v38 = vmax.f32 %v1532_v1, %v1655_v33  ;;  %v1782_v40 = vpop.f32.mrb[14].mxu0  ;;  %v1657_v41 = vpop.f32.mrb[23].mxu1  ;;  %v7037_v1 = vld [vmem:[%s7914_s8 + $0x60] sm:$0xff]   ;;  %v7065_v18 = vld [vmem:[%s7914_s8 + $0x70] sm:$0xff]   ;;  %v7074_v28 = vld [vmem:[%s7914_s8 + $0x38] sm:$0xff]  }
 0x3d7   :  { %v1784_v42 = vpop.f32.mrb[15].mxu0 }
 0x3d8   :  { %v1797_v43 = vadd.f32 %v4439_v31, %v1788_v34  ;;  %v1789_v44 = vmax.f32 %v1662_v38, %v1782_v40  ;;  %v7090_v38 = vld [vmem:[%s7914_s8 + $0x100] sm:$0xff]   ;;  %v7106_v42 = vld [vmem:[%s7914_s8 + $0x108] sm:$0xff]  }
 0x3d9   :  { %v7095_v40 = vld [vmem:[%s7914_s8 + $0x140] sm:$0xff]  }
 0x3da   :  { %v1798_v45 = vadd.f32 %v4439_v31, %v1789_v44  ;;  %v1799_v46 = vmax.f32 %v1797_v43, 0.0  ;;  %v7111_v43 = vld [vmem:[%s7914_s8 + $0x148] sm:$0xff]   ;;  %v7124_v44 = vld [vmem:[%s7914_s8 + $0x110] sm:$0xff]  }
 0x3dc   :  { %v1800_v47 = vmax.f32 %v1798_v45, 0.0  ;;  %v7129_v45 = vld [vmem:[%s7914_s8 + $0x150] sm:$0xff]  }
 0x3de   :  { %v1801_v48 = vpack.c.bf16 %v1800_v47, %v1799_v46  ;;  %v7138_v46 = vld [vmem:[%s7914_s8 + $0x118] sm:$0xff]  }
 0x3df   :  { %v7143_v47 = vld [vmem:[%s7914_s8 + $0x158] sm:$0xff]  }
 0x3e0   :  { %4998 = vmatpush3.bf16.msra.mxu1 %v1801_v48 }
 0x3e1   :  { %5003 = vmatprep.subr.bf16.mxu1 %v5951_v7 }
 0x3e3   :  { %5000 = vmatmul.mubr.msk.bf16.vlgmr.msra.gmra.mrb[24].mxu1 %vm925_vm3, %v1802_v49  ;;  %v7157_v49 = vld [vmem:[%s7914_s8 + $0x160] sm:$0xff]  }
 0x3e4   :  { %5004 = vmatpush3.bf16.msra.mxu1 %v1801_v48  ;;  %5005 = vmatprep.mubr.msk.bf16.mxu1 %vm5952_vm4, %v5951_v7 }
 0x3e5   :  { %5009 = vmatprep.subr.bf16.mxu1 %v5951_v7 }
 0x3eb   :  { %5006 = vmatmul.mubr.msk.bf16.vlgmr.msra.gmra.mrb[28].mxu1 %vm925_vm3, %v4441_v50  ;;  %v7166_v50 = vld [vmem:[%s7914_s8 + $0x128] sm:$0xff]  }
 0x3ec   :  { %5010 = vmatpush3.bf16.msra.mxu1 %v1801_v48  ;;  %5011 = vmatprep.mubr.msk.bf16.mxu1 %vm5952_vm4, %v5951_v7 }
 0x3ed   :  { %5015 = vmatprep.subr.bf16.mxu1 %v5951_v7 }
 0x3f3   :  { %5012 = vmatmul.mubr.msk.bf16.vlgmr.msra.gmra.mrb[32].mxu1 %vm925_vm3, %v4443_v51  ;;  %v7171_v51 = vld [vmem:[%s7914_s8 + $0x168] sm:$0xff]  }
 0x3f4   :  { %5016 = vmatpush3.bf16.msra.mxu1 %v1801_v48  ;;  %5017 = vmatprep.mubr.msk.bf16.mxu1 %vm5952_vm4, %v5951_v7  ;;  %v7152_v48 = vld [vmem:[%s7914_s8 + $0x120] sm:$0xff]  }
 0x3f5   :  { %5021 = vmatprep.subr.bf16.mxu1 %v5951_v7 }
 0x3fb   :  { %5018 = vmatmul.mubr.msk.bf16.vlgmr.msra.gmra.mrb[36].mxu1 %vm925_vm3, %v4445_v52  ;;  %v7180_v52 = vld [vmem:[%s7914_s8 + $0x130] sm:$0xff]  }
 0x3fc   :  { %5022 = vmatpush3.bf16.msra.mxu1 %v6893_v53  ;;  %5037 = vmatprep.mubr.msk.bf16.mxu1 %vm5952_vm4, %v5951_v7 }
 0x3fd   :  { %5023 = vmatprep.subr.bf16.mxu1 %v5951_v7 }
 0x400   :  { %5024 = vmatpush3.bf16.msra.mxu1 %v6900_v54 }
 0x401   :  { %5025 = vmatprep.subr.bf16.mxu1 %v5951_v7 }
 0x404   :  { %5026 = vmatpush3.bf16.msra.mxu1 %v6909_v55 }
 0x405   :  { %5027 = vmatprep.subr.bf16.mxu1 %v5951_v7 }
 0x408   :  { %5028 = vmatpush3.bf16.msra.mxu1 %v6916_v56 }
 0x409   :  { %5029 = vmatprep.subr.bf16.mxu1 %v5951_v7 }
 0x40c   :  { %5030 = vmatpush3.bf16.msra.mxu1 %v6923_v57 }
 0x40d   :  { %5031 = vmatprep.subr.bf16.mxu1 %v5951_v7 }
 0x410   :  { %5032 = vmatpush3.bf16.msra.mxu1 %v6930_v58 }
 0x411   :  { %5033 = vmatprep.subr.bf16.mxu1 %v5951_v7 }
 0x414   :  { %5034 = vmatpush3.bf16.msra.mxu1 %v6938_v59 }
 0x415   :  { %5035 = vmatprep.subr.bf16.mxu1 %v5951_v7 }
 0x418   :  { %5036 = vmatpush3.bf16.msra.mxu1 %v6950_v62 }
 0x419   :  { %5041 = vmatprep.subr.bf16.mxu1 %v5951_v7 }
 0x4b6   :  { %v6963_v19 = vpop.f32.mrb[24].mxu1 }
 0x4b7   :  { %v5001_v20 = vpop.f32.mrb[25].mxu1  ;;  %v1846_v41 = vpack.c.bf16 %v6963_v19, %v6963_v19  ;;  %v7185_v19 = vld [vmem:[%s7914_s8 + $0x170] sm:$0xff]  }
 0x4b8   :  { %v1843_v21 = vpop.f32.mrb[26].mxu1  ;;  %v7194_v20 = vld [vmem:[%s7914_s8 + $0x138] sm:$0xff]  }
 0x4b9   :  { %v5002_v22 = vpop.f32.mrb[27].mxu1  ;;  %v7199_v21 = vld [vmem:[%s7914_s8 + $0x178] sm:$0xff]  }
 0x4be   :  { %v1886_v23 = vpop.f32.mrb[28].mxu1 }
 0x4bf   :  { %v6975_v26 = vpack.c.bf16 %v1886_v23, %v1886_v23  ;;  %v5007_v27 = vpop.f32.mrb[29].mxu1 }
 0x4c0   :  { %v1889_v29 = vpop.f32.mrb[30].mxu1 }
 0x4c1   :  { %v5008_v35 = vpop.f32.mrb[31].mxu1  ;;  %5038 = vmatmul.mubr.bf16.vlgmr.msra.gmra.mrb[40].mxu1 %v6975_v26  ;;  %5098 = vmatmul.mubr.bf16.vlgmr.msra.gmra.mrb[16].mxu0 %v6975_v26  ;;  %v4575_v29 = vld [vmem:[%s7918_s9] ss:$0 sm:$0xff] }
 0x4c2   :  { %5042 = vmatpush3.bf16.msra.mxu1 %v6968_v24  ;;  %5102 = vmatpush3.bf16.msra.mxu0 %v6973_v25 }
 0x4c3   :  { %5043 = vmatprep.subr.bf16.mxu1 %v5951_v7  ;;  %5103 = vmatprep.subr.bf16.mxu0 %v5951_v7 }
 0x4c4   :  { %5057 = vmatprep.mubr.msk.bf16.mxu1 %vm5952_vm4, %v5951_v7  ;;  %5117 = vmatprep.mubr.msk.bf16.mxu0 %vm5952_vm4, %v5951_v7 }
 0x4c6   :  { %5044 = vmatpush3.bf16.msra.mxu1 %v6984_v36  ;;  %5104 = vmatpush3.bf16.msra.mxu0 %v6989_v37  ;;  %v7009_v6 = vpop.f32.mrb[32].mxu1 }
 0x4c7   :  { %5045 = vmatprep.subr.bf16.mxu1 %v5951_v7  ;;  %5105 = vmatprep.subr.bf16.mxu0 %v5951_v7  ;;  %v5013_v8 = vpop.f32.mrb[33].mxu1  ;;  %v1938_v22 = vpack.c.bf16 %v7009_v6, %v7009_v6 }
 0x4c8   :  { %v1935_v9 = vpop.f32.mrb[34].mxu1 }
 0x4c9   :  { %v5014_v10 = vpop.f32.mrb[35].mxu1 }
 0x4ca   :  { %5046 = vmatpush3.bf16.msra.mxu1 %v7002_v39  ;;  %5106 = vmatpush3.bf16.msra.mxu0 %v7007_v61 }
 0x4cb   :  { %5047 = vmatprep.subr.bf16.mxu1 %v5951_v7  ;;  %5107 = vmatprep.subr.bf16.mxu0 %v5951_v7 }
 0x4ce   :  { %5048 = vmatpush3.bf16.msra.mxu1 %v7018_v11  ;;  %5108 = vmatpush3.bf16.msra.mxu0 %v7023_v12  ;;  %v7081_v31 = vpop.f32.mrb[36].mxu1 }
 0x4cf   :  { %5049 = vmatprep.subr.bf16.mxu1 %v5951_v7  ;;  %5109 = vmatprep.subr.bf16.mxu0 %v5951_v7  ;;  %v5019_v32 = vpop.f32.mrb[37].mxu1 }
 0x4d0   :  { %v1981_v33 = vpop.f32.mrb[38].mxu1  ;;  %v7449_v32 = vld [vmem:[%s7917_s11 + $0xf0] sm:$0xff]  }
 0x4d1   :  { %v5020_v34 = vpop.f32.mrb[39].mxu1  ;;  %v7456_v33 = vld [vmem:[%s7917_s11 + $0xb8] sm:$0xff]  }
 0x4d2   :  { %5050 = vmatpush3.bf16.msra.mxu1 %v7032_v0  ;;  %5110 = vmatpush3.bf16.msra.mxu0 %v7037_v1  ;;  %v7461_v34 = vld [vmem:[%s7917_s11 + $0xf8] sm:$0xff]  }
 0x4d3   :  { %5051 = vmatprep.subr.bf16.mxu1 %v5951_v7  ;;  %5111 = vmatprep.subr.bf16.mxu0 %v5951_v7 }
 0x4d6   :  { %5052 = vmatpush3.bf16.msra.mxu1 %v7046_v2  ;;  %5112 = vmatpush3.bf16.msra.mxu0 %v7051_v3 }
 0x4d7   :  { %5053 = vmatprep.subr.bf16.mxu1 %v5951_v7  ;;  %5113 = vmatprep.subr.bf16.mxu0 %v5951_v7 }
 0x4da   :  { %5054 = vmatpush3.bf16.msra.mxu1 %v7060_v17  ;;  %5114 = vmatpush3.bf16.msra.mxu0 %v7065_v18 }
 0x4db   :  { %5055 = vmatprep.subr.bf16.mxu1 %v5951_v7  ;;  %5115 = vmatprep.subr.bf16.mxu0 %v5951_v7 }
 0x4de   :  { %5056 = vmatpush3.bf16.msra.mxu1 %v7074_v28  ;;  %5116 = vmatpush3.bf16.msra.mxu0 %v7079_v30 }
 0x4df   :  { %5061 = vmatprep.subr.bf16.mxu1 %v5951_v7  ;;  %5121 = vmatprep.subr.bf16.mxu0 %v5951_v7 }
 0x4e1   :  { %5058 = vmatmul.mubr.bf16.vlgmr.msra.gmra.mrb[40].mxu1 %v1846_v41  ;;  %5118 = vmatmul.mubr.bf16.vlgmr.msra.gmra.mrb[16].mxu0 %v1846_v41 }
 0x4e2   :  { %5062 = vmatpush3.bf16.msra.mxu1 %v7090_v38  ;;  %5122 = vmatpush3.bf16.msra.mxu0 %v7095_v40 }
 0x4e3   :  { %5063 = vmatprep.subr.bf16.mxu1 %v5951_v7  ;;  %5123 = vmatprep.subr.bf16.mxu0 %v5951_v7 }
 0x4e4   :  { %5077 = vmatprep.mubr.msk.bf16.mxu1 %vm5952_vm4, %v5951_v7  ;;  %5137 = vmatprep.mubr.msk.bf16.mxu0 %vm5952_vm4, %v5951_v7 }
 0x4e6   :  { %5064 = vmatpush3.bf16.msra.mxu1 %v7106_v42  ;;  %5124 = vmatpush3.bf16.msra.mxu0 %v7111_v43 }
 0x4e7   :  { %5065 = vmatprep.subr.bf16.mxu1 %v5951_v7  ;;  %5125 = vmatprep.subr.bf16.mxu0 %v5951_v7 }
 0x4ea   :  { %5066 = vmatpush3.bf16.msra.mxu1 %v7124_v44  ;;  %5126 = vmatpush3.bf16.msra.mxu0 %v7129_v45 }
 0x4eb   :  { %5067 = vmatprep.subr.bf16.mxu1 %v5951_v7  ;;  %5127 = vmatprep.subr.bf16.mxu0 %v5951_v7 }
 0x4ee   :  { %5068 = vmatpush3.bf16.msra.mxu1 %v7138_v46  ;;  %5128 = vmatpush3.bf16.msra.mxu0 %v7143_v47 }
 0x4ef   :  { %5069 = vmatprep.subr.bf16.mxu1 %v5951_v7  ;;  %5129 = vmatprep.subr.bf16.mxu0 %v5951_v7 }
 0x4f2   :  { %5070 = vmatpush3.bf16.msra.mxu1 %v7152_v48  ;;  %5130 = vmatpush3.bf16.msra.mxu0 %v7157_v49 }
 0x4f3   :  { %5071 = vmatprep.subr.bf16.mxu1 %v5951_v7  ;;  %5131 = vmatprep.subr.bf16.mxu0 %v5951_v7 }
 0x4f6   :  { %5072 = vmatpush3.bf16.msra.mxu1 %v7166_v50  ;;  %5132 = vmatpush3.bf16.msra.mxu0 %v7171_v51 }
 0x4f7   :  { %5073 = vmatprep.subr.bf16.mxu1 %v5951_v7  ;;  %5133 = vmatprep.subr.bf16.mxu0 %v5951_v7 }
 0x4fa   :  { %5074 = vmatpush3.bf16.msra.mxu1 %v7180_v52  ;;  %5134 = vmatpush3.bf16.msra.mxu0 %v7185_v19 }
 0x4fb   :  { %5075 = vmatprep.subr.bf16.mxu1 %v5951_v7  ;;  %5135 = vmatprep.subr.bf16.mxu0 %v5951_v7 }
 0x4fe   :  { %5076 = vmatpush3.bf16.msra.mxu1 %v7194_v20  ;;  %5136 = vmatpush3.bf16.msra.mxu0 %v7199_v21 }
 0x4ff   :  { %5141 = vmatprep.subr.bf16.mxu1 %v5951_v7  ;;  %5201 = vmatprep.subr.bf16.mxu0 %v5951_v7 }
 0x501   :  { %5078 = vmatmul.mubr.bf16.vlgmr.msra.gmra.mrb[40].mxu1 %v1938_v22  ;;  %5138 = vmatmul.mubr.bf16.vlgmr.msra.gmra.mrb[16].mxu0 %v1938_v22 }
 0x502   :  { %5142 = vmatpush3.bf16.msra.mxu1 %v6893_v53  ;;  %5202 = vmatpush3.bf16.msra.mxu0 %v6823_v4  ;;  %v1984_v4 = vpack.c.bf16 %v7081_v31, %v7081_v31  ;;  %v7444_v31 = vld [vmem:[%s7917_s11 + $0xb0] sm:$0xff]  }
 0x503   :  { %5143 = vmatprep.subr.bf16.mxu1 %v5951_v7  ;;  %5203 = vmatprep.subr.bf16.mxu0 %v5951_v7 }
 0x504   :  { %5157 = vmatprep.mubr.msk.bf16.mxu1 %vm5952_vm4, %v5951_v7  ;;  %5217 = vmatprep.mubr.msk.bf16.mxu0 %vm5952_vm4, %v5951_v7 }
 0x506   :  { %5144 = vmatpush3.bf16.msra.mxu1 %v6900_v54  ;;  %5204 = vmatpush3.bf16.msra.mxu0 %v6830_v5 }
 0x507   :  { %5145 = vmatprep.subr.bf16.mxu1 %v5951_v7  ;;  %5205 = vmatprep.subr.bf16.mxu0 %v5951_v7 }
 0x50a   :  { %5146 = vmatpush3.bf16.msra.mxu1 %v6909_v55  ;;  %5206 = vmatpush3.bf16.msra.mxu0 %v6837_v13 }
 0x50b   :  { %5147 = vmatprep.subr.bf16.mxu1 %v5951_v7  ;;  %5207 = vmatprep.subr.bf16.mxu0 %v5951_v7 }
 0x50e   :  { %5148 = vmatpush3.bf16.msra.mxu1 %v6916_v56  ;;  %5208 = vmatpush3.bf16.msra.mxu0 %v6844_v14 }
 0x50f   :  { %5149 = vmatprep.subr.bf16.mxu1 %v5951_v7  ;;  %5209 = vmatprep.subr.bf16.mxu0 %v5951_v7 }
 0x512   :  { %5150 = vmatpush3.bf16.msra.mxu1 %v6923_v57  ;;  %5210 = vmatpush3.bf16.msra.mxu0 %v6851_v15  ;;  %v7328_v57 = vld [vmem:[%s7917_s11 + $0xc0] sm:$0xff]  }
 0x513   :  { %5151 = vmatprep.subr.bf16.mxu1 %v5951_v7  ;;  %5211 = vmatprep.subr.bf16.mxu0 %v5951_v7 }
 0x516   :  { %5152 = vmatpush3.bf16.msra.mxu1 %v6930_v58  ;;  %5212 = vmatpush3.bf16.msra.mxu0 %v6858_v16  ;;  %v7335_v58 = vld [vmem:[%s7917_s11 + $0xc8] sm:$0xff]  }
 0x517   :  { %5153 = vmatprep.subr.bf16.mxu1 %v5951_v7  ;;  %5213 = vmatprep.subr.bf16.mxu0 %v5951_v7 }
 0x51a   :  { %5154 = vmatpush3.bf16.msra.mxu1 %v6938_v59  ;;  %5214 = vmatpush3.bf16.msra.mxu0 %v6943_v60  ;;  %v7342_v59 = vld [vmem:[%s7917_s11 + $0xd0] sm:$0xff]   ;;  %v7349_v60 = vld [vmem:[%s7917_s11 + $0xd8] sm:$0xff]  }
 0x51b   :  { %5155 = vmatprep.subr.bf16.mxu1 %v5951_v7  ;;  %5215 = vmatprep.subr.bf16.mxu0 %v5951_v7 }
 0x51e   :  { %5156 = vmatpush3.bf16.msra.mxu1 %v6950_v62  ;;  %5216 = vmatpush3.bf16.msra.mxu0 %v6955_v63  ;;  %v7356_v62 = vld [vmem:[%s7917_s11 + $0xe0] sm:$0xff]   ;;  %v7363_v63 = vld [vmem:[%s7917_s11 + $0xe8] sm:$0xff]  }
 0x51f   :  { %5161 = vmatprep.subr.bf16.mxu1 %v5951_v7  ;;  %5221 = vmatprep.subr.bf16.mxu0 %v5951_v7 }
 0x521   :  { %5158 = vmatmul.mubr.bf16.vlgmr.msra.gmra.mrb[44].mxu1 %v1938_v22  ;;  %5218 = vmatmul.mubr.bf16.vlgmr.msra.gmra.mrb[20].mxu0 %v1938_v22 }
 0x522   :  { %5162 = vmatpush3.bf16.msra.mxu1 %v6968_v24  ;;  %5222 = vmatpush3.bf16.msra.mxu0 %v6973_v25 }
 0x523   :  { %5163 = vmatprep.subr.bf16.mxu1 %v5951_v7  ;;  %5223 = vmatprep.subr.bf16.mxu0 %v5951_v7 }
 0x524   :  { %5177 = vmatprep.mubr.msk.bf16.mxu1 %vm5952_vm4, %v5951_v7  ;;  %5237 = vmatprep.mubr.msk.bf16.mxu0 %vm5952_vm4, %v5951_v7 }
 0x526   :  { %5164 = vmatpush3.bf16.msra.mxu1 %v6984_v36  ;;  %5224 = vmatpush3.bf16.msra.mxu0 %v6989_v37 }
 0x527   :  { %5165 = vmatprep.subr.bf16.mxu1 %v5951_v7  ;;  %5225 = vmatprep.subr.bf16.mxu0 %v5951_v7 }
 0x52a   :  { %5166 = vmatpush3.bf16.msra.mxu1 %v7002_v39  ;;  %5226 = vmatpush3.bf16.msra.mxu0 %v7007_v61 }
 0x52b   :  { %5167 = vmatprep.subr.bf16.mxu1 %v5951_v7  ;;  %5227 = vmatprep.subr.bf16.mxu0 %v5951_v7 }
 0x52e   :  { %5168 = vmatpush3.bf16.msra.mxu1 %v7018_v11  ;;  %5228 = vmatpush3.bf16.msra.mxu0 %v7023_v12  ;;  %v2871_v11 = vld [vmem:[%s7919_s10] sm:$0x3]  ;;  %v4577_v12 = vld [vmem:[%s7919_s10 + $0x2] sm:$0x3] }
 0x52f   :  { %5169 = vmatprep.subr.bf16.mxu1 %v5951_v7  ;;  %5229 = vmatprep.subr.bf16.mxu0 %v5951_v7 }
 0x532   :  { %5170 = vmatpush3.bf16.msra.mxu1 %v7032_v0  ;;  %5230 = vmatpush3.bf16.msra.mxu0 %v7037_v1  ;;  %v4579_v0 = vld [vmem:[%s7919_s10 + $0x4] sm:$0x3]  ;;  %v4581_v1 = vld [vmem:[%s7919_s10 + $0x6] sm:$0x3] }
 0x533   :  { %5171 = vmatprep.subr.bf16.mxu1 %v5951_v7  ;;  %5231 = vmatprep.subr.bf16.mxu0 %v5951_v7 }
 0x536   :  { %5172 = vmatpush3.bf16.msra.mxu1 %v7046_v2  ;;  %5232 = vmatpush3.bf16.msra.mxu0 %v7051_v3  ;;  %v7399_v2 = vld [vmem:[%s7917_s11 + $0x80] sm:$0xff]   ;;  %v7406_v3 = vld [vmem:[%s7917_s11 + $0x88] sm:$0xff]  }
 0x537   :  { %5173 = vmatprep.subr.bf16.mxu1 %v5951_v7  ;;  %5233 = vmatprep.subr.bf16.mxu0 %v5951_v7 }
 0x53a   :  { %5174 = vmatpush3.bf16.msra.mxu1 %v7060_v17  ;;  %5234 = vmatpush3.bf16.msra.mxu0 %v7065_v18  ;;  %v7415_v17 = vld [vmem:[%s7917_s11 + $0x90] sm:$0xff]   ;;  %v7422_v18 = vld [vmem:[%s7917_s11 + $0x98] sm:$0xff]  }
 0x53b   :  { %5175 = vmatprep.subr.bf16.mxu1 %v5951_v7  ;;  %5235 = vmatprep.subr.bf16.mxu0 %v5951_v7 }
 0x53e   :  { %5176 = vmatpush3.bf16.msra.mxu1 %v7074_v28  ;;  %5236 = vmatpush3.bf16.msra.mxu0 %v7079_v30  ;;  %v7429_v28 = vld [vmem:[%s7917_s11 + $0xa0] sm:$0xff]   ;;  %v7436_v30 = vld [vmem:[%s7917_s11 + $0xa8] sm:$0xff]  }
 0x53f   :  { %5181 = vmatprep.subr.bf16.mxu1 %v5951_v7  ;;  %5241 = vmatprep.subr.bf16.mxu0 %v5951_v7 }
 0x541   :  { %5178 = vmatmul.mubr.bf16.vlgmr.msra.gmra.mrb[44].mxu1 %v6975_v26  ;;  %5238 = vmatmul.mubr.bf16.vlgmr.msra.gmra.mrb[20].mxu0 %v6975_v26 }
 0x542   :  { %5182 = vmatpush3.bf16.msra.mxu1 %v7090_v38  ;;  %5242 = vmatpush3.bf16.msra.mxu0 %v7095_v40 }
 0x543   :  { %5183 = vmatprep.subr.bf16.mxu1 %v5951_v7  ;;  %5243 = vmatprep.subr.bf16.mxu0 %v5951_v7 }
 0x544   :  { %5197 = vmatprep.mubr.msk.bf16.mxu1 %vm5952_vm4, %v5951_v7  ;;  %5257 = vmatprep.mubr.msk.bf16.mxu0 %vm5952_vm4, %v5951_v7 }
 0x546   :  { %5184 = vmatpush3.bf16.msra.mxu1 %v7106_v42  ;;  %5244 = vmatpush3.bf16.msra.mxu0 %v7111_v43 }
 0x547   :  { %5185 = vmatprep.subr.bf16.mxu1 %v5951_v7  ;;  %5245 = vmatprep.subr.bf16.mxu0 %v5951_v7 }
 0x54a   :  { %5186 = vmatpush3.bf16.msra.mxu1 %v7124_v44  ;;  %5246 = vmatpush3.bf16.msra.mxu0 %v7129_v45  ;;  %v7474_v44 = vld [vmem:[%s7917_s11] sm:$0xff]  }
 0x54b   :  { %5187 = vmatprep.subr.bf16.mxu1 %v5951_v7  ;;  %5247 = vmatprep.subr.bf16.mxu0 %v5951_v7  ;;  %v7479_v45 = vld [vmem:[%s7917_s11 + $0x40] sm:$0xff]  }
 0x54e   :  { %5188 = vmatpush3.bf16.msra.mxu1 %v7138_v46  ;;  %5248 = vmatpush3.bf16.msra.mxu0 %v7143_v47 }
 0x54f   :  { %5189 = vmatprep.subr.bf16.mxu1 %v5951_v7  ;;  %5249 = vmatprep.subr.bf16.mxu0 %v5951_v7 }
 0x552   :  { %5190 = vmatpush3.bf16.msra.mxu1 %v7152_v48  ;;  %5250 = vmatpush3.bf16.msra.mxu0 %v7157_v49 }
 0x553   :  { %5191 = vmatprep.subr.bf16.mxu1 %v5951_v7  ;;  %5251 = vmatprep.subr.bf16.mxu0 %v5951_v7 }
 0x556   :  { %5192 = vmatpush3.bf16.msra.mxu1 %v7166_v50  ;;  %5252 = vmatpush3.bf16.msra.mxu0 %v7171_v51  ;;  %v7490_v50 = vld [vmem:[%s7917_s11 + $0x8] sm:$0xff]  }
 0x557   :  { %5193 = vmatprep.subr.bf16.mxu1 %v5951_v7  ;;  %5253 = vmatprep.subr.bf16.mxu0 %v5951_v7  ;;  %v7495_v51 = vld [vmem:[%s7917_s11 + $0x48] sm:$0xff]  }
 0x55a   :  { %5194 = vmatpush3.bf16.msra.mxu1 %v7180_v52  ;;  %5254 = vmatpush3.bf16.msra.mxu0 %v7185_v19  ;;  %v7508_v52 = vld [vmem:[%s7917_s11 + $0x10] sm:$0xff]  }
 0x55b   :  { %5195 = vmatprep.subr.bf16.mxu1 %v5951_v7  ;;  %5255 = vmatprep.subr.bf16.mxu0 %v5951_v7  ;;  %v7513_v19 = vld [vmem:[%s7917_s11 + $0x50] sm:$0xff]  }
 0x55e   :  { %5196 = vmatpush3.bf16.msra.mxu1 %v7194_v20  ;;  %5256 = vmatpush3.bf16.msra.mxu0 %v7199_v21 }
 0x55f   :  { %5261 = vmatprep.subr.bf16.mxu1 %v5951_v7  ;;  %5345 = vmatprep.subr.bf16.mxu0 %v5951_v7 }
 0x561   :  { %5198 = vmatmul.mubr.bf16.vlgmr.msra.gmra.mrb[44].mxu1 %v1984_v4  ;;  %5258 = vmatmul.mubr.bf16.vlgmr.msra.gmra.mrb[20].mxu0 %v1984_v4 }
 0x562   :  { %5263 = vmatprep.mubr.msk.bf16.mxu1 %vm5952_vm4, %v5951_v7  ;;  %5361 = vmatprep.mubr.msk.bf16.mxu0 %vm5952_vm4, %v5951_v7 }
 0x563   :  { %5346 = vmatpush3.bf16.msra.mxu0 %v7328_v57 }
 0x564   :  { %5347 = vmatprep.subr.bf16.mxu0 %v5951_v7 }
 0x567   :  { %5348 = vmatpush3.bf16.msra.mxu0 %v7335_v58 }
 0x568   :  { %5349 = vmatprep.subr.bf16.mxu0 %v5951_v7 }
 0x56b   :  { %5350 = vmatpush3.bf16.msra.mxu0 %v7342_v59 }
 0x56c   :  { %5351 = vmatprep.subr.bf16.mxu0 %v5951_v7 }
 0x56f   :  { %5352 = vmatpush3.bf16.msra.mxu0 %v7349_v60 }
 0x570   :  { %5353 = vmatprep.subr.bf16.mxu0 %v5951_v7 }
 0x573   :  { %5354 = vmatpush3.bf16.msra.mxu0 %v7356_v62 }
 0x574   :  { %5355 = vmatprep.subr.bf16.mxu0 %v5951_v7 }
 0x577   :  { %5356 = vmatpush3.bf16.msra.mxu0 %v7363_v63 }
 0x578   :  { %5357 = vmatprep.subr.bf16.mxu0 %v5951_v7 }
 0x57b   :  { %5358 = vmatpush3.bf16.msra.mxu0 %v7449_v32 }
 0x57c   :  { %5359 = vmatprep.subr.bf16.mxu0 %v5951_v7 }
 0x57f   :  { %5360 = vmatpush3.bf16.msra.mxu0 %v7461_v34 }
 0x580   :  { %5365 = vmatprep.subr.bf16.mxu0 %v5951_v7 }
 0x5d4   :  { %v2293_v5 = vpop.f32.mrb[40].mxu1  ;;  %v2609_v13 = vpop.f32.mrb[16].mxu0 }
 0x5d5   :  { %v2616_v14 = vmax.f32 %v2293_v5, %v2609_v13  ;;  %v5079_v15 = vpop.f32.mrb[41].mxu1  ;;  %v5139_v16 = vpop.f32.mrb[17].mxu0  ;;  %v7524_v5 = vld [vmem:[%s7917_s11 + $0x18] sm:$0xff]  }
 0x5d6   :  { %v2296_v53 = vpop.f32.mrb[42].mxu1  ;;  %v2612_v54 = vpop.f32.mrb[18].mxu0  ;;  %v7529_v13 = vld [vmem:[%s7917_s11 + $0x58] sm:$0xff]   ;;  %v7543_v15 = vld [vmem:[%s7917_s11 + $0x60] sm:$0xff]   ;;  %v7552_v16 = vld [vmem:[%s7917_s11 + $0x28] sm:$0xff]  }
 0x5d7   :  { %v5080_v55 = vpop.f32.mrb[43].mxu1  ;;  %v5140_v56 = vpop.f32.mrb[19].mxu0  ;;  %v7557_v53 = vld [vmem:[%s7917_s11 + $0x68] sm:$0xff]   ;;  %v7566_v54 = vld [vmem:[%s7917_s11 + $0x30] sm:$0xff]  }
 0x5d8   :  { %v7571_v55 = vld [vmem:[%s7917_s11 + $0x70] sm:$0xff]   ;;  %v7580_v56 = vld [vmem:[%s7917_s11 + $0x38] sm:$0xff]  }
 0x634   :  { %v2731_v23 = vpop.f32.mrb[44].mxu1  ;;  %v2853_v24 = vpop.f32.mrb[20].mxu0 }
 0x635   :  { %v2738_v25 = vmax.f32 %v2616_v14, %v2731_v23  ;;  %v5199_v26 = vpop.f32.mrb[45].mxu1  ;;  %v5259_v27 = vpop.f32.mrb[21].mxu0  ;;  %v7538_v14 = vld [vmem:[%s7917_s11 + $0x20] sm:$0xff]   ;;  %v7585_v23 = vld [vmem:[%s7917_s11 + $0x78] sm:$0xff]  }
 0x636   :  { %v2734_v35 = vpop.f32.mrb[46].mxu1  ;;  %v2856_v36 = vpop.f32.mrb[22].mxu0  ;;  %v7596_v27 = vld [vmem:[%s7917_s11 + $0x100] sm:$0xff]  }
 0x637   :  { %v2860_v37 = vmax.f32 %v2738_v25, %v2853_v24  ;;  %v5200_v39 = vpop.f32.mrb[47].mxu1  ;;  %v5260_v61 = vpop.f32.mrb[23].mxu0 }
 0x638   :  { %v7617_v39 = vld [vmem:[%s7917_s11 + $0x148] sm:$0xff]   ;;  %v7630_v61 = vld [vmem:[%s7917_s11 + $0x110] sm:$0xff]  }
 0x639   :  { %v2868_v6 = vadd.f32 %v4575_v29, %v2860_v37  ;;  %v7601_v29 = vld [vmem:[%s7917_s11 + $0x140] sm:$0xff]   ;;  %v7612_v37 = vld [vmem:[%s7917_s11 + $0x108] sm:$0xff]  }
 0x63b   :  { %v2869_v8 = vmax.f32 %v2868_v6, 0.0  ;;  %v7635_v6 = vld [vmem:[%s7917_s11 + $0x150] sm:$0xff]  }
 0x63d   :  { %v2870_v9 = vpack.c.bf16 %v2869_v8, %v2869_v8  ;;  %v7644_v8 = vld [vmem:[%s7917_s11 + $0x118] sm:$0xff]  }
 0x63f   :  { %v2877_v10 = vsel %vm614_vm1, %v2870_v9, 0  ;;  %v7649_v9 = vld [vmem:[%s7917_s11 + $0x158] sm:$0xff]  }
 0x640   :  { %5262 = vmatpush3.bf16.msra.mxu1 %v2877_v10 }
 0x641   :  { %5267 = vmatprep.subr.bf16.mxu1 %v5951_v7 }
 0x643   :  { %5264 = vmatmul.mubr.msk.bf16.vlgmr.msra.gmra.mrb[48].mxu1 %vm2872_vm5, %v2871_v11  ;;  %v7663_v11 = vld [vmem:[%s7917_s11 + $0x160] sm:$0xff]  }
 0x644   :  { %5268 = vmatpush3.bf16.msra.mxu1 %v2877_v10  ;;  %5269 = vmatprep.mubr.msk.bf16.mxu1 %vm5952_vm4, %v5951_v7 }
 0x645   :  { %5273 = vmatprep.subr.bf16.mxu1 %v5951_v7 }
 0x64b   :  { %5270 = vmatmul.mubr.msk.bf16.vlgmr.msra.gmra.mrb[52].mxu1 %vm2872_vm5, %v4577_v12  ;;  %v7672_v12 = vld [vmem:[%s7917_s11 + $0x128] sm:$0xff]  }
 0x64c   :  { %5274 = vmatpush3.bf16.msra.mxu1 %v2877_v10  ;;  %5275 = vmatprep.mubr.msk.bf16.mxu1 %vm5952_vm4, %v5951_v7 }
 0x64d   :  { %5279 = vmatprep.subr.bf16.mxu1 %v5951_v7 }
 0x653   :  { %5276 = vmatmul.mubr.msk.bf16.vlgmr.msra.gmra.mrb[56].mxu1 %vm2872_vm5, %v4579_v0  ;;  %v7677_v0 = vld [vmem:[%s7917_s11 + $0x168] sm:$0xff]  }
 0x654   :  { %5280 = vmatpush3.bf16.msra.mxu1 %v2877_v10  ;;  %5281 = vmatprep.mubr.msk.bf16.mxu1 %vm5952_vm4, %v5951_v7  ;;  %v7658_v10 = vld [vmem:[%s7917_s11 + $0x120] sm:$0xff]  }
 0x655   :  { %5285 = vmatprep.subr.bf16.mxu1 %v5951_v7 }
 0x65b   :  { %5282 = vmatmul.mubr.msk.bf16.vlgmr.msra.gmra.mrb[60].mxu1 %vm2872_vm5, %v4581_v1  ;;  %v7686_v1 = vld [vmem:[%s7917_s11 + $0x130] sm:$0xff]  }
 0x65c   :  { %5286 = vmatpush3.bf16.msra.mxu1 %v7399_v2  ;;  %5301 = vmatprep.mubr.msk.bf16.mxu1 %vm5952_vm4, %v5951_v7 }
 0x65d   :  { %5287 = vmatprep.subr.bf16.mxu1 %v5951_v7 }
 0x660   :  { %5288 = vmatpush3.bf16.msra.mxu1 %v7406_v3 }
 0x661   :  { %5289 = vmatprep.subr.bf16.mxu1 %v5951_v7 }
 0x664   :  { %5290 = vmatpush3.bf16.msra.mxu1 %v7415_v17 }
 0x665   :  { %5291 = vmatprep.subr.bf16.mxu1 %v5951_v7 }
 0x668   :  { %5292 = vmatpush3.bf16.msra.mxu1 %v7422_v18 }
 0x669   :  { %5293 = vmatprep.subr.bf16.mxu1 %v5951_v7 }
 0x66c   :  { %5294 = vmatpush3.bf16.msra.mxu1 %v7429_v28 }
 0x66d   :  { %5295 = vmatprep.subr.bf16.mxu1 %v5951_v7 }
 0x670   :  { %5296 = vmatpush3.bf16.msra.mxu1 %v7436_v30 }
 0x671   :  { %5297 = vmatprep.subr.bf16.mxu1 %v5951_v7 }
 0x674   :  { %5298 = vmatpush3.bf16.msra.mxu1 %v7444_v31 }
 0x675   :  { %5299 = vmatprep.subr.bf16.mxu1 %v5951_v7 }
 0x678   :  { %5300 = vmatpush3.bf16.msra.mxu1 %v7456_v33 }
 0x679   :  { %5305 = vmatprep.subr.bf16.mxu1 %v5951_v7 }
 0x716   :  { %v7469_v38 = vpop.f32.mrb[48].mxu1 }
 0x717   :  { %v5265_v40 = vpop.f32.mrb[49].mxu1  ;;  %v2919_v36 = vpack.c.bf16 %v7469_v38, %v7469_v38  ;;  %v7691_v38 = vld [vmem:[%s7917_s11 + $0x170] sm:$0xff]  }
 0x718   :  { %v2916_v41 = vpop.f32.mrb[50].mxu1  ;;  %v7700_v40 = vld [vmem:[%s7917_s11 + $0x138] sm:$0xff]  }
 0x719   :  { %v5266_v42 = vpop.f32.mrb[51].mxu1  ;;  %v7705_v41 = vld [vmem:[%s7917_s11 + $0x178] sm:$0xff]  }
 0x71e   :  { %v2959_v43 = vpop.f32.mrb[52].mxu1 }
 0x71f   :  { %v7481_v46 = vpack.c.bf16 %v2959_v43, %v2959_v43  ;;  %v5271_v47 = vpop.f32.mrb[53].mxu1  ;;  %v5947_v43 = vld [vmem:[%s7920_s13 + $0x78] sm:$0xff]  }
 0x720   :  { %v2962_v48 = vpop.f32.mrb[54].mxu1 }
 0x721   :  { %5302 = vmatmul.mubr.bf16.vlgmr.msra.gmra.mrb[64].mxu1 %v7481_v46  ;;  %5362 = vmatmul.mubr.bf16.vlgmr.msra.gmra.mrb[24].mxu0 %v7481_v46  ;;  %v5272_v49 = vpop.f32.mrb[55].mxu1 }
 0x722   :  { %5306 = vmatpush3.bf16.msra.mxu1 %v7474_v44  ;;  %5366 = vmatpush3.bf16.msra.mxu0 %v7479_v45 }
 0x723   :  { %5307 = vmatprep.subr.bf16.mxu1 %v5951_v7  ;;  %5367 = vmatprep.subr.bf16.mxu0 %v5951_v7 }
 0x724   :  { %5321 = vmatprep.mubr.msk.bf16.mxu1 %vm5952_vm4, %v5951_v7  ;;  %5381 = vmatprep.mubr.msk.bf16.mxu0 %vm5952_vm4, %v5951_v7 }
 0x726   :  { %5308 = vmatpush3.bf16.msra.mxu1 %v7490_v50  ;;  %5368 = vmatpush3.bf16.msra.mxu0 %v7495_v51  ;;  %v7515_v20 = vpop.f32.mrb[56].mxu1 }
 0x727   :  { %5309 = vmatprep.subr.bf16.mxu1 %v5951_v7  ;;  %5369 = vmatprep.subr.bf16.mxu0 %v5951_v7  ;;  %v5277_v21 = vpop.f32.mrb[57].mxu1  ;;  %v3011_v42 = vpack.c.bf16 %v7515_v20, %v7515_v20 }
 0x728   :  { %v3008_v22 = vpop.f32.mrb[58].mxu1 }
 0x729   :  { %v5278_v4 = vpop.f32.mrb[59].mxu1 }
 0x72a   :  { %5310 = vmatpush3.bf16.msra.mxu1 %v7508_v52  ;;  %5370 = vmatpush3.bf16.msra.mxu0 %v7513_v19  ;;  %v4711_v4 = vld [vmem:[%s7921_s12] ss:$0 sm:$0xff] }
 0x72b   :  { %5311 = vmatprep.subr.bf16.mxu1 %v5951_v7  ;;  %5371 = vmatprep.subr.bf16.mxu0 %v5951_v7 }
 0x72e   :  { %5312 = vmatpush3.bf16.msra.mxu1 %v7524_v5  ;;  %5372 = vmatpush3.bf16.msra.mxu0 %v7529_v13  ;;  %v7589_v24 = vpop.f32.mrb[60].mxu1 }
 0x72f   :  { %5313 = vmatprep.subr.bf16.mxu1 %v5951_v7  ;;  %5373 = vmatprep.subr.bf16.mxu0 %v5951_v7  ;;  %v5283_v25 = vpop.f32.mrb[61].mxu1 }
 0x730   :  { %v3054_v26 = vpop.f32.mrb[62].mxu1 }
 0x731   :  { %v5284_v35 = vpop.f32.mrb[63].mxu1 }
 0x732   :  { %5314 = vmatpush3.bf16.msra.mxu1 %v7538_v14  ;;  %5374 = vmatpush3.bf16.msra.mxu0 %v7543_v15 }
 0x733   :  { %5315 = vmatprep.subr.bf16.mxu1 %v5951_v7  ;;  %5375 = vmatprep.subr.bf16.mxu0 %v5951_v7 }
 0x736   :  { %5316 = vmatpush3.bf16.msra.mxu1 %v7552_v16  ;;  %5376 = vmatpush3.bf16.msra.mxu0 %v7557_v53 }
 0x737   :  { %5317 = vmatprep.subr.bf16.mxu1 %v5951_v7  ;;  %5377 = vmatprep.subr.bf16.mxu0 %v5951_v7 }
 0x73a   :  { %5318 = vmatpush3.bf16.msra.mxu1 %v7566_v54  ;;  %5378 = vmatpush3.bf16.msra.mxu0 %v7571_v55 }
 0x73b   :  { %5319 = vmatprep.subr.bf16.mxu1 %v5951_v7  ;;  %5379 = vmatprep.subr.bf16.mxu0 %v5951_v7 }
 0x73e   :  { %5320 = vmatpush3.bf16.msra.mxu1 %v7580_v56  ;;  %5380 = vmatpush3.bf16.msra.mxu0 %v7585_v23 }
 0x73f   :  { %5325 = vmatprep.subr.bf16.mxu1 %v5951_v7  ;;  %5385 = vmatprep.subr.bf16.mxu0 %v5951_v7 }
 0x741   :  { %5322 = vmatmul.mubr.bf16.vlgmr.msra.gmra.mrb[64].mxu1 %v2919_v36  ;;  %5382 = vmatmul.mubr.bf16.vlgmr.msra.gmra.mrb[24].mxu0 %v2919_v36 }
 0x742   :  { %5326 = vmatpush3.bf16.msra.mxu1 %v7596_v27  ;;  %5386 = vmatpush3.bf16.msra.mxu0 %v7601_v29 }
 0x743   :  { %5327 = vmatprep.subr.bf16.mxu1 %v5951_v7  ;;  %5387 = vmatprep.subr.bf16.mxu0 %v5951_v7 }
 0x744   :  { %5341 = vmatprep.mubr.msk.bf16.mxu1 %vm5952_vm4, %v5951_v7  ;;  %5401 = vmatprep.mubr.msk.bf16.mxu0 %vm5952_vm4, %v5951_v7 }
 0x746   :  { %5328 = vmatpush3.bf16.msra.mxu1 %v7612_v37  ;;  %5388 = vmatpush3.bf16.msra.mxu0 %v7617_v39 }
 0x747   :  { %5329 = vmatprep.subr.bf16.mxu1 %v5951_v7  ;;  %5389 = vmatprep.subr.bf16.mxu0 %v5951_v7 }
 0x74a   :  { %5330 = vmatpush3.bf16.msra.mxu1 %v7630_v61  ;;  %5390 = vmatpush3.bf16.msra.mxu0 %v7635_v6 }
 0x74b   :  { %5331 = vmatprep.subr.bf16.mxu1 %v5951_v7  ;;  %5391 = vmatprep.subr.bf16.mxu0 %v5951_v7 }
 0x74e   :  { %5332 = vmatpush3.bf16.msra.mxu1 %v7644_v8  ;;  %5392 = vmatpush3.bf16.msra.mxu0 %v7649_v9 }
 0x74f   :  { %5333 = vmatprep.subr.bf16.mxu1 %v5951_v7  ;;  %5393 = vmatprep.subr.bf16.mxu0 %v5951_v7 }
 0x752   :  { %5334 = vmatpush3.bf16.msra.mxu1 %v7658_v10  ;;  %5394 = vmatpush3.bf16.msra.mxu0 %v7663_v11 }
 0x753   :  { %5335 = vmatprep.subr.bf16.mxu1 %v5951_v7  ;;  %5395 = vmatprep.subr.bf16.mxu0 %v5951_v7 }
 0x756   :  { %5336 = vmatpush3.bf16.msra.mxu1 %v7672_v12  ;;  %5396 = vmatpush3.bf16.msra.mxu0 %v7677_v0 }
 0x757   :  { %5337 = vmatprep.subr.bf16.mxu1 %v5951_v7  ;;  %5397 = vmatprep.subr.bf16.mxu0 %v5951_v7 }
 0x75a   :  { %5338 = vmatpush3.bf16.msra.mxu1 %v7686_v1  ;;  %5398 = vmatpush3.bf16.msra.mxu0 %v7691_v38 }
 0x75b   :  { %5339 = vmatprep.subr.bf16.mxu1 %v5951_v7  ;;  %5399 = vmatprep.subr.bf16.mxu0 %v5951_v7 }
 0x75e   :  { %5340 = vmatpush3.bf16.msra.mxu1 %v7700_v40  ;;  %5400 = vmatpush3.bf16.msra.mxu0 %v7705_v41 }
 0x75f   :  { %5405 = vmatprep.subr.bf16.mxu1 %v5951_v7  ;;  %5465 = vmatprep.subr.bf16.mxu0 %v5951_v7 }
 0x761   :  { %5342 = vmatmul.mubr.bf16.vlgmr.msra.gmra.mrb[64].mxu1 %v3011_v42  ;;  %5402 = vmatmul.mubr.bf16.vlgmr.msra.gmra.mrb[24].mxu0 %v3011_v42 }
 0x762   :  { %5406 = vmatpush3.bf16.msra.mxu1 %v7399_v2  ;;  %5466 = vmatpush3.bf16.msra.mxu0 %v7328_v57  ;;  %v3057_v57 = vpack.c.bf16 %v7589_v24, %v7589_v24  ;;  %v5937_v2 = vld [vmem:[%s7920_s13 + $0x50] sm:$0xff]  }
 0x763   :  { %5407 = vmatprep.subr.bf16.mxu1 %v5951_v7  ;;  %5467 = vmatprep.subr.bf16.mxu0 %v5951_v7 }
 0x764   :  { %5421 = vmatprep.mubr.msk.bf16.mxu1 %vm5952_vm4, %v5951_v7  ;;  %5481 = vmatprep.mubr.msk.bf16.mxu0 %vm5952_vm4, %v5951_v7 }
 0x766   :  { %5408 = vmatpush3.bf16.msra.mxu1 %v7406_v3  ;;  %5468 = vmatpush3.bf16.msra.mxu0 %v7335_v58  ;;  %v5932_v58 = vld [vmem:[%s7920_s13] sm:$0xff]   ;;  %v5938_v3 = vld [vmem:[%s7920_s13 + $0x18] sm:$0xff]  }
 0x767   :  { %5409 = vmatprep.subr.bf16.mxu1 %v5951_v7  ;;  %5469 = vmatprep.subr.bf16.mxu0 %v5951_v7 }
 0x76a   :  { %5410 = vmatpush3.bf16.msra.mxu1 %v7415_v17  ;;  %5470 = vmatpush3.bf16.msra.mxu0 %v7342_v59  ;;  %v5933_v59 = vld [vmem:[%s7920_s13 + $0x40] sm:$0xff]   ;;  %v5939_v17 = vld [vmem:[%s7920_s13 + $0x58] sm:$0xff]  }
 0x76b   :  { %5411 = vmatprep.subr.bf16.mxu1 %v5951_v7  ;;  %5471 = vmatprep.subr.bf16.mxu0 %v5951_v7 }
 0x76e   :  { %5412 = vmatpush3.bf16.msra.mxu1 %v7422_v18  ;;  %5472 = vmatpush3.bf16.msra.mxu0 %v7349_v60  ;;  %v5934_v60 = vld [vmem:[%s7920_s13 + $0x8] sm:$0xff]   ;;  %v5940_v18 = vld [vmem:[%s7920_s13 + $0x20] sm:$0xff]  }
 0x76f   :  { %5413 = vmatprep.subr.bf16.mxu1 %v5951_v7  ;;  %5473 = vmatprep.subr.bf16.mxu0 %v5951_v7 }
 0x772   :  { %5414 = vmatpush3.bf16.msra.mxu1 %v7429_v28  ;;  %5474 = vmatpush3.bf16.msra.mxu0 %v7356_v62  ;;  %v5935_v62 = vld [vmem:[%s7920_s13 + $0x48] sm:$0xff]   ;;  %v5941_v28 = vld [vmem:[%s7920_s13 + $0x60] sm:$0xff]  }
 0x773   :  { %5415 = vmatprep.subr.bf16.mxu1 %v5951_v7  ;;  %5475 = vmatprep.subr.bf16.mxu0 %v5951_v7 }
 0x776   :  { %5416 = vmatpush3.bf16.msra.mxu1 %v7436_v30  ;;  %5476 = vmatpush3.bf16.msra.mxu0 %v7363_v63  ;;  %v5936_v63 = vld [vmem:[%s7920_s13 + $0x10] sm:$0xff]   ;;  %v5942_v30 = vld [vmem:[%s7920_s13 + $0x28] sm:$0xff]  }
 0x777   :  { %5417 = vmatprep.subr.bf16.mxu1 %v5951_v7  ;;  %5477 = vmatprep.subr.bf16.mxu0 %v5951_v7 }
 0x77a   :  { %5418 = vmatpush3.bf16.msra.mxu1 %v7444_v31  ;;  %5478 = vmatpush3.bf16.msra.mxu0 %v7449_v32  ;;  %v5943_v31 = vld [vmem:[%s7920_s13 + $0x68] sm:$0xff]   ;;  %v5944_v32 = vld [vmem:[%s7920_s13 + $0x30] sm:$0xff]  }
 0x77b   :  { %5419 = vmatprep.subr.bf16.mxu1 %v5951_v7  ;;  %5479 = vmatprep.subr.bf16.mxu0 %v5951_v7 }
 0x77e   :  { %5420 = vmatpush3.bf16.msra.mxu1 %v7456_v33  ;;  %5480 = vmatpush3.bf16.msra.mxu0 %v7461_v34  ;;  %v5945_v33 = vld [vmem:[%s7920_s13 + $0x70] sm:$0xff]   ;;  %v5946_v34 = vld [vmem:[%s7920_s13 + $0x38] sm:$0xff]  }
 0x77f   :  { %5425 = vmatprep.subr.bf16.mxu1 %v5951_v7  ;;  %5485 = vmatprep.subr.bf16.mxu0 %v5951_v7 }
 0x781   :  { %5422 = vmatmul.mubr.bf16.vlgmr.msra.gmra.mrb[68].mxu1 %v3011_v42  ;;  %5482 = vmatmul.mubr.bf16.vlgmr.msra.gmra.mrb[28].mxu0 %v3011_v42 }
 0x782   :  { %5426 = vmatpush3.bf16.msra.mxu1 %v7474_v44  ;;  %5486 = vmatpush3.bf16.msra.mxu0 %v7479_v45 }
 0x783   :  { %5427 = vmatprep.subr.bf16.mxu1 %v5951_v7  ;;  %5487 = vmatprep.subr.bf16.mxu0 %v5951_v7 }
 0x784   :  { %5441 = vmatprep.mubr.msk.bf16.mxu1 %vm5952_vm4, %v5951_v7  ;;  %5501 = vmatprep.mubr.msk.bf16.mxu0 %vm5952_vm4, %v5951_v7 }
 0x786   :  { %5428 = vmatpush3.bf16.msra.mxu1 %v7490_v50  ;;  %5488 = vmatpush3.bf16.msra.mxu0 %v7495_v51 }
 0x787   :  { %5429 = vmatprep.subr.bf16.mxu1 %v5951_v7  ;;  %5489 = vmatprep.subr.bf16.mxu0 %v5951_v7 }
 0x78a   :  { %5430 = vmatpush3.bf16.msra.mxu1 %v7508_v52  ;;  %5490 = vmatpush3.bf16.msra.mxu0 %v7513_v19 }
 0x78b   :  { %5431 = vmatprep.subr.bf16.mxu1 %v5951_v7  ;;  %5491 = vmatprep.subr.bf16.mxu0 %v5951_v7 }
 0x78e   :  { %5432 = vmatpush3.bf16.msra.mxu1 %v7524_v5  ;;  %5492 = vmatpush3.bf16.msra.mxu0 %v7529_v13 }
 0x78f   :  { %5433 = vmatprep.subr.bf16.mxu1 %v5951_v7  ;;  %5493 = vmatprep.subr.bf16.mxu0 %v5951_v7 }
 0x792   :  { %5434 = vmatpush3.bf16.msra.mxu1 %v7538_v14  ;;  %5494 = vmatpush3.bf16.msra.mxu0 %v7543_v15 }
 0x793   :  { %5435 = vmatprep.subr.bf16.mxu1 %v5951_v7  ;;  %5495 = vmatprep.subr.bf16.mxu0 %v5951_v7 }
 0x796   :  { %5436 = vmatpush3.bf16.msra.mxu1 %v7552_v16  ;;  %5496 = vmatpush3.bf16.msra.mxu0 %v7557_v53 }
 0x797   :  { %5437 = vmatprep.subr.bf16.mxu1 %v5951_v7  ;;  %5497 = vmatprep.subr.bf16.mxu0 %v5951_v7 }
 0x79a   :  { %5438 = vmatpush3.bf16.msra.mxu1 %v7566_v54  ;;  %5498 = vmatpush3.bf16.msra.mxu0 %v7571_v55 }
 0x79b   :  { %5439 = vmatprep.subr.bf16.mxu1 %v5951_v7  ;;  %5499 = vmatprep.subr.bf16.mxu0 %v5951_v7 }
 0x79e   :  { %5440 = vmatpush3.bf16.msra.mxu1 %v7580_v56  ;;  %5500 = vmatpush3.bf16.msra.mxu0 %v7585_v23  ;;  %v22_v23 = vstv %s7922_s16 }
 0x79f   :  { %5445 = vmatprep.subr.bf16.mxu1 %v5951_v7  ;;  %5505 = vmatprep.subr.bf16.mxu0 %v5951_v7  ;;  %23 = vst [vmem:[#allocation2] sm:$0x1] %v22_v23 }
 0x7a1   :  { %5442 = vmatmul.mubr.bf16.vlgmr.msra.gmra.mrb[68].mxu1 %v7481_v46  ;;  %5502 = vmatmul.mubr.bf16.vlgmr.msra.gmra.mrb[28].mxu0 %v7481_v46 }
 0x7a2   :  { %5446 = vmatpush3.bf16.msra.mxu1 %v7596_v27  ;;  %5506 = vmatpush3.bf16.msra.mxu0 %v7601_v29  ;;  %v4744_v27 = vld [vmem:[%s7923_s14] ss:$0 sm:$0xff] }
 0x7a3   :  { %5447 = vmatprep.subr.bf16.mxu1 %v5951_v7  ;;  %5507 = vmatprep.subr.bf16.mxu0 %v5951_v7 }
 0x7a4   :  { %5461 = vmatprep.mubr.msk.bf16.mxu1 %vm5952_vm4, %v5951_v7  ;;  %5521 = vmatprep.mubr.msk.bf16.mxu0 %vm5952_vm4, %v5951_v7 }
 0x7a6   :  { %5448 = vmatpush3.bf16.msra.mxu1 %v7612_v37  ;;  %5508 = vmatpush3.bf16.msra.mxu0 %v7617_v39 }
 0x7a7   :  { %5449 = vmatprep.subr.bf16.mxu1 %v5951_v7  ;;  %5509 = vmatprep.subr.bf16.mxu0 %v5951_v7 }
 0x7aa   :  { %5450 = vmatpush3.bf16.msra.mxu1 %v7630_v61  ;;  %5510 = vmatpush3.bf16.msra.mxu0 %v7635_v6 }
 0x7ab   :  { %5451 = vmatprep.subr.bf16.mxu1 %v5951_v7  ;;  %5511 = vmatprep.subr.bf16.mxu0 %v5951_v7 }
 0x7ae   :  { %5452 = vmatpush3.bf16.msra.mxu1 %v7644_v8  ;;  %5512 = vmatpush3.bf16.msra.mxu0 %v7649_v9  ;;  %v4745_v8 = vld [vmem:[%s7924_s15] ss:$0 sm:$0xff] }
 0x7af   :  { %5453 = vmatprep.subr.bf16.mxu1 %v5951_v7  ;;  %5513 = vmatprep.subr.bf16.mxu0 %v5951_v7 }
 0x7b2   :  { %5454 = vmatpush3.bf16.msra.mxu1 %v7658_v10  ;;  %5514 = vmatpush3.bf16.msra.mxu0 %v7663_v11 }
 0x7b3   :  { %5455 = vmatprep.subr.bf16.mxu1 %v5951_v7  ;;  %5515 = vmatprep.subr.bf16.mxu0 %v5951_v7 }
 0x7b6   :  { %5456 = vmatpush3.bf16.msra.mxu1 %v7672_v12  ;;  %5516 = vmatpush3.bf16.msra.mxu0 %v7677_v0  ;;  %v4746_v12 = vld [vmem:[#allocation2] ss:$0 sm:$0xff] }
 0x7b7   :  { %5457 = vmatprep.subr.bf16.mxu1 %v5951_v7  ;;  %5517 = vmatprep.subr.bf16.mxu0 %v5951_v7 }
 0x7ba   :  { %5458 = vmatpush3.bf16.msra.mxu1 %v7686_v1  ;;  %5518 = vmatpush3.bf16.msra.mxu0 %v7691_v38 }
 0x7bb   :  { %5459 = vmatprep.subr.bf16.mxu1 %v5951_v7  ;;  %5519 = vmatprep.subr.bf16.mxu0 %v5951_v7 }
 0x7be   :  { %5460 = vmatpush3.bf16.msra.mxu1 %v7700_v40  ;;  %5520 = vmatpush3.bf16.msra.mxu0 %v7705_v41 }
 0x7bf   :  { %5545 = vmatprep.subr.bf16.mxu0 %v5951_v7  ;;  %5525 = vmatprep.subr.bf16.mxu1 %v5951_v7 }
 0x7c1   :  { %5462 = vmatmul.mubr.bf16.vlgmr.msra.gmra.mrb[68].mxu1 %v3057_v57  ;;  %5522 = vmatmul.mubr.bf16.vlgmr.msra.gmra.mrb[28].mxu0 %v3057_v57 }
 0x7c2   :  { %5546 = vmatpush3.bf16.msra.mxu0 %v5932_v58  ;;  %5526 = vmatpush3.bf16.msra.mxu1 %v5933_v59 }
 0x7c3   :  { %5547 = vmatprep.subr.bf16.mxu0 %v5951_v7  ;;  %5527 = vmatprep.subr.bf16.mxu1 %v5951_v7 }
 0x7c4   :  { %5561 = vmatprep.mubr.msk.bf16.mxu0 %vm5952_vm4, %v5951_v7  ;;  %5541 = vmatprep.mubr.msk.bf16.mxu1 %vm5952_vm4, %v5951_v7 }
 0x7c6   :  { %5548 = vmatpush3.bf16.msra.mxu0 %v5934_v60  ;;  %5528 = vmatpush3.bf16.msra.mxu1 %v5935_v62 }
 0x7c7   :  { %5549 = vmatprep.subr.bf16.mxu0 %v5951_v7  ;;  %5529 = vmatprep.subr.bf16.mxu1 %v5951_v7 }
 0x7ca   :  { %5550 = vmatpush3.bf16.msra.mxu0 %v5936_v63  ;;  %5530 = vmatpush3.bf16.msra.mxu1 %v5937_v2 }
 0x7cb   :  { %5551 = vmatprep.subr.bf16.mxu0 %v5951_v7  ;;  %5531 = vmatprep.subr.bf16.mxu1 %v5951_v7 }
 0x7ce   :  { %5552 = vmatpush3.bf16.msra.mxu0 %v5938_v3  ;;  %5532 = vmatpush3.bf16.msra.mxu1 %v5939_v17 }
 0x7cf   :  { %5553 = vmatprep.subr.bf16.mxu0 %v5951_v7  ;;  %5533 = vmatprep.subr.bf16.mxu1 %v5951_v7 }
 0x7d2   :  { %5554 = vmatpush3.bf16.msra.mxu0 %v5940_v18  ;;  %5534 = vmatpush3.bf16.msra.mxu1 %v5941_v28 }
 0x7d3   :  { %5555 = vmatprep.subr.bf16.mxu0 %v5951_v7  ;;  %5535 = vmatprep.subr.bf16.mxu1 %v5951_v7 }
 0x7d6   :  { %5556 = vmatpush3.bf16.msra.mxu0 %v5942_v30  ;;  %5536 = vmatpush3.bf16.msra.mxu1 %v5943_v31 }
 0x7d7   :  { %5557 = vmatprep.subr.bf16.mxu0 %v5951_v7  ;;  %5537 = vmatprep.subr.bf16.mxu1 %v5951_v7 }
 0x7da   :  { %5558 = vmatpush3.bf16.msra.mxu0 %v5944_v32  ;;  %5538 = vmatpush3.bf16.msra.mxu1 %v5945_v33 }
 0x7db   :  { %5559 = vmatprep.subr.bf16.mxu0 %v5951_v7  ;;  %5539 = vmatprep.subr.bf16.mxu1 %v5951_v7 }
 0x7de   :  { %5560 = vmatpush3.bf16.msra.mxu0 %v5946_v34  ;;  %5540 = vmatpush3.bf16.msra.mxu1 %v5947_v43 }
 0x834   :  { %v3366_v44 = vpop.f32.mrb[64].mxu1  ;;  %v3682_v45 = vpop.f32.mrb[24].mxu0 }
 0x835   :  { %v3689_v46 = vmax.f32 %v3366_v44, %v3682_v45  ;;  %v5343_v47 = vpop.f32.mrb[65].mxu1  ;;  %v5403_v48 = vpop.f32.mrb[25].mxu0 }
 0x836   :  { %v3369_v49 = vpop.f32.mrb[66].mxu1  ;;  %v3685_v50 = vpop.f32.mrb[26].mxu0 }
 0x837   :  { %v5344_v51 = vpop.f32.mrb[67].mxu1  ;;  %v5404_v52 = vpop.f32.mrb[27].mxu0 }
 0x894   :  { %v3804_v19 = vpop.f32.mrb[68].mxu1  ;;  %v3926_v20 = vpop.f32.mrb[28].mxu0 }
 0x895   :  { %v3811_v21 = vmax.f32 %v3689_v46, %v3804_v19  ;;  %v5463_v22 = vpop.f32.mrb[69].mxu1  ;;  %v5523_v7 = vpop.f32.mrb[29].mxu0 }
 0x896   :  { %v3807_v5 = vpop.f32.mrb[70].mxu1  ;;  %v3929_v13 = vpop.f32.mrb[30].mxu0 }
 0x897   :  { %v3933_v14 = vmax.f32 %v3811_v21, %v3926_v20  ;;  %v5464_v15 = vpop.f32.mrb[71].mxu1  ;;  %v5524_v16 = vpop.f32.mrb[31].mxu0 }
 0x899   :  { %v3941_v53 = vadd.f32 %v4711_v4, %v3933_v14 }
 0x89b   :  { %v3942_v54 = vmax.f32 %v3941_v53, 0.0 }
 0x89d   :  { %v3943_v55 = vpack.c.bf16 %v3942_v54, %v3942_v54 }
 0x89f   :  { %v3978_v56 = vrot.slane %v3943_v55, 1  ;;  %5562 = vmatmul.mubr.bf16.vlgmr.msra.gmra.mrb[32].mxu0 %v3943_v55 }
 0x8a1   :  { %5542 = vmatmul.mubr.bf16.vlgmr.msra.gmra.mrb[72].mxu1 %v3978_v56 }
 0x972   :  { %v4150_v24 = vpop.f32.mrb[32].mxu0 }
 0x973   :  { %v5563_v25 = vpop.f32.mrb[33].mxu0 }
 0x974   :  { %v4062_v26 = vpop.f32.mrb[72].mxu1  ;;  %v4153_v29 = vpop.f32.mrb[34].mxu0 }
 0x975   :  { %v4151_v35 = vadd.f32 %v4150_v24, %v4062_v26  ;;  %v5543_v36 = vpop.f32.mrb[73].mxu1  ;;  %v5564_v37 = vpop.f32.mrb[35].mxu0 }
 0x976   :  { %v4065_v39 = vpop.f32.mrb[74].mxu1 }
 0x977   :  { %v4163_v61 = vadd.f32 %v4744_v27, %v4151_v35  ;;  %v5544_v6 = vpop.f32.mrb[75].mxu1 }
 0x979   :  { %v4164_v9 = vmax.f32 %v4163_v61, 0.0 }
 0x97b   :  { %v4172_v10 = vmul.f32 %v4745_v8, %v4164_v9 }
 0x97d   :  { %v4174_v11 = vsel %vm4173_vm6, %v4172_v10, 0.0 }
 0x97e   :  { %4175 = vadd.xlane.f32.xlu0 %v4174_v11 }
 0xa0b   :  { %v4176_v0 = vpop.xlane.xlu0 %4175 }
 0xa0c   :  { %v4184_v1 = vadd.f32 %v4746_v12, %v4176_v0 }
 0xa0e   :  { %v4185_v38 = vmul.f32 0.5, %v4184_v1 }
 0xa10   :  { %5948 = vtanh.f32 %v4185_v38 }
 0xa1a   :  { %v5949_v40 = vpop.eup %5948 }
 0xa1b   :  { %v4187_v41 = vadd.f32 1.0, %v5949_v40 }
 0xa1d   :  { %v4188_v42 = vmul.f32 0.5, %v4187_v41 }
 0xa1f   :  { %4190 = vst.msk [vmem:[%s7925_s17] sm:$0x3] %vm4189_vm7, %v4188_v42 }

</bundles_post_ra>
